<compile_context>
chip_gen: v7x
topology: tpu7x:2x2x1
jax: 0.10.0
libtpu: 0.0.40
codegen_flags: <defaults>
</compile_context>

<pallas_src>
import functools

import jax
import jax.numpy as jnp
from jax import lax
from jax.experimental import pallas as pl
from jax.experimental.pallas import tpu as pltpu


def _sigmoid(x):
    # 1/(1+exp(-x)) == 0.5*tanh(0.5*x)+0.5 ; tanh runs on the otherwise-idle EUP.
    return 0.5 * jnp.tanh(0.5 * x) + 0.5


def _round_up(n, m):
    return -(-n // m) * m


# ----------------------------------------------------------------------------
# One-time weight lowering (plain XLA ops, kept OUT of the per-step jit).
# Produces a flat list of (W bf16 (K, N), b f32 (1, N)) operands, one pair per
# fused layer, plus static metadata describing the layer sequence.
# ----------------------------------------------------------------------------
def build_newnet_operands(params, *, in_h, in_w, l_out_long, l_out_short,
                          stride=1, dilation=1, pad1d=2):
    conv_wb = params["conv2d"]
    fc_wb = list(params["fc"]) + [params["fc_final"]]
    w_long, b_long = params["cnn1d_long"]
    w_short, b_short = params["cnn1d_short"]

    long_leads = w_long.shape[0]
    short_leads = w_short.shape[0]
    out_dim_long = long_leads * l_out_long
    out_dim_short = short_leads * l_out_short
    out_dim = out_dim_long + out_dim_short
    assert fc_wb[-1][0].shape[1] == out_dim
    out_pad = _round_up(out_dim, 128)          # lane-dense final store

    operands = []                              # [W0, b0, W1, b1, ...]
    kinds = []                                 # "relu" / "sigmoid" per layer

    # --- conv2d stack: exact lowered matrices (Cin*H*W, Cout*OH*OW), built by
    #     pushing a one-hot basis through lax.conv (matches torch Conv2d). ---
    c_in = conv_wb[0][0].shape[1]
    h, w = in_h, in_w
    k0 = c_in * h * w
    for (wc, bc) in conv_wb:
        c_out, ci_w, kh, kw = wc.shape
        assert ci_w == c_in
        oh = (h - dilation * (kh - 1) - 1) // stride + 1
        ow = (w - dilation * (kw - 1) - 1) // stride + 1
        din = c_in * h * w
        eye = jnp.eye(din, dtype=jnp.float32).reshape(din, c_in, h, w)
        m = lax.conv_general_dilated(
            eye, wc, window_strides=(stride, stride), padding="VALID",
            rhs_dilation=(dilation, dilation),
            dimension_numbers=("NCHW", "OIHW", "NCHW"))
        m = m.reshape(din, c_out * oh * ow)                       # NCHW flatten
        operands += [m.astype(jnp.bfloat16),
                     jnp.repeat(bc, oh * ow).reshape(1, -1).astype(jnp.float32)]
        kinds.append("relu")
        c_in, h, w = c_out, oh, ow

    # conv output flatten order (C, OH, OW) matches torch's .reshape(B, -1)
    assert fc_wb[0][0].shape[0] == c_in * h * w

    # --- hidden FC layers (ReLU) ---
    for (wf, bf) in fc_wb[:-1]:
        operands += [wf.astype(jnp.bfloat16),
                     bf.reshape(1, -1).astype(jnp.float32)]
        kinds.append("relu")

    # --- final FC (sigmoid), zero-padded to out_pad output lanes ---
    wf, bf = fc_wb[-1]
    wf_p = jnp.zeros((wf.shape[0], out_pad), jnp.float32).at[:, :out_dim].set(wf)
    bf_p = jnp.zeros((1, out_pad), jnp.float32).at[:, :out_dim].set(bf)
    operands += [wf_p.astype(jnp.bfloat16), bf_p]
    kinds.append("sigmoid")

    # --- both 1-D convs as ONE block-banded matmul + sigmoid ---
    def conv1d_matrix(wc, leads, length):
        d = leads * length
        eye = jnp.eye(d, dtype=jnp.float32).reshape(d, leads, length)
        y = lax.conv_general_dilated(
            eye, wc, window_strides=(1,), padding=[(pad1d, pad1d)],
            dimension_numbers=("NCH", "OIH", "NCH"))
        return y.reshape(d, d)

    band = jnp.zeros((out_pad, out_pad), jnp.float32)
    band = band.at[:out_dim_long, :out_dim_long].set(
        conv1d_matrix(w_long, long_leads, l_out_long))
    band = band.at[out_dim_long:out_dim, out_dim_long:out_dim].set(
        conv1d_matrix(w_short, short_leads, l_out_short))
    b_band = jnp.zeros((1, out_pad), jnp.float32)
    b_band = b_band.at[0, :out_dim_long].set(jnp.repeat(b_long, l_out_long))
    b_band = b_band.at[0, out_dim_long:out_dim].set(jnp.repeat(b_short, l_out_short))
    operands += [band.astype(jnp.bfloat16), b_band]
    kinds.append("sigmoid")

    meta = dict(k0=k0, out_dim=out_dim, out_dim_long=out_dim_long, out_pad=out_pad,
                long_leads=long_leads, short_leads=short_leads,
                l_out_long=l_out_long, l_out_short=l_out_short,
                layer_kinds=tuple(kinds))
    return operands, meta


# ----------------------------------------------------------------------------
# Fused kernel: one batch row per grid step, all layers as MXU matmuls.
# ----------------------------------------------------------------------------
def _make_kernel(layer_kinds):
    n_layers = len(layer_kinds)

    def kernel(x_ref, *rest):
        out_ref = rest[-1]
        wb = rest[:-1]
        v = x_ref[0]                                           # (1, K0) bf16
        for li, kind in enumerate(layer_kinds):
            w_r, b_r = wb[2 * li], wb[2 * li + 1]
            z = jnp.dot(v, w_r[...],
                        preferred_element_type=jnp.float32) + b_r[...]
            a = jnp.maximum(z, 0.0) if kind == "relu" else _sigmoid(z)
            if li < n_layers - 1:
                v = a.astype(jnp.bfloat16)                     # bf16 in, f32 acc
            else:
                out_ref[0] = a                                 # (1, out_pad) f32

    return kernel


def newnet_forward(operands, x, *, meta):
    """NewNet inference (conv_dropout=None, batch_norm=False), fully fused."""
    B = x.shape[0]
    k0, out_pad = meta["k0"], meta["out_pad"]
    out_dim, out_dim_long = meta["out_dim"], meta["out_dim_long"]

    # NCHW flatten outside the kernel (free XLA reshape); bf16 for the MXU.
    x_flat = x.reshape(B, 1, k0).astype(jnp.bfloat16)

    in_specs = [pl.BlockSpec((1, 1, k0), lambda i: (i, 0, 0))]
    # Weights/biases: full-array blocks at a constant index -> fetched once,
    # resident in VMEM across all (parallel) batch grid steps.
    in_specs += [pl.BlockSpec(op.shape, lambda i: (0, 0)) for op in operands]

    res = pl.pallas_call(
        _make_kernel(meta["layer_kinds"]),
        out_shape=jax.ShapeDtypeStruct((B, 1, out_pad), jnp.float32),
        grid=(B,),
        in_specs=in_specs,
        out_specs=pl.BlockSpec((1, 1, out_pad), lambda i: (i, 0, 0)),
        compiler_params=pltpu.CompilerParams(
            dimension_semantics=("parallel",),        # megacore on v7x
            vmem_limit_bytes=32 * 1024 * 1024),       # ~2.3 MB resident weights
    )(x_flat, *operands)

    out_flat = res.reshape(B, out_pad)[:, :out_dim]
    out_long = out_flat[:, :out_dim_long].reshape(
        B, meta["long_leads"], meta["l_out_long"])
    out_short = out_flat[:, out_dim_long:].reshape(
        B, meta["short_leads"], meta["l_out_short"])
    return out_short, out_long


# ----------------------------------------------------------------------------
# Pure-JAX reference (for a correctness check only)
# ----------------------------------------------------------------------------
def newnet_reference(params, x, *, l_out_long, l_out_short, stride=1, dilation=1):
    B = x.shape[0]
    out = x
    for wc, bc in params["conv2d"]:
        out = lax.conv_general_dilated(
            out, wc, window_strides=(stride, stride), padding="VALID",
            rhs_dilation=(dilation, dilation),
            dimension_numbers=("NCHW", "OIHW", "NCHW"))
        out = jax.nn.relu(out + bc[None, :, None, None])
    out = out.reshape(B, -1)
    for wf, bf in params["fc"]:
        out = jax.nn.relu(out @ wf + bf)
    wf, bf = params["fc_final"]
    out = jax.nn.sigmoid(out @ wf + bf)

    long_leads = params["cnn1d_long"][0].shape[0]
    short_leads = params["cnn1d_short"][0].shape[0]
    odl = long_leads * l_out_long
    out_long = out[:, :odl].reshape(B, long_leads, l_out_long)
    out_short = out[:, odl:].reshape(B, short_leads, l_out_short)

    def c1d(z, wc, bc):
        y = lax.conv_general_dilated(
            z, wc, window_strides=(1,), padding=[(2, 2)],
            dimension_numbers=("NCH", "OIH", "NCH"))
        return jax.nn.sigmoid(y + bc[None, :, None])

    out_long = c1d(out_long, *params["cnn1d_long"])
    out_short = c1d(out_short, *params["cnn1d_short"])
    return out_short, out_long


# ----------------------------------------------------------------------------
# Parameter init (deterministic, PyTorch-like uniform(-1/sqrt(fan_in), +))
# ----------------------------------------------------------------------------
def _uniform(key, shape, fan_in):
    bound = 1.0 / (fan_in ** 0.5)
    return jax.random.uniform(key, shape, jnp.float32, -bound, bound)


def init_newnet_params(key, in_channels, conv_hidden_channels, conv_kernel_sizes,
                       in_h, in_w, fc_hidden_dims, out_dim, short_leads, long_leads):
    params = {"conv2d": [], "fc": []}
    c_in = in_channels
    h, w = in_h, in_w
    for c_out, k in zip(conv_hidden_channels, conv_kernel_sizes):
        key, k1, k2 = jax.random.split(key, 3)
        fan_in = c_in * k * k
        params["conv2d"].append((_uniform(k1, (c_out, c_in, k, k), fan_in),
                                 _uniform(k2, (c_out,), fan_in)))
        c_in = c_out
        h -= (k - 1)
        w -= (k - 1)
    in_dim = c_in * h * w
    for d in fc_hidden_dims:
        key, k1, k2 = jax.random.split(key, 3)
        params["fc"].append((_uniform(k1, (in_dim, d), in_dim), _uniform(k2, (d,), in_dim)))
        in_dim = d
    # TODO(synk): the reference Ecg12ImageNet head emits nn.Linear(in_dim, 1) when
    # num_of_classes != 2, which makes NewNet.forward's slice/reshape to
    # (B, leads, length) shape-inconsistent; we follow the evident intent and emit
    # out_dim features (Linear(in_dim, out_dim) + Sigmoid) so the model runs.
    key, k1, k2 = jax.random.split(key, 3)
    params["fc_final"] = (_uniform(k1, (in_dim, out_dim), in_dim),
                          _uniform(k2, (out_dim,), in_dim))
    key, k1, k2 = jax.random.split(key, 3)
    params["cnn1d_long"] = (_uniform(k1, (long_leads, long_leads, 5), long_leads * 5),
                            _uniform(k2, (long_leads,), long_leads * 5))
    key, k1, k2 = jax.random.split(key, 3)
    params["cnn1d_short"] = (_uniform(k1, (short_leads, short_leads, 5), short_leads * 5),
                             _uniform(k2, (short_leads,), short_leads * 5))
    return params


# ----------------------------------------------------------------------------
if __name__ == "__main__":
    # Small, self-consistent configuration
    B = 2
    in_channels, in_h, in_w = 1, 16, 16
    conv_hidden_channels = [4, 8]
    conv_kernel_sizes = [3, 3]
    fc_hidden_dims = (32,)
    l_out_long, l_out_short = 16, 8
    long_leads, short_leads = 1, 4
    out_dim = l_out_long * long_leads + l_out_short * short_leads  # 48

    key = jax.random.PRNGKey(0)
    key, pkey, xkey = jax.random.split(key, 3)
    params = init_newnet_params(pkey, in_channels, conv_hidden_channels, conv_kernel_sizes,
                                in_h, in_w, fc_hidden_dims, out_dim, short_leads, long_leads)
    x = jax.random.normal(xkey, (B, in_channels, in_h, in_w), jnp.float32)

    # One-time weight lowering (outside the per-step jit).
    operands, meta = build_newnet_operands(
        params, in_h=in_h, in_w=in_w, l_out_long=l_out_long, l_out_short=l_out_short)
    operands = [jax.device_put(op) for op in operands]

    fwd = jax.jit(functools.partial(newnet_forward, meta=meta))
    out_short, out_long = fwd(operands, x)
    jax.block_until_ready(out_short)
    jax.block_until_ready(out_long)

    assert out_short.shape == (B, short_leads, l_out_short)
    assert out_long.shape == (B, long_leads, l_out_long)
    assert bool(jnp.all(jnp.isfinite(out_short))) and bool(jnp.all(jnp.isfinite(out_long)))

    # Numerical check against a pure-JAX f32 reference (kernel uses bf16 weights
    # with f32 accumulation -> differences are ~1e-3).
    ref_short, ref_long = newnet_reference(params, x, l_out_long=l_out_long,
                                           l_out_short=l_out_short)
    assert bool(jnp.allclose(out_short, ref_short, atol=5e-2, rtol=0.0))
    assert bool(jnp.allclose(out_long, ref_long, atol=5e-2, rtol=0.0))

    print("KERNEL_OK")
</pallas_src>

<mosaic_0001>
module attributes {stable_mosaic.version = 11 : i64} {
  func.func @kernel(%arg0: i32, %arg1: memref<1x1x256xbf16, #tpu.memory_space<vmem>>, %arg2: memref<256x784xbf16, #tpu.memory_space<vmem>>, %arg3: memref<1x784xf32, #tpu.memory_space<vmem>>, %arg4: memref<784x1152xbf16, #tpu.memory_space<vmem>>, %arg5: memref<1x1152xf32, #tpu.memory_space<vmem>>, %arg6: memref<1152x32xbf16, #tpu.memory_space<vmem>>, %arg7: memref<1x32xf32, #tpu.memory_space<vmem>>, %arg8: memref<32x128xbf16, #tpu.memory_space<vmem>>, %arg9: memref<1x128xf32, #tpu.memory_space<vmem>>, %arg10: memref<128x128xbf16, #tpu.memory_space<vmem>>, %arg11: memref<1x128xf32, #tpu.memory_space<vmem>>, %arg12: memref<1x1x128xf32, #tpu.memory_space<vmem>>) attributes {dimension_semantics = [#tpu.dimension_semantics<parallel>], iteration_bounds = array<i64: 2>, scalar_prefetch = 0 : i64, scratch_operands = 0 : i64, tpu.core_type = #tpu.core_type<tc>, window_params = [{transform_indices = @transform_0, window_bounds = array<i64: 1, 1, 256>}, {pipeline_mode = #tpu.pipeline_mode<synchronous>, transform_indices = @transform_1, window_bounds = array<i64: 256, 784>}, {pipeline_mode = #tpu.pipeline_mode<synchronous>, transform_indices = @transform_2, window_bounds = array<i64: 1, 784>}, {pipeline_mode = #tpu.pipeline_mode<synchronous>, transform_indices = @transform_3, window_bounds = array<i64: 784, 1152>}, {pipeline_mode = #tpu.pipeline_mode<synchronous>, transform_indices = @transform_4, window_bounds = array<i64: 1, 1152>}, {pipeline_mode = #tpu.pipeline_mode<synchronous>, transform_indices = @transform_5, window_bounds = array<i64: 1152, 32>}, {pipeline_mode = #tpu.pipeline_mode<synchronous>, transform_indices = @transform_6, window_bounds = array<i64: 1, 32>}, {pipeline_mode = #tpu.pipeline_mode<synchronous>, transform_indices = @transform_7, window_bounds = array<i64: 32, 128>}, {pipeline_mode = #tpu.pipeline_mode<synchronous>, transform_indices = @transform_8, window_bounds = array<i64: 1, 128>}, {pipeline_mode = #tpu.pipeline_mode<synchronous>, transform_indices = @transform_9, window_bounds = array<i64: 128, 128>}, {pipeline_mode = #tpu.pipeline_mode<synchronous>, transform_indices = @transform_10, window_bounds = array<i64: 1, 128>}, {transform_indices = @transform_11, window_bounds = array<i64: 1, 1, 128>}]} {
    %c0 = arith.constant 0 : index
    %c0_0 = arith.constant 0 : index
    %c0_1 = arith.constant 0 : index
    %0 = vector.load %arg1[%c0, %c0_0, %c0_1] : memref<1x1x256xbf16, #tpu.memory_space<vmem>>, vector<1x1x256xbf16>
    %1 = vector.shape_cast %0 : vector<1x1x256xbf16> to vector<1x256xbf16>
    %c0_2 = arith.constant 0 : index
    %c0_3 = arith.constant 0 : index
    %2 = vector.load %arg2[%c0_2, %c0_3] : memref<256x784xbf16, #tpu.memory_space<vmem>>, vector<256x784xbf16>
    %cst = arith.constant dense<0.000000e+00> : vector<1x784xf32>
    %3 = tpu.matmul %1, %2, %cst {dimension_numbers = #tpu.dot_dimension_numbers<[1], [0], [0], [1], [0, 0, 1, 1], [], []>} : vector<1x256xbf16>, vector<256x784xbf16>, vector<1x784xf32> -> vector<1x784xf32>
    %c0_4 = arith.constant 0 : index
    %c0_5 = arith.constant 0 : index
    %4 = vector.load %arg3[%c0_4, %c0_5] : memref<1x784xf32, #tpu.memory_space<vmem>>, vector<1x784xf32>
    %5 = arith.addf %3, %4 : vector<1x784xf32>
    %cst_6 = arith.constant 0.000000e+00 : f32
    %6 = vector.broadcast %cst_6 : f32 to vector<1x784xf32>
    %7 = arith.maximumf %5, %6 : vector<1x784xf32>
    %8 = arith.truncf %7 : vector<1x784xf32> to vector<1x784xbf16>
    %c0_7 = arith.constant 0 : index
    %c0_8 = arith.constant 0 : index
    %9 = vector.load %arg4[%c0_7, %c0_8] : memref<784x1152xbf16, #tpu.memory_space<vmem>>, vector<784x1152xbf16>
    %cst_9 = arith.constant dense<0.000000e+00> : vector<1x1152xf32>
    %10 = tpu.matmul %8, %9, %cst_9 {dimension_numbers = #tpu.dot_dimension_numbers<[1], [0], [0], [1], [0, 0, 1, 1], [], []>} : vector<1x784xbf16>, vector<784x1152xbf16>, vector<1x1152xf32> -> vector<1x1152xf32>
    %c0_10 = arith.constant 0 : index
    %c0_11 = arith.constant 0 : index
    %11 = vector.load %arg5[%c0_10, %c0_11] : memref<1x1152xf32, #tpu.memory_space<vmem>>, vector<1x1152xf32>
    %12 = arith.addf %10, %11 : vector<1x1152xf32>
    %cst_12 = arith.constant 0.000000e+00 : f32
    %13 = vector.broadcast %cst_12 : f32 to vector<1x1152xf32>
    %14 = arith.maximumf %12, %13 : vector<1x1152xf32>
    %15 = arith.truncf %14 : vector<1x1152xf32> to vector<1x1152xbf16>
    %c0_13 = arith.constant 0 : index
    %c0_14 = arith.constant 0 : index
    %16 = vector.load %arg6[%c0_13, %c0_14] : memref<1152x32xbf16, #tpu.memory_space<vmem>>, vector<1152x32xbf16>
    %cst_15 = arith.constant dense<0.000000e+00> : vector<1x32xf32>
    %17 = tpu.matmul %15, %16, %cst_15 {dimension_numbers = #tpu.dot_dimension_numbers<[1], [0], [0], [1], [0, 0, 1, 1], [], []>} : vector<1x1152xbf16>, vector<1152x32xbf16>, vector<1x32xf32> -> vector<1x32xf32>
    %c0_16 = arith.constant 0 : index
    %c0_17 = arith.constant 0 : index
    %18 = vector.load %arg7[%c0_16, %c0_17] : memref<1x32xf32, #tpu.memory_space<vmem>>, vector<1x32xf32>
    %19 = arith.addf %17, %18 : vector<1x32xf32>
    %cst_18 = arith.constant 0.000000e+00 : f32
    %20 = vector.broadcast %cst_18 : f32 to vector<1x32xf32>
    %21 = arith.maximumf %19, %20 : vector<1x32xf32>
    %22 = arith.truncf %21 : vector<1x32xf32> to vector<1x32xbf16>
    %c0_19 = arith.constant 0 : index
    %c0_20 = arith.constant 0 : index
    %23 = vector.load %arg8[%c0_19, %c0_20] : memref<32x128xbf16, #tpu.memory_space<vmem>>, vector<32x128xbf16>
    %cst_21 = arith.constant dense<0.000000e+00> : vector<1x128xf32>
    %24 = tpu.matmul %22, %23, %cst_21 {dimension_numbers = #tpu.dot_dimension_numbers<[1], [0], [0], [1], [0, 0, 1, 1], [], []>} : vector<1x32xbf16>, vector<32x128xbf16>, vector<1x128xf32> -> vector<1x128xf32>
    %c0_22 = arith.constant 0 : index
    %c0_23 = arith.constant 0 : index
    %25 = vector.load %arg9[%c0_22, %c0_23] : memref<1x128xf32, #tpu.memory_space<vmem>>, vector<1x128xf32>
    %26 = arith.addf %24, %25 : vector<1x128xf32>
    %cst_24 = arith.constant 5.000000e-01 : f32
    %27 = vector.broadcast %cst_24 : f32 to vector<1x128xf32>
    %28 = arith.mulf %27, %26 : vector<1x128xf32>
    %29 = math.tanh %28 : vector<1x128xf32>
    %cst_25 = arith.constant 5.000000e-01 : f32
    %30 = vector.broadcast %cst_25 : f32 to vector<1x128xf32>
    %31 = arith.mulf %30, %29 : vector<1x128xf32>
    %cst_26 = arith.constant 5.000000e-01 : f32
    %32 = vector.broadcast %cst_26 : f32 to vector<1x128xf32>
    %33 = arith.addf %31, %32 : vector<1x128xf32>
    %34 = arith.truncf %33 : vector<1x128xf32> to vector<1x128xbf16>
    %c0_27 = arith.constant 0 : index
    %c0_28 = arith.constant 0 : index
    %35 = vector.load %arg10[%c0_27, %c0_28] : memref<128x128xbf16, #tpu.memory_space<vmem>>, vector<128x128xbf16>
    %cst_29 = arith.constant dense<0.000000e+00> : vector<1x128xf32>
    %36 = tpu.matmul %34, %35, %cst_29 {dimension_numbers = #tpu.dot_dimension_numbers<[1], [0], [0], [1], [0, 0, 1, 1], [], []>} : vector<1x128xbf16>, vector<128x128xbf16>, vector<1x128xf32> -> vector<1x128xf32>
    %c0_30 = arith.constant 0 : index
    %c0_31 = arith.constant 0 : index
    %37 = vector.load %arg11[%c0_30, %c0_31] : memref<1x128xf32, #tpu.memory_space<vmem>>, vector<1x128xf32>
    %38 = arith.addf %36, %37 : vector<1x128xf32>
    %cst_32 = arith.constant 5.000000e-01 : f32
    %39 = vector.broadcast %cst_32 : f32 to vector<1x128xf32>
    %40 = arith.mulf %39, %38 : vector<1x128xf32>
    %41 = math.tanh %40 : vector<1x128xf32>
    %cst_33 = arith.constant 5.000000e-01 : f32
    %42 = vector.broadcast %cst_33 : f32 to vector<1x128xf32>
    %43 = arith.mulf %42, %41 : vector<1x128xf32>
    %cst_34 = arith.constant 5.000000e-01 : f32
    %44 = vector.broadcast %cst_34 : f32 to vector<1x128xf32>
    %45 = arith.addf %43, %44 : vector<1x128xf32>
    %c0_35 = arith.constant 0 : index
    %c0_36 = arith.constant 0 : index
    %c0_37 = arith.constant 0 : index
    %46 = vector.load %arg12[%c0_35, %c0_36, %c0_37] : memref<1x1x128xf32, #tpu.memory_space<vmem>>, vector<1x1x128xf32>
    %47 = vector.shape_cast %46 : vector<1x1x128xf32> to vector<1x128xf32>
    %48 = vector.shape_cast %45 : vector<1x128xf32> to vector<1x1x128xf32>
    tpu.vector_store %arg12[%c0_35, %c0_36, %c0_37], %48 {strides = array<i32>} : memref<1x1x128xf32, #tpu.memory_space<vmem>>, vector<1x1x128xf32>,
    return
  }
  func.func @transform_0(%arg0: i32) -> (i32, i32, i32) {
    %c0_i32 = arith.constant 0 : i32
    %c0_i32_0 = arith.constant 0 : i32
    %c0_i32_1 = arith.constant 0 : i32
    return %arg0, %c0_i32, %c0_i32_0 : i32, i32, i32
  }
  func.func @transform_1(%arg0: i32) -> (i32, i32) {
    %c0_i32 = arith.constant 0 : i32
    %c0_i32_0 = arith.constant 0 : i32
    %c0_i32_1 = arith.constant 0 : i32
    return %c0_i32, %c0_i32_0 : i32, i32
  }
  func.func @transform_2(%arg0: i32) -> (i32, i32) {
    %c0_i32 = arith.constant 0 : i32
    %c0_i32_0 = arith.constant 0 : i32
    %c0_i32_1 = arith.constant 0 : i32
    return %c0_i32, %c0_i32_0 : i32, i32
  }
  func.func @transform_3(%arg0: i32) -> (i32, i32) {
    %c0_i32 = arith.constant 0 : i32
    %c0_i32_0 = arith.constant 0 : i32
    %c0_i32_1 = arith.constant 0 : i32
    return %c0_i32, %c0_i32_0 : i32, i32
  }
  func.func @transform_4(%arg0: i32) -> (i32, i32) {
    %c0_i32 = arith.constant 0 : i32
    %c0_i32_0 = arith.constant 0 : i32
    %c0_i32_1 = arith.constant 0 : i32
    return %c0_i32, %c0_i32_0 : i32, i32
  }
  func.func @transform_5(%arg0: i32) -> (i32, i32) {
    %c0_i32 = arith.constant 0 : i32
    %c0_i32_0 = arith.constant 0 : i32
    %c0_i32_1 = arith.constant 0 : i32
    return %c0_i32, %c0_i32_0 : i32, i32
  }
  func.func @transform_6(%arg0: i32) -> (i32, i32) {
    %c0_i32 = arith.constant 0 : i32
    %c0_i32_0 = arith.constant 0 : i32
    %c0_i32_1 = arith.constant 0 : i32
    return %c0_i32, %c0_i32_0 : i32, i32
  }
  func.func @transform_7(%arg0: i32) -> (i32, i32) {
    %c0_i32 = arith.constant 0 : i32
    %c0_i32_0 = arith.constant 0 : i32
    %c0_i32_1 = arith.constant 0 : i32
    return %c0_i32, %c0_i32_0 : i32, i32
  }
  func.func @transform_8(%arg0: i32) -> (i32, i32) {
    %c0_i32 = arith.constant 0 : i32
    %c0_i32_0 = arith.constant 0 : i32
    %c0_i32_1 = arith.constant 0 : i32
    return %c0_i32, %c0_i32_0 : i32, i32
  }
  func.func @transform_9(%arg0: i32) -> (i32, i32) {
    %c0_i32 = arith.constant 0 : i32
    %c0_i32_0 = arith.constant 0 : i32
    %c0_i32_1 = arith.constant 0 : i32
    return %c0_i32, %c0_i32_0 : i32, i32
  }
  func.func @transform_10(%arg0: i32) -> (i32, i32) {
    %c0_i32 = arith.constant 0 : i32
    %c0_i32_0 = arith.constant 0 : i32
    %c0_i32_1 = arith.constant 0 : i32
    return %c0_i32, %c0_i32_0 : i32, i32
  }
  func.func @transform_11(%arg0: i32) -> (i32, i32, i32) {
    %c0_i32 = arith.constant 0 : i32
    %c0_i32_0 = arith.constant 0 : i32
    %c0_i32_1 = arith.constant 0 : i32
    return %arg0, %c0_i32, %c0_i32_0 : i32, i32, i32
  }
}

</mosaic_0001>

<bundles_post_ra>
// kernel: newnet_forward.1
= control target key start
LH: loop header
LB: loop body
LE: loop exit
PB: predicated region body
PF: predicated region fallthrough
CT: control target
= control target key end

     0   :  { %s9395_s0 = inlined_call_operand.vmem [shape: bf16[2,1,256], index: 0, kind: input, shape index: {}]   ;;  %s9396_s1 = inlined_call_operand.vmem [shape: bf16[256,784], index: 1, kind: input, shape index: {}]   ;;  %s9397_s2 = inlined_call_operand.hbm [shape: f32[1,784], index: 2, kind: input, shape index: {}]   ;;  %s9398_s3 = inlined_call_operand.hbm [shape: bf16[784,1152], index: 3, kind: input, shape index: {}]   ;;  %s9399_s4 = inlined_call_operand.hbm [shape: f32[1,1152], index: 4, kind: input, shape index: {}]   ;;  %s9400_s5 = inlined_call_operand.vmem [shape: bf16[1152,32], index: 5, kind: input, shape index: {}]   ;;  %s9401_s6 = inlined_call_operand.hbm [shape: f32[1,32], index: 6, kind: input, shape index: {}]   ;;  %s9402_s7 = inlined_call_operand.hbm [shape: bf16[32,128], index: 7, kind: input, shape index: {}]   ;;  %s9403_s8 = inlined_call_operand.hbm [shape: f32[1,128], index: 8, kind: input, shape index: {}]   ;;  %s9404_s9 = inlined_call_operand.hbm [shape: bf16[128,128], index: 9, kind: input, shape index: {}]   ;;  %s9405_s10 = inlined_call_operand.hbm [shape: f32[1,128], index: 10, kind: input, shape index: {}]   ;;  %s9406_s11 = inlined_call_operand.vmem [shape: f32[2,1,128], index: 11, kind: output, shape index: {}]  }
   0x1   :  { %9410 = sst [smem:[#allocation21_spill]] %s9397_s2 }
   0x2   :  { %16 = vsyncpa [#allocation3], 0 }
   0x3   :  { %17 = vsyncpa [#allocation5], 0 }
   0x4   :  { %18 = vsyncpa [#allocation8], 0 }
   0x5   :  { %19 = vsyncpa [#allocation11], 0 }
   0x6   :  { %20 = vsyncpa [#allocation14], 0  ;;  %s8427_s17 = smov 0  }
   0x7 LB: > { %9411 = sst [smem:[#allocation20_spill]] %s8349_s17  ;;  %s8351_s18 = smov [#allocation4]   ;;  %s8349_s17 = sphi %s8427_s17, %s26_s17  }
   0x8   : > { %s319_s19 = sshll.u32 %s8351_s18, 4  ;;  %s8433_s20 = sadd.s32 4294967295, %s8349_s17   ;;  %s8438_s19 = int_to_ptr.vmem [resolvable:$true] %s319_s19 }
   0x9   : > { %p6146_p0 = scmp.ge.s32.totalorder %s8349_s17, 1  ;;  %p293_p1 = scmp.lt.s32.totalorder %s8349_s17, 3 }
   0xa   : > { %p9408_p2 = scmp.eq.s32.totalorder %s8433_s20, 0  ;;  %s8352_s22 = smov [#allocation7]  }
   0xb   : > { %p8440_p3 = pnand %p6146_p0, %p293_p1  ;;  %s347_s23 = sshll.u32 %s8352_s22, 4  ;;  %s8446_s23 = int_to_ptr.vmem [resolvable:$true] %s347_s23 }
   0xc   : > { %s8353_s25 = smov [#allocation10]   ;;  %s8354_s27 = smov [#allocation2]  }
   0xd   : > { %s9412_s21 = scalar_select %p8440_p3, 1, 0 }
   0xe   : > { %p7150_p4 = pneg %p8440_p3  ;;  %s371_s26 = sshll.u32 %s8353_s25, 4  ;;  %s8454_s26 = int_to_ptr.vmem [resolvable:$true] %s371_s26 }
   0xf   : > { %s8456_s28 = sshll.u32 %s8354_s27, 4  ;;  %s8099_s12 = scalar_lea.hbm %s9398_s3, 56448  ;;  %s310_s28 = int_to_ptr.vmem [resolvable:$true] %s8456_s28 }
  0x10   : > { %p8450_p5 = pnand %p9408_p2, %p7150_p4  ;;  %p8100_p6 = scmp.ne.s32.totalorder %s9398_s3, %s8099_s12 }
  0x11   : > { %p8106_p10 = scmp.lt.u32.totalorder %s8099_s12, %s9398_s3 }
  0x12   : > { %p8466_p7 = pneg %p8450_p5 }
  0x14   : > { %p8102_p8 = pnand %p8466_p7, %p8100_p6 }
  0x16   : > { %p8103_p9 = pneg %p8102_p8 }
  0x18   : > { %p8108_p11 = pnand %p8106_p10, %p8103_p9 }
  0x1a   : > { %8111 = shalt.err (!%p8108_p11)
}
  0x1b   : > { %s8112_s22 = scalar_lea.vmem %s8438_s19, 56448  ;;  %p8120_p1 = scmp.lt.s32.totalorder %s8438_s19, %s8438_s19 }
  0x1c   : > { %p8113_p12 = scmp.ne.s32.totalorder %s8438_s19, %s8112_s22  ;;  %p8121_p4 = scmp.lt.s32.totalorder %s8112_s22, %s8112_s22 }
  0x1e   : > { %p8115_p13 = pnand %p8113_p12, %p8466_p7  ;;  %p8122_p6 = por %p8121_p4, %p8120_p1 }
  0x20   : > { %p8116_p0 = pneg %p8115_p13 }
  0x22   : > { %p8123_p8 = pnand %p8122_p6, %p8116_p0 }
  0x24   : > { %8126 = shalt.err (!%p8123_p8)
}
  0x25   : > { %s8355_s25 = smov 576   ;;  %s8356_s27 = smov 36  }
  0x26   : > { %7156 = dma.hbm_to_vmem [thread:$0]  (!%p8450_p5), %s9398_s3, 56448, %s8438_s19, [#allocation5], %s8355_s25, %s8355_s25, %s8356_s27  }
  0x27   : > { %s8127_s14 = scalar_lea.hbm %s9401_s6, 16 }
  0x28   : > { %p8128_p9 = scmp.ne.s32.totalorder %s9401_s6, %s8127_s14  ;;  %p8134_p12 = scmp.lt.u32.totalorder %s8127_s14, %s9401_s6 }
  0x2a   : > { %p8130_p10 = pnand %p8128_p9, %p8466_p7 }
  0x2c   : > { %p8131_p11 = pneg %p8130_p10 }
  0x2e   : > { %p8136_p13 = pnand %p8134_p12, %p8131_p11 }
  0x30   : > { %8139 = shalt.err (!%p8136_p13)
}
  0x31   : > { %s8140_s19 = scalar_lea.vmem %s8446_s23, 16  ;;  %s8147_s25 = scalar_lea.vmem %s8446_s23, 32 }
  0x32   : > { %p8141_p0 = scmp.ne.s32.totalorder %s8446_s23, %s8140_s19  ;;  %p8148_p6 = scmp.lt.s32.totalorder %s8446_s23, %s8446_s23 }
  0x33   : > { %p8149_p8 = scmp.lt.s32.totalorder %s8147_s25, %s8140_s19 }
  0x34   : > { %p8143_p1 = pnand %p8141_p0, %p8466_p7 }
  0x35   : > { %p8150_p9 = por %p8149_p8, %p8148_p6 }
  0x36   : > { %p8144_p4 = pneg %p8143_p1 }
  0x38   : > { %p8151_p10 = pnand %p8150_p9, %p8144_p4 }
  0x3a   : > { %8154 = shalt.err (!%p8151_p10)
}
  0x3b   : > { %7162 = dma.hbm_to_vmem [thread:$0]  (!%p8450_p5), %s9401_s6, 16, %s8446_s23, [#allocation8]  }
  0x3c   : > { %s8155_s12 = scalar_lea.hbm %s9403_s8, 16 }
  0x3d   : > { %p8156_p11 = scmp.ne.s32.totalorder %s9403_s8, %s8155_s12  ;;  %p8162_p0 = scmp.lt.u32.totalorder %s8155_s12, %s9403_s8 }
  0x3f   : > { %p8158_p12 = pnand %p8156_p11, %p8466_p7 }
  0x41   : > { %p8159_p13 = pneg %p8158_p12 }
  0x43   : > { %p8164_p1 = pnand %p8162_p0, %p8159_p13 }
  0x45   : > { %8167 = shalt.err (!%p8164_p1)
}
  0x46   : > { %s8168_s23 = scalar_lea.vmem %s8454_s26, 16  ;;  %s8175_s22 = scalar_lea.vmem %s8454_s26, 32 }
  0x47   : > { %p8169_p4 = scmp.ne.s32.totalorder %s8454_s26, %s8168_s23  ;;  %p8176_p9 = scmp.lt.s32.totalorder %s8454_s26, %s8454_s26 }
  0x48   : > { %p8177_p10 = scmp.lt.s32.totalorder %s8175_s22, %s8168_s23 }
  0x49   : > { %p8171_p6 = pnand %p8169_p4, %p8466_p7 }
  0x4a   : > { %p8178_p11 = por %p8177_p10, %p8176_p9 }
  0x4b   : > { %p8172_p8 = pneg %p8171_p6 }
  0x4d   : > { %p8179_p12 = pnand %p8178_p11, %p8172_p8 }
  0x4f   : > { %8182 = shalt.err (!%p8179_p12)
}
  0x50   : > { %7168 = dma.hbm_to_vmem [thread:$0]  (!%p8450_p5), %s9403_s8, 16, %s8454_s26, [#allocation11]  }
  0x51   : > { %s9415_s2 = sld [smem:[#allocation21_spill]] }
  0x57   : > { %s8183_s29 = scalar_lea.hbm %s9415_s2, 112 }
  0x58   : > { %p8184_p13 = scmp.ne.s32.totalorder %s9415_s2, %s8183_s29  ;;  %p8190_p4 = scmp.lt.u32.totalorder %s8183_s29, %s9415_s2 }
  0x5a   : > { %p8186_p0 = pnand %p8184_p13, %p8466_p7 }
  0x5c   : > { %p8187_p1 = pneg %p8186_p0 }
  0x5e   : > { %p8192_p6 = pnand %p8190_p4, %p8187_p1 }
  0x60   : > { %8195 = shalt.err (!%p8192_p6)
}
  0x61   : > { %s8196_s16 = scalar_lea.vmem %s310_s28, 112  ;;  %s8203_s26 = scalar_lea.vmem %s310_s28, 128 }
  0x62   : > { %p8197_p8 = scmp.ne.s32.totalorder %s310_s28, %s8196_s16  ;;  %p8204_p11 = scmp.lt.s32.totalorder %s310_s28, %s310_s28 }
  0x63   : > { %p8205_p12 = scmp.lt.s32.totalorder %s8203_s26, %s8196_s16 }
  0x64   : > { %p8199_p9 = pnand %p8197_p8, %p8466_p7 }
  0x65   : > { %p8206_p2 = por %p8205_p12, %p8204_p11 }
  0x66   : > { %p8200_p10 = pneg %p8199_p9 }
  0x68   : > { %p8207_p3 = pnand %p8206_p2, %p8200_p10 }
  0x6a   : > { %8210 = shalt.err (!%p8207_p3)
}
  0x6b   : > { %7153 = dma.hbm_to_vmem [thread:$0]  (!%p8450_p5), %s9415_s2, 112, %s310_s28, [#allocation3]  }
  0x6c   : > { %s8357_s22 = smov [#allocation6]   ;;  %s8358_s25 = smov [#allocation9]  }
  0x6d   : > { %s333_s19 = sshll.u32 %s8357_s22, 4  ;;  %s357_s17 = sshll.u32 %s8358_s25, 4  ;;  %s334_s19 = int_to_ptr.vmem [resolvable:$true] %s333_s19  ;;  %s358_s17 = int_to_ptr.vmem [resolvable:$true] %s357_s17 }
  0x6e   : > { %s8211_s30 = scalar_lea.hbm %s9399_s4, 144 }
  0x6f   : > { %p8212_p2 = scmp.ne.s32.totalorder %s9399_s4, %s8211_s30  ;;  %p8218_p0 = scmp.lt.u32.totalorder %s8211_s30, %s9399_s4 }
  0x71   : > { %p8214_p3 = pnand %p8212_p2, %p8466_p7 }
  0x73   : > { %p8215_p13 = pneg %p8214_p3 }
  0x75   : > { %p8220_p1 = pnand %p8218_p0, %p8215_p13 }
  0x77   : > { %8223 = shalt.err (!%p8220_p1)
}
  0x78   : > { %s8224_s28 = scalar_lea.vmem %s334_s19, 144  ;;  %s8231_s26 = scalar_lea.vmem %s334_s19, 160 }
  0x79   : > { %p8225_p4 = scmp.ne.s32.totalorder %s334_s19, %s8224_s28  ;;  %p8232_p9 = scmp.lt.s32.totalorder %s334_s19, %s334_s19 }
  0x7a   : > { %p8233_p10 = scmp.lt.s32.totalorder %s8231_s26, %s8224_s28 }
  0x7b   : > { %p8227_p6 = pnand %p8225_p4, %p8466_p7 }
  0x7c   : > { %p8234_p11 = por %p8233_p10, %p8232_p9 }
  0x7d   : > { %p8228_p8 = pneg %p8227_p6 }
  0x7f   : > { %p8235_p12 = pnand %p8234_p11, %p8228_p8 }
  0x81   : > { %8238 = shalt.err (!%p8235_p12)
}
  0x82   : > { %7159 = dma.hbm_to_vmem [thread:$0]  (!%p8450_p5), %s9399_s4, 144, %s334_s19, [#allocation5]  }
  0x83   : > { %s8239_s27 = scalar_lea.hbm %s9402_s7, 256 }
  0x84   : > { %p8240_p2 = scmp.ne.s32.totalorder %s9402_s7, %s8239_s27  ;;  %p8246_p0 = scmp.lt.u32.totalorder %s8239_s27, %s9402_s7 }
  0x86   : > { %p8242_p3 = pnand %p8240_p2, %p8466_p7 }
  0x88   : > { %p8243_p13 = pneg %p8242_p3 }
  0x8a   : > { %p8248_p1 = pnand %p8246_p0, %p8243_p13 }
  0x8c   : > { %8251 = shalt.err (!%p8248_p1)
}
  0x8d   : > { %s8252_s14 = scalar_lea.vmem %s358_s17, 256  ;;  %p8260_p9 = scmp.lt.s32.totalorder %s358_s17, %s358_s17 }
  0x8e   : > { %p8253_p4 = scmp.ne.s32.totalorder %s358_s17, %s8252_s14  ;;  %p8261_p10 = scmp.lt.s32.totalorder %s8252_s14, %s8252_s14 }
  0x90   : > { %p8255_p6 = pnand %p8253_p4, %p8466_p7  ;;  %p8262_p11 = por %p8261_p10, %p8260_p9 }
  0x92   : > { %p8256_p8 = pneg %p8255_p6 }
  0x94   : > { %p8263_p12 = pnand %p8262_p11, %p8256_p8 }
  0x96   : > { %8266 = shalt.err (!%p8263_p12)
}
  0x97   : > { %s8359_s19 = smov 64   ;;  %s8360_s16 = smov 4  }
  0x98   : > { %7165 = dma.hbm_to_vmem [thread:$0]  (!%p8450_p5), %s9402_s7, 256, %s358_s17, [#allocation8], %s8359_s19, %s8359_s19, %s8360_s16  }
  0x99   : > { %s8361_s18 = smov [#allocation12]   ;;  %s8362_s22 = smov [#allocation13]  }
  0x9a   : > { %s381_s23 = sshll.u32 %s8361_s18, 4  ;;  %s395_s25 = sshll.u32 %s8362_s22, 4  ;;  %s382_s23 = int_to_ptr.vmem [resolvable:$true] %s381_s23  ;;  %s396_s25 = int_to_ptr.vmem [resolvable:$true] %s395_s25 }
  0x9b   : > { %s8267_s30 = scalar_lea.hbm %s9404_s9, 1024 }
  0x9c   : > { %p8268_p2 = scmp.ne.s32.totalorder %s9404_s9, %s8267_s30  ;;  %p8274_p0 = scmp.lt.u32.totalorder %s8267_s30, %s9404_s9 }
  0x9e   : > { %p8270_p3 = pnand %p8268_p2, %p8466_p7 }
  0xa0   : > { %p8271_p13 = pneg %p8270_p3 }
  0xa2   : > { %p8276_p1 = pnand %p8274_p0, %p8271_p13 }
  0xa4   : > { %8279 = shalt.err (!%p8276_p1)
}
  0xa5   : > { %s8280_s17 = scalar_lea.vmem %s382_s23, 1024  ;;  %p8288_p9 = scmp.lt.s32.totalorder %s382_s23, %s382_s23 }
  0xa6   : > { %p8281_p4 = scmp.ne.s32.totalorder %s382_s23, %s8280_s17  ;;  %p8289_p10 = scmp.lt.s32.totalorder %s8280_s17, %s8280_s17 }
  0xa8   : > { %p8283_p6 = pnand %p8281_p4, %p8466_p7  ;;  %p8290_p11 = por %p8289_p10, %p8288_p9 }
  0xaa   : > { %p8284_p8 = pneg %p8283_p6 }
  0xac   : > { %p8291_p12 = pnand %p8290_p11, %p8284_p8 }
  0xae   : > { %8294 = shalt.err (!%p8291_p12)
}
  0xaf   : > { %7171 = dma.hbm_to_vmem [thread:$0]  (!%p8450_p5), %s9404_s9, 1024, %s382_s23, [#allocation11], %s8359_s19, %s8359_s19, %s8360_s16  }
  0xb0   : > { %s8295_s22 = scalar_lea.hbm %s9405_s10, 16 }
  0xb1   : > { %p8296_p2 = scmp.ne.s32.totalorder %s9405_s10, %s8295_s22  ;;  %p8302_p0 = scmp.lt.u32.totalorder %s8295_s22, %s9405_s10 }
  0xb3   : > { %p8298_p3 = pnand %p8296_p2, %p8466_p7 }
  0xb5   : > { %p8299_p13 = pneg %p8298_p3 }
  0xb7   : > { %p8304_p1 = pnand %p8302_p0, %p8299_p13 }
  0xb9   : > { %8307 = shalt.err (!%p8304_p1)
}
  0xba   : > { %s8308_s13 = scalar_lea.vmem %s396_s25, 16  ;;  %s8315_s19 = scalar_lea.vmem %s396_s25, 32 }
  0xbb   : > { %p8309_p4 = scmp.ne.s32.totalorder %s396_s25, %s8308_s13  ;;  %p8316_p9 = scmp.lt.s32.totalorder %s396_s25, %s396_s25 }
  0xbc   : > { %p8317_p10 = scmp.lt.s32.totalorder %s8315_s19, %s8308_s13 }
  0xbd   : > { %p8311_p6 = pnand %p8309_p4, %p8466_p7 }
  0xbe   : > { %p8318_p11 = por %p8317_p10, %p8316_p9 }
  0xbf   : > { %p8312_p8 = pneg %p8311_p6 }
  0xc1   : > { %p8319_p12 = pnand %p8318_p11, %p8312_p8 }
  0xc3   : > { %8322 = shalt.err (!%p8319_p12)
}
  0xc4   : > { %7174 = dma.hbm_to_vmem [thread:$0]  (!%p8450_p5), %s9405_s10, 16, %s396_s25, [#allocation14]  }
  0xc5   : > { %p9416_p2 = scmp.ne.s32.totalorder %s9412_s21, 0 }
  0xc6   : > { %p9417_p3 = scmp.eq.s32.totalorder (!%p9416_p2), %s8433_s20, 0 }
  0xc7   : > { %415 = sbr.rel (%p9416_p2) target bundleno = 1827 (0x723), region = 64 }
  0xce   : > { %8328 = dma.done.wait (%p9417_p3), [#allocation3], 112   ;;  %p9418_p7 = pmov %p9417_p3 }
  0xcf   : > { %p9419_p13 = pmov %p9417_p3 }
  0xd0   : > { %8330 = vsyncadd (%p9418_p7), [#allocation3], 4294967184 }
  0xd1   : > { %8332 = dma.done.wait (%p9419_p13), [#allocation5], 56592   ;;  %p9420_p0 = pmov %p9417_p3 }
  0xd3   : > { %8334 = vsyncadd (%p9420_p0), [#allocation5], 4294910704  ;;  %p9421_p1 = pmov %p9420_p0 }
  0xd4   : > { %p9422_p5 = pmov %p9420_p0 }
  0xd5   : > { %8336 = dma.done.wait (%p9421_p1), [#allocation8], 272  }
  0xd6   : > { %8338 = vsyncadd (%p9422_p5), [#allocation8], 4294967024  ;;  %p9423_p4 = pmov %p9420_p0 }
  0xd7   : > { %p9424_p6 = pmov %p9420_p0 }
  0xd8   : > { %8340 = dma.done.wait (%p9423_p4), [#allocation11], 1040  }
  0xd9   : > { %8342 = vsyncadd (%p9424_p6), [#allocation11], 4294966256  ;;  %p9425_p8 = pmov %p9420_p0 }
  0xda   : > { %p9426_p9 = pmov %p9420_p0 }
  0xdb   : > { %8344 = dma.done.wait (%p9425_p8), [#allocation14], 16  }
  0xdc   : > { %8346 = vsyncadd (%p9426_p9), [#allocation14], 4294967280  ;;  %v7215_v0 = vld [vmem:[%s9396_s1 + $0x4] ss:$28 sps:$4 sm:$0xff]   ;;  %v7218_v2 = vld [vmem:[%s9396_s1 + $0x3c] ss:$28 sps:$4 sm:$0xff]   ;;  %v630_v11 = vlaneseq }
  0xdd   : > { %v7217_v1 = vld [vmem:[%s9396_s1] ss:$28 sps:$4 sm:$0xff]   ;;  %1255 = vmatprep.subr.bf16.mxu0 %v7215_v0  ;;  %v7220_v3 = vld [vmem:[%s9396_s1 + $0x38] ss:$28 sps:$4 sm:$0xff]   ;;  %v7223_v5 = vld [vmem:[%s9396_s1 + $0x70] ss:$28 sps:$4 sm:$0xff]  }
  0xde   : > { %1256 = vmatpush1.bf16.msra.mxu0 %v7217_v1  ;;  %v7221_v4 = vld [vmem:[%s9396_s1 + $0x74] ss:$28 sps:$4 sm:$0xff]   ;;  %v7224_v6 = vld [vmem:[%s9396_s1 + $0xac] ss:$28 sps:$4 sm:$0xff]   ;;  %p480_p10 = scmp.lt.s32.totalorder %s8433_s20, 1  ;;  %v8686_v15 = vshrl.u32 %v630_v11, 7 }
  0xdf   : > { %1257 = vmatprep.subr.bf16.mxu0 %v7218_v2  ;;  %v7226_v7 = vld [vmem:[%s9396_s1 + $0xa8] ss:$28 sps:$4 sm:$0xff]   ;;  %v8363_v9 = vmov 1966171168   ;;  %v7229_v12 = vld [vmem:[%s9396_s1 + $0xe0] ss:$28 sps:$4 sm:$0xff]  }
  0xe0   : > { %v7227_v8 = vld [vmem:[%s9396_s1 + $0xe4] ss:$28 sps:$4 sm:$0xff]   ;;  %s9429_s20 = smov (!%p480_p10, %s8433_s20), 1  ;;  %v628_v10 = vunpack.c.l.s4 %v8363_v9  ;;  %v7230_v13 = vld [vmem:[%s9396_s1 + $0x11c] ss:$28 sps:$4 sm:$0xff]   ;;  %vm4225_vm0 = vcmask 130048  }
  0xe1   : > { %s6165_s25 = sshll.u32 %s9429_s20, 1  ;;  %v7232_v16 = vld [vmem:[%s9396_s1 + $0x118] ss:$28 sps:$4 sm:$0xff]   ;;  %v7235_v18 = vld [vmem:[%s9396_s1 + $0x150] ss:$28 sps:$4 sm:$0xff]   ;;  %vm8366_vm1 = vmmov 0   ;;  %s486_s30 = scalar_lea.vmem %s9406_s11, %s9429_s20 }
  0xe2   : > { %1258 = vmatpush1.bf16.msra.mxu0 %v7220_v3  ;;  %v629_v14 = vunpack.c.0.s8 %v628_v10  ;;  %v7233_v17 = vld [vmem:[%s9396_s1 + $0x154] ss:$28 sps:$4 sm:$0xff]   ;;  %s483_s22 = scalar_lea.vmem %s9395_s0, %s6165_s25  ;;  %v7263_v19 = vld [vmem:[%s9396_s1 + $0xc] ss:$28 sps:$4 sm:$0xff]   ;;  %v7266_v25 = vld [vmem:[%s9396_s1 + $0x44] ss:$28 sps:$4 sm:$0xff]  }
  0xe3   : > { %1259 = vmatprep.subr.bf16.mxu0 %v7221_v4  ;;  %v7265_v20 = vld [vmem:[%s9396_s1 + $0x8] ss:$28 sps:$4 sm:$0xff]   ;;  %v8709_v22 = vld.sshfl [vmem:[%s483_s22] sm:$0x11 pattern:$0x75316420]  ;;  %1296 = vmatprep.subr.bf16.mxu1 %v7263_v19 }
  0xe4   : > { %v8707_v21 = vsub.s32 %v629_v14, %v8686_v15  ;;  %v7236_v23 = vld [vmem:[%s9396_s1 + $0x18c] ss:$28 sps:$4 sm:$0xff]   ;;  %v626_v24 = vcombine.high %v8709_v22, %v8709_v22  ;;  %1297 = vmatpush1.bf16.msra.mxu1 %v7265_v20  ;;  %v7268_v26 = vld [vmem:[%s9396_s1 + $0x40] ss:$28 sps:$4 sm:$0xff]   ;;  %v7271_v31 = vld [vmem:[%s9396_s1 + $0x78] ss:$28 sps:$4 sm:$0xff]  }
  0xe5   : > { %1298 = vmatprep.subr.bf16.mxu1 %v7266_v25  ;;  %v7269_v28 = vld [vmem:[%s9396_s1 + $0x7c] ss:$28 sps:$4 sm:$0xff]   ;;  %v7238_v29 = vld [vmem:[%s9396_s1 + $0x188] ss:$28 sps:$4 sm:$0xff]   ;;  %v7272_v32 = vld [vmem:[%s9396_s1 + $0xb4] ss:$28 sps:$4 sm:$0xff]  }
  0xe6   : > { %1260 = vmatpush1.bf16.msra.mxu0 %v7223_v5  ;;  %v8723_v27 = vrot.slane %v626_v24, %v8707_v21  ;;  %v7239_v30 = vld [vmem:[%s9396_s1 + $0x1c4] ss:$28 sps:$4 sm:$0xff]   ;;  %v7242_v34 = vld [vmem:[%s9396_s1 + $0x1fc] ss:$28 sps:$4 sm:$0xff]   ;;  %v7274_v35 = vld [vmem:[%s9396_s1 + $0xb0] ss:$28 sps:$4 sm:$0xff]   ;;  %v8837_v0 = vrot.slane %v8709_v22, %v8707_v21 }
  0xe7   : > { %1261 = vmatprep.subr.bf16.mxu0 %v7224_v6  ;;  %v7241_v33 = vld [vmem:[%s9396_s1 + $0x1c0] ss:$28 sps:$4 sm:$0xff]   ;;  %v7275_v36 = vld [vmem:[%s9396_s1 + $0xec] ss:$28 sps:$4 sm:$0xff]   ;;  %v7244_v37 = vld [vmem:[%s9396_s1 + $0x1f8] ss:$28 sps:$4 sm:$0xff]  }
  0xe8   : > { %1287 = vmatprep.mubr.bf16.mxu0 %v8723_v27  ;;  %1299 = vmatpush1.bf16.msra.mxu1 %v7268_v26  ;;  %v7245_v38 = vld [vmem:[%s9396_s1 + $0x234] ss:$28 sps:$4 sm:$0xff]   ;;  %v7277_v39 = vld [vmem:[%s9396_s1 + $0xe8] ss:$28 sps:$4 sm:$0xff]   ;;  %v7280_v43 = vld [vmem:[%s9396_s1 + $0x120] ss:$28 sps:$4 sm:$0xff]  }
  0xe9   : > { %1328 = vmatprep.mubr.bf16.mxu1 %v8723_v27  ;;  %1300 = vmatprep.subr.bf16.mxu1 %v7269_v28  ;;  %v7278_v40 = vld [vmem:[%s9396_s1 + $0x124] ss:$28 sps:$4 sm:$0xff]   ;;  %v7247_v41 = vld [vmem:[%s9396_s1 + $0x230] ss:$28 sps:$4 sm:$0xff]   ;;  %v7281_v44 = vld [vmem:[%s9396_s1 + $0x15c] ss:$28 sps:$4 sm:$0xff]  }
  0xea   : > { %1262 = vmatpush1.bf16.msra.mxu0 %v7226_v7  ;;  %v7248_v42 = vld [vmem:[%s9396_s1 + $0x26c] ss:$28 sps:$4 sm:$0xff]   ;;  %v7251_v46 = vld [vmem:[%s9396_s1 + $0x2a4] ss:$28 sps:$4 sm:$0xff]   ;;  %v7283_v47 = vld [vmem:[%s9396_s1 + $0x158] ss:$28 sps:$4 sm:$0xff]  }
  0xeb   : > { %1263 = vmatprep.subr.bf16.mxu0 %v7227_v8  ;;  %v7250_v45 = vld [vmem:[%s9396_s1 + $0x268] ss:$28 sps:$4 sm:$0xff]   ;;  %v7284_v48 = vld [vmem:[%s9396_s1 + $0x194] ss:$28 sps:$4 sm:$0xff]   ;;  %v7253_v49 = vld [vmem:[%s9396_s1 + $0x2a0] ss:$28 sps:$4 sm:$0xff]  }
  0xec   : > { %1301 = vmatpush1.bf16.msra.mxu1 %v7271_v31  ;;  %v7254_v50 = vld [vmem:[%s9396_s1 + $0x2dc] ss:$28 sps:$4 sm:$0xff]   ;;  %v7286_v51 = vld [vmem:[%s9396_s1 + $0x190] ss:$28 sps:$4 sm:$0xff]   ;;  %v7289_v55 = vld [vmem:[%s9396_s1 + $0x1c8] ss:$28 sps:$4 sm:$0xff]  }
  0xed   : > { %1302 = vmatprep.subr.bf16.mxu1 %v7272_v32  ;;  %v7287_v52 = vld [vmem:[%s9396_s1 + $0x1cc] ss:$28 sps:$4 sm:$0xff]   ;;  %v7256_v53 = vld [vmem:[%s9396_s1 + $0x2d8] ss:$28 sps:$4 sm:$0xff]   ;;  %v7290_v56 = vld [vmem:[%s9396_s1 + $0x204] ss:$28 sps:$4 sm:$0xff]  }
  0xee   : > { %1264 = vmatpush1.bf16.msra.mxu0 %v7229_v12  ;;  %v7257_v54 = vld [vmem:[%s9396_s1 + $0x314] ss:$28 sps:$4 sm:$0xff]   ;;  %v7260_v58 = vld [vmem:[%s9396_s1 + $0x34c] ss:$28 sps:$4 sm:$0xff]   ;;  %v7292_v59 = vld [vmem:[%s9396_s1 + $0x200] ss:$28 sps:$4 sm:$0xff]  }
  0xef   : > { %1265 = vmatprep.subr.bf16.mxu0 %v7230_v13  ;;  %v7259_v57 = vld [vmem:[%s9396_s1 + $0x310] ss:$28 sps:$4 sm:$0xff]   ;;  %v7293_v60 = vld [vmem:[%s9396_s1 + $0x23c] ss:$28 sps:$4 sm:$0xff]   ;;  %v7262_v61 = vld [vmem:[%s9396_s1 + $0x348] ss:$28 sps:$4 sm:$0xff]  }
  0xf0   : > { %1303 = vmatpush1.bf16.msra.mxu1 %v7274_v35  ;;  %v7313_v62 = vld [vmem:[%s9396_s1 + $0x14] ss:$28 sps:$4 sm:$0xff]   ;;  %v7316_v3 = vld [vmem:[%s9396_s1 + $0x4c] ss:$28 sps:$4 sm:$0xff]   ;;  %v7319_v7 = vld [vmem:[%s9396_s1 + $0x84] ss:$28 sps:$4 sm:$0xff]  }
  0xf1   : > { %1304 = vmatprep.subr.bf16.mxu1 %v7275_v36  ;;  %v7295_v63 = vld [vmem:[%s9396_s1 + $0x238] ss:$28 sps:$4 sm:$0xff]   ;;  %v7311_v2 = vld [vmem:[%s9396_s1 + $0x10] ss:$28 sps:$4 sm:$0xff]   ;;  %v7314_v6 = vld [vmem:[%s9396_s1 + $0x48] ss:$28 sps:$4 sm:$0xff]  }
  0xf2   : > { %1266 = vmatpush1.bf16.msra.mxu0 %v7232_v16  ;;  %v7296_v1 = vld [vmem:[%s9396_s1 + $0x274] ss:$28 sps:$4 sm:$0xff]   ;;  %v7299_v5 = vld [vmem:[%s9396_s1 + $0x2ac] ss:$28 sps:$4 sm:$0xff]   ;;  %v7302_v9 = vld [vmem:[%s9396_s1 + $0x2e4] ss:$28 sps:$4 sm:$0xff]  }
  0xf3   : > { %1267 = vmatprep.subr.bf16.mxu0 %v7233_v17  ;;  %v7298_v4 = vld [vmem:[%s9396_s1 + $0x270] ss:$28 sps:$4 sm:$0xff]   ;;  %v7301_v8 = vld [vmem:[%s9396_s1 + $0x2a8] ss:$28 sps:$4 sm:$0xff]   ;;  %v7317_v10 = vld [vmem:[%s9396_s1 + $0x80] ss:$28 sps:$4 sm:$0xff]  }
  0xf4   : > { %1305 = vmatpush1.bf16.msra.mxu1 %v7277_v39  ;;  %v7322_v11 = vld [vmem:[%s9396_s1 + $0xbc] ss:$28 sps:$4 sm:$0xff]   ;;  %v7325_v16 = vld [vmem:[%s9396_s1 + $0xf4] ss:$28 sps:$4 sm:$0xff]   ;;  %v7328_v20 = vld [vmem:[%s9396_s1 + $0x12c] ss:$28 sps:$4 sm:$0xff]  }
  0xf5   : > { %1306 = vmatprep.subr.bf16.mxu1 %v7278_v40  ;;  %v7304_v12 = vld [vmem:[%s9396_s1 + $0x2e0] ss:$28 sps:$4 sm:$0xff]   ;;  %v7320_v14 = vld [vmem:[%s9396_s1 + $0xb8] ss:$28 sps:$4 sm:$0xff]   ;;  %v7323_v19 = vld [vmem:[%s9396_s1 + $0xf0] ss:$28 sps:$4 sm:$0xff]  }
  0xf6   : > { %1268 = vmatpush1.bf16.msra.mxu0 %v7235_v18  ;;  %v7305_v13 = vld [vmem:[%s9396_s1 + $0x31c] ss:$28 sps:$4 sm:$0xff]   ;;  %v7308_v18 = vld [vmem:[%s9396_s1 + $0x354] ss:$28 sps:$4 sm:$0xff]   ;;  %v7331_v24 = vld [vmem:[%s9396_s1 + $0x164] ss:$28 sps:$4 sm:$0xff]  }
  0xf7   : > { %1269 = vmatprep.subr.bf16.mxu0 %v7236_v23  ;;  %v7307_v17 = vld [vmem:[%s9396_s1 + $0x318] ss:$28 sps:$4 sm:$0xff]   ;;  %v7310_v21 = vld [vmem:[%s9396_s1 + $0x350] ss:$28 sps:$4 sm:$0xff]   ;;  %v7326_v23 = vld [vmem:[%s9396_s1 + $0x128] ss:$28 sps:$4 sm:$0xff]  }
  0xf8   : > { %1307 = vmatpush1.bf16.msra.mxu1 %v7280_v43  ;;  %v7344_v22 = vld [vmem:[%s9396_s1 + $0x1d8] ss:$28 sps:$4 sm:$0xff]   ;;  %v7349_v26 = vld [vmem:[%s9396_s1 + $0x210] ss:$28 sps:$4 sm:$0xff]   ;;  %v7329_v28 = vld [vmem:[%s9396_s1 + $0x160] ss:$28 sps:$4 sm:$0xff]  }
  0xf9   : > { %1308 = vmatprep.subr.bf16.mxu1 %v7281_v44  ;;  %v7348_v25 = vld [vmem:[%s9396_s1 + $0x18] ss:$28 sps:$4 sm:$0xff]   ;;  %v7354_v31 = vld [vmem:[%s9396_s1 + $0x248] ss:$28 sps:$4 sm:$0xff]   ;;  %v7335_v35 = vld [vmem:[%s9396_s1 + $0x1d0] ss:$28 sps:$4 sm:$0xff]  }
  0xfa   : > { %1270 = vmatpush1.bf16.msra.mxu0 %v7238_v29  ;;  %v7334_v29 = vld [vmem:[%s9396_s1 + $0x19c] ss:$28 sps:$4 sm:$0xff]   ;;  %v7340_v36 = vld [vmem:[%s9396_s1 + $0x20c] ss:$28 sps:$4 sm:$0xff]   ;;  %v7343_v40 = vld [vmem:[%s9396_s1 + $0x244] ss:$28 sps:$4 sm:$0xff]  }
  0xfb   : > { %1271 = vmatprep.subr.bf16.mxu0 %v7239_v30  ;;  %v7353_v30 = vld [vmem:[%s9396_s1 + $0x50] ss:$28 sps:$4 sm:$0xff]   ;;  %v7332_v32 = vld [vmem:[%s9396_s1 + $0x198] ss:$28 sps:$4 sm:$0xff]   ;;  %v7338_v39 = vld [vmem:[%s9396_s1 + $0x208] ss:$28 sps:$4 sm:$0xff]  }
  0xfc   : > { %1309 = vmatpush1.bf16.msra.mxu1 %v7283_v47  ;;  %v7341_v43 = vld [vmem:[%s9396_s1 + $0x240] ss:$28 sps:$4 sm:$0xff]   ;;  %v7345_v47 = vld [vmem:[%s9396_s1 + $0x278] ss:$28 sps:$4 sm:$0xff]   ;;  %vm5859_vm2 = vcmask 261120  }
  0xfd   : > { %1310 = vmatprep.subr.bf16.mxu1 %v7284_v48  ;;  %v7347_v44 = vld [vmem:[%s9396_s1 + $0x27c] ss:$28 sps:$4 sm:$0xff]   ;;  %v7352_v48 = vld [vmem:[%s9396_s1 + $0x2b4] ss:$28 sps:$4 sm:$0xff]  }
  0xfe   : > { %1272 = vmatpush1.bf16.msra.mxu0 %v7241_v33  ;;  %v7337_v33 = vld [vmem:[%s9396_s1 + $0x1d4] ss:$28 sps:$4 sm:$0xff]  }
  0xff   : > { %1273 = vmatprep.subr.bf16.mxu0 %v7242_v34  ;;  %v7359_v34 = vld [vmem:[%s9396_s1 + $0x280] ss:$28 sps:$4 sm:$0xff]  }
 0x100   : > { %1311 = vmatpush1.bf16.msra.mxu1 %v7286_v51  ;;  %v7350_v51 = vld [vmem:[%s9396_s1 + $0x2b0] ss:$28 sps:$4 sm:$0xff]  }
 0x101   : > { %1312 = vmatprep.subr.bf16.mxu1 %v7287_v52  ;;  %v7357_v52 = vld [vmem:[%s9396_s1 + $0x2ec] ss:$28 sps:$4 sm:$0xff]  }
 0x102   : > { %1274 = vmatpush1.bf16.msra.mxu0 %v7244_v37  ;;  %v7363_v37 = vld [vmem:[%s9396_s1 + $0xc0] ss:$28 sps:$4 sm:$0xff]  }
 0x103   : > { %1275 = vmatprep.subr.bf16.mxu0 %v7245_v38  ;;  %v7364_v38 = vld [vmem:[%s9396_s1 + $0x2b8] ss:$28 sps:$4 sm:$0xff]  }
 0x104   : > { %1313 = vmatpush1.bf16.msra.mxu1 %v7289_v55  ;;  %v7355_v55 = vld [vmem:[%s9396_s1 + $0x2e8] ss:$28 sps:$4 sm:$0xff]  }
 0x105   : > { %1314 = vmatprep.subr.bf16.mxu1 %v7290_v56  ;;  %v7362_v56 = vld [vmem:[%s9396_s1 + $0x324] ss:$28 sps:$4 sm:$0xff]  }
 0x106   : > { %1276 = vmatpush1.bf16.msra.mxu0 %v7247_v41  ;;  %v7368_v41 = vld [vmem:[%s9396_s1 + $0xf8] ss:$28 sps:$4 sm:$0xff]  }
 0x107   : > { %1277 = vmatprep.subr.bf16.mxu0 %v7248_v42  ;;  %v7369_v42 = vld [vmem:[%s9396_s1 + $0x2f0] ss:$28 sps:$4 sm:$0xff]  }
 0x108   : > { %1315 = vmatpush1.bf16.msra.mxu1 %v7292_v59  ;;  %v7383_v59 = vld [vmem:[#allocation4 + $0x4c] ss:$36 sps:$4 sm:$0xff]  }
 0x109   : > { %1316 = vmatprep.subr.bf16.mxu1 %v7293_v60  ;;  %v7367_v60 = vld [vmem:[%s9396_s1 + $0x35c] ss:$28 sps:$4 sm:$0xff]  }
 0x10a   : > { %1278 = vmatpush1.bf16.msra.mxu0 %v7250_v45  ;;  %v7370_v45 = vld [vmem:[%s9396_s1 + $0x130] ss:$28 sps:$4 sm:$0xff]  }
 0x10b   : > { %1279 = vmatprep.subr.bf16.mxu0 %v7251_v46  ;;  %v7371_v46 = vld [vmem:[%s9396_s1 + $0x328] ss:$28 sps:$4 sm:$0xff]  }
 0x10c   : > { %1317 = vmatpush1.bf16.msra.mxu1 %v7295_v63  ;;  %v7365_v63 = vld [vmem:[%s9396_s1 + $0x358] ss:$28 sps:$4 sm:$0xff]  }
 0x10d   : > { %1318 = vmatprep.subr.bf16.mxu1 %v7296_v1  ;;  %v7380_v1 = vld [vmem:[#allocation4 + $0xc] ss:$36 sps:$4 sm:$0xff]  }
 0x10e   : > { %1280 = vmatpush1.bf16.msra.mxu0 %v7253_v49  ;;  %v7372_v49 = vld [vmem:[%s9396_s1 + $0x168] ss:$28 sps:$4 sm:$0xff]  }
 0x10f   : > { %1281 = vmatprep.subr.bf16.mxu0 %v7254_v50  ;;  %v7373_v50 = vld [vmem:[%s9396_s1 + $0x360] ss:$28 sps:$4 sm:$0xff]  }
 0x110   : > { %1319 = vmatpush1.bf16.msra.mxu1 %v7298_v4  ;;  %v7378_v4 = vld [vmem:[#allocation4 + $0x8] ss:$36 sps:$4 sm:$0xff]  }
 0x111   : > { %1320 = vmatprep.subr.bf16.mxu1 %v7299_v5  ;;  %v7386_v5 = vld [vmem:[#allocation4 + $0x54] ss:$36 sps:$4 sm:$0xff]  }
 0x112   : > { %1282 = vmatpush1.bf16.msra.mxu0 %v7256_v53  ;;  %v7374_v53 = vld [vmem:[%s9396_s1 + $0x1a0] ss:$28 sps:$4 sm:$0xff]  }
 0x113   : > { %1283 = vmatprep.subr.bf16.mxu0 %v7257_v54  ;;  %v7377_v54 = vld [vmem:[#allocation4 + $0x4] ss:$36 sps:$4 sm:$0xff]  }
 0x114   : > { %1321 = vmatpush1.bf16.msra.mxu1 %v7301_v8  ;;  %v7384_v8 = vld [vmem:[#allocation4 + $0x50] ss:$36 sps:$4 sm:$0xff]  }
 0x115   : > { %1322 = vmatprep.subr.bf16.mxu1 %v7302_v9  ;;  %v7392_v9 = vld [vmem:[#allocation4 + $0x9c] ss:$36 sps:$4 sm:$0xff]  }
 0x116   : > { %1284 = vmatpush1.bf16.msra.mxu0 %v7259_v57  ;;  %v7360_v57 = vld [vmem:[%s9396_s1 + $0x320] ss:$28 sps:$4 sm:$0xff]  }
 0x117   : > { %1285 = vmatprep.subr.bf16.mxu0 %v7260_v58  ;;  %v7375_v58 = vld [vmem:[#allocation4] ss:$36 sps:$4 sm:$0xff]  }
 0x118   : > { %1323 = vmatpush1.bf16.msra.mxu1 %v7304_v12  ;;  %v7390_v12 = vld [vmem:[#allocation4 + $0x98] ss:$36 sps:$4 sm:$0xff]  }
 0x119   : > { %1324 = vmatprep.subr.bf16.mxu1 %v7305_v13  ;;  %v7398_v13 = vld [vmem:[#allocation4 + $0xe4] ss:$36 sps:$4 sm:$0xff]  }
 0x11a   : > { %1286 = vmatpush1.bf16.msra.mxu0 %v7262_v61  ;;  %v7381_v61 = vld [vmem:[#allocation4 + $0x48] ss:$36 sps:$4 sm:$0xff]  }
 0x11b   : > { %1337 = vmatprep.subr.bf16.mxu0 %v7313_v62  ;;  %v7389_v62 = vld [vmem:[#allocation4 + $0x94] ss:$36 sps:$4 sm:$0xff]  }
 0x11c   : > { %1325 = vmatpush1.bf16.msra.mxu1 %v7307_v17  ;;  %v7396_v17 = vld [vmem:[#allocation4 + $0xe0] ss:$36 sps:$4 sm:$0xff]  }
 0x11d   : > { %1288 = vmatmul.mubr.bf16.vlgmr.msra.gmra.mrb[0].mxu0 %v8837_v0  ;;  %1326 = vmatprep.subr.bf16.mxu1 %v7308_v18  ;;  %v7404_v18 = vld [vmem:[#allocation4 + $0x12c] ss:$36 sps:$4 sm:$0xff]  }
 0x11e   : > { %1338 = vmatpush1.bf16.msra.mxu0 %v7311_v2  ;;  %1369 = vmatprep.mubr.bf16.mxu0 %v8723_v27  ;;  %v7387_v2 = vld [vmem:[#allocation4 + $0x90] ss:$36 sps:$4 sm:$0xff]  }
 0x11f   : > { %1339 = vmatprep.subr.bf16.mxu0 %v7316_v3  ;;  %v7395_v3 = vld [vmem:[#allocation4 + $0xdc] ss:$36 sps:$4 sm:$0xff]  }
 0x120   : > { %1327 = vmatpush1.bf16.msra.mxu1 %v7310_v21  ;;  %v7410_v21 = vld [vmem:[#allocation4 + $0x174] ss:$36 sps:$4 sm:$0xff]  }
 0x121   : > { %6811 = vmatprep.subr.bf16.mxu1 %v7344_v22  ;;  %v7417_v22 = vld [vmem:[#allocation4 + $0x1f8] ss:$36 sps:$4 sm:$0xff]  }
 0x122   : > { %1340 = vmatpush1.bf16.msra.mxu0 %v7314_v6  ;;  %v7393_v6 = vld [vmem:[#allocation4 + $0xd8] ss:$36 sps:$4 sm:$0xff]  }
 0x123   : > { %1341 = vmatprep.subr.bf16.mxu0 %v7319_v7  ;;  %1329 = vmatmul.mubr.bf16.vlgmr.msra.gmra.mrb[0].mxu1 %v8837_v0  ;;  %v7401_v7 = vld [vmem:[#allocation4 + $0x124] ss:$36 sps:$4 sm:$0xff]  }
 0x124   : > { %6812 = vmatpush3.bf16.msra.mxu1 %v7348_v25  ;;  %1410 = vmatprep.mubr.bf16.mxu1 %v8723_v27  ;;  %v7358_v27 = vld [vmem:[%s9396_s1 + $0x88] ss:$28 sps:$4 sm:$0xff]  }
 0x125   : > { %6813 = vmatprep.subr.bf16.mxu1 %v7349_v26  ;;  %v7416_v25 = vld [vmem:[#allocation4 + $0x1bc] ss:$36 sps:$4 sm:$0xff]  }
 0x126   : > { %1342 = vmatpush1.bf16.msra.mxu0 %v7317_v10  ;;  %v7399_v10 = vld [vmem:[#allocation4 + $0x120] ss:$36 sps:$4 sm:$0xff]  }
 0x127   : > { %1343 = vmatprep.subr.bf16.mxu0 %v7322_v11  ;;  %v7407_v11 = vld [vmem:[#allocation4 + $0x16c] ss:$36 sps:$4 sm:$0xff]   ;;  %v7423_v26 = vld [vmem:[#allocation4 + $0x240] ss:$36 sps:$4 sm:$0xff]  }
 0x128   : > { %6814 = vmatpush3.bf16.msra.mxu1 %v7353_v30  ;;  %v7422_v30 = vld [vmem:[#allocation4 + $0x204] ss:$36 sps:$4 sm:$0xff]  }
 0x129   : > { %6815 = vmatprep.subr.bf16.mxu1 %v7354_v31  ;;  %v7429_v31 = vld [vmem:[#allocation4 + $0x288] ss:$36 sps:$4 sm:$0xff]  }
 0x12a   : > { %1344 = vmatpush1.bf16.msra.mxu0 %v7320_v14  ;;  %v7405_v14 = vld [vmem:[#allocation4 + $0x168] ss:$36 sps:$4 sm:$0xff]  }
 0x12b   : > { %1345 = vmatprep.subr.bf16.mxu0 %v7325_v16  ;;  %v7413_v16 = vld [vmem:[#allocation4 + $0x1b4] ss:$36 sps:$4 sm:$0xff]  }
 0x12c   : > { %6816 = vmatpush3.bf16.msra.mxu1 %v7358_v27  ;;  %v7428_v27 = vld [vmem:[#allocation4 + $0x24c] ss:$36 sps:$4 sm:$0xff]  }
 0x12d   : > { %6817 = vmatprep.subr.bf16.mxu1 %v7359_v34  ;;  %v7435_v34 = vld [vmem:[#allocation4 + $0x2d0] ss:$36 sps:$4 sm:$0xff]  }
 0x12e   : > { %1346 = vmatpush1.bf16.msra.mxu0 %v7323_v19  ;;  %v7419_v19 = vld [vmem:[#allocation4 + $0x1fc] ss:$36 sps:$4 sm:$0xff]  }
 0x12f   : > { %1347 = vmatprep.subr.bf16.mxu0 %v7328_v20  ;;  %v7402_v20 = vld [vmem:[#allocation4 + $0x128] ss:$36 sps:$4 sm:$0xff]  }
 0x130   : > { %6818 = vmatpush3.bf16.msra.mxu1 %v7363_v37  ;;  %v7434_v37 = vld [vmem:[#allocation4 + $0x294] ss:$36 sps:$4 sm:$0xff]  }
 0x131   : > { %6819 = vmatprep.subr.bf16.mxu1 %v7364_v38  ;;  %v7441_v38 = vld [vmem:[#allocation4 + $0x318] ss:$36 sps:$4 sm:$0xff]  }
 0x132   : > { %1348 = vmatpush1.bf16.msra.mxu0 %v7326_v23  ;;  %v7425_v23 = vld [vmem:[#allocation4 + $0x244] ss:$36 sps:$4 sm:$0xff]  }
 0x133   : > { %1349 = vmatprep.subr.bf16.mxu0 %v7331_v24  ;;  %v7408_v24 = vld [vmem:[#allocation4 + $0x170] ss:$36 sps:$4 sm:$0xff]  }
 0x134   : > { %6820 = vmatpush3.bf16.msra.mxu1 %v7368_v41  ;;  %v7440_v41 = vld [vmem:[#allocation4 + $0x2dc] ss:$36 sps:$4 sm:$0xff]  }
 0x135   : > { %6821 = vmatprep.subr.bf16.mxu1 %v7369_v42  ;;  %v7447_v42 = vld [vmem:[#allocation4 + $0x360] ss:$36 sps:$4 sm:$0xff]  }
 0x136   : > { %1350 = vmatpush1.bf16.msra.mxu0 %v7329_v28  ;;  %v7431_v28 = vld [vmem:[#allocation4 + $0x28c] ss:$36 sps:$4 sm:$0xff]  }
 0x137   : > { %1351 = vmatprep.subr.bf16.mxu0 %v7334_v29  ;;  %v7414_v29 = vld [vmem:[#allocation4 + $0x1b8] ss:$36 sps:$4 sm:$0xff]  }
 0x138   : > { %6822 = vmatpush3.bf16.msra.mxu1 %v7370_v45  ;;  %v7446_v45 = vld [vmem:[#allocation4 + $0x324] ss:$36 sps:$4 sm:$0xff]  }
 0x139   : > { %6823 = vmatprep.subr.bf16.mxu1 %v7371_v46  ;;  %v7453_v46 = vld [vmem:[#allocation4 + $0x3a8] ss:$36 sps:$4 sm:$0xff]  }
 0x13a   : > { %1352 = vmatpush1.bf16.msra.mxu0 %v7332_v32  ;;  %v7437_v32 = vld [vmem:[#allocation4 + $0x2d4] ss:$36 sps:$4 sm:$0xff]  }
 0x13b   : > { %1353 = vmatprep.subr.bf16.mxu0 %v7337_v33  ;;  %v7420_v33 = vld [vmem:[#allocation4 + $0x200] ss:$36 sps:$4 sm:$0xff]  }
 0x13c   : > { %6824 = vmatpush3.bf16.msra.mxu1 %v7372_v49  ;;  %v7452_v49 = vld [vmem:[#allocation4 + $0x36c] ss:$36 sps:$4 sm:$0xff]  }
 0x13d   : > { %6825 = vmatprep.subr.bf16.mxu1 %v7373_v50  ;;  %v7459_v50 = vld [vmem:[#allocation4 + $0x3f0] ss:$36 sps:$4 sm:$0xff]  }
 0x13e   : > { %1354 = vmatpush1.bf16.msra.mxu0 %v7335_v35  ;;  %v7443_v35 = vld [vmem:[#allocation4 + $0x31c] ss:$36 sps:$4 sm:$0xff]  }
 0x13f   : > { %1355 = vmatprep.subr.bf16.mxu0 %v7340_v36  ;;  %v7426_v36 = vld [vmem:[#allocation4 + $0x248] ss:$36 sps:$4 sm:$0xff]  }
 0x140   : > { %6826 = vmatpush3.bf16.msra.mxu1 %v7374_v53  ;;  %v7458_v53 = vld [vmem:[#allocation4 + $0x3b4] ss:$36 sps:$4 sm:$0xff]  }
 0x141   : > { %4229 = vmatprep.subr.bf16.mxu1 %v7377_v54  ;;  %v7465_v54 = vld [vmem:[#allocation4 + $0x438] ss:$36 sps:$4 sm:$0xff]  }
 0x142   : > { %1356 = vmatpush1.bf16.msra.mxu0 %v7338_v39  ;;  %v7449_v39 = vld [vmem:[#allocation4 + $0x364] ss:$36 sps:$4 sm:$0xff]  }
 0x143   : > { %1357 = vmatprep.subr.bf16.mxu0 %v7343_v40  ;;  %1411 = vmatmul.mubr.bf16.vlgmr.msra.gmra.mrb[4].mxu1 %v8837_v0  ;;  %v7432_v40 = vld [vmem:[#allocation4 + $0x290] ss:$36 sps:$4 sm:$0xff]  }
 0x144   : > { %4230 = vmatpush1.bf16.msra.mxu1 %v7375_v58  ;;  %v7462_v58 = vld [vmem:[#allocation4 + $0x3f8] ss:$36 sps:$4 sm:$0xff]  }
 0x145   : > { %4231 = vmatprep.subr.bf16.mxu1 %v7383_v59  ;;  %v7470_v59 = vld [vmem:[#allocation4 + $0x444] ss:$36 sps:$4 sm:$0xff]  }
 0x146   : > { %1358 = vmatpush1.bf16.msra.mxu0 %v7341_v43  ;;  %v7455_v43 = vld [vmem:[#allocation4 + $0x3ac] ss:$36 sps:$4 sm:$0xff]  }
 0x147   : > { %1359 = vmatprep.subr.bf16.mxu0 %v7347_v44  ;;  %v7438_v44 = vld [vmem:[#allocation4 + $0x2d8] ss:$36 sps:$4 sm:$0xff]  }
 0x148   : > { %4232 = vmatpush1.bf16.msra.mxu1 %v7381_v61  ;;  %v7476_v61 = vld [vmem:[#allocation4 + $0x48c] ss:$36 sps:$4 sm:$0xff]  }
 0x149   : > { %4233 = vmatprep.subr.bf16.mxu1 %v7389_v62  ;;  %v1222_v62 = vsub.s32 0, %v8686_v15 }
 0x14a   : > { %1360 = vmatpush1.bf16.msra.mxu0 %v7345_v47  ;;  %v7461_v47 = vld [vmem:[#allocation4 + $0x3f4] ss:$36 sps:$4 sm:$0xff]  }
 0x14b   : > { %1361 = vmatprep.subr.bf16.mxu0 %v7352_v48  ;;  %v7444_v48 = vld [vmem:[#allocation4 + $0x320] ss:$36 sps:$4 sm:$0xff]  }
 0x14c   : > { %4234 = vmatpush1.bf16.msra.mxu1 %v7387_v2 }
 0x14d   : > { %4235 = vmatprep.subr.bf16.mxu1 %v7395_v3 }
 0x14e   : > { %1362 = vmatpush1.bf16.msra.mxu0 %v7350_v51  ;;  %v7467_v51 = vld [vmem:[#allocation4 + $0x43c] ss:$36 sps:$4 sm:$0xff]  }
 0x14f   : > { %1363 = vmatprep.subr.bf16.mxu0 %v7357_v52  ;;  %v7450_v52 = vld [vmem:[#allocation4 + $0x368] ss:$36 sps:$4 sm:$0xff]  }
 0x150   : > { %4236 = vmatpush1.bf16.msra.mxu1 %v7393_v6 }
 0x151   : > { %4237 = vmatprep.subr.bf16.mxu1 %v7401_v7 }
 0x152   : > { %1364 = vmatpush1.bf16.msra.mxu0 %v7355_v55  ;;  %v7473_v55 = vld [vmem:[#allocation4 + $0x484] ss:$36 sps:$4 sm:$0xff]  }
 0x153   : > { %1365 = vmatprep.subr.bf16.mxu0 %v7362_v56  ;;  %v7456_v56 = vld [vmem:[#allocation4 + $0x3b0] ss:$36 sps:$4 sm:$0xff]  }
 0x154   : > { %4238 = vmatpush1.bf16.msra.mxu1 %v7399_v10 }
 0x155   : > { %4239 = vmatprep.subr.bf16.mxu1 %v7407_v11 }
 0x156   : > { %1366 = vmatpush1.bf16.msra.mxu0 %v7360_v57  ;;  %v7464_v57 = vld [vmem:[#allocation4 + $0x3fc] ss:$36 sps:$4 sm:$0xff]  }
 0x157   : > { %1367 = vmatprep.subr.bf16.mxu0 %v7367_v60  ;;  %v7468_v60 = vld [vmem:[#allocation4 + $0x440] ss:$36 sps:$4 sm:$0xff]  }
 0x158   : > { %4240 = vmatpush1.bf16.msra.mxu1 %v7405_v14 }
 0x159   : > { %4241 = vmatprep.subr.bf16.mxu1 %v7413_v16  ;;  %v7479_v16 = vld [vmem:[#allocation4 + $0x4cc] ss:$36 sps:$4 sm:$0xff]  }
 0x15a   : > { %1368 = vmatpush1.bf16.msra.mxu0 %v7365_v63  ;;  %v9017_v63 = vld [vmem:[#allocation2] sm:$0x7f] }
 0x15b   : > { %4393 = vmatprep.subr.bf16.mxu0 %v7380_v1  ;;  %v1226_v1 = vsub.s32 1, %v8686_v15  ;;  %v1223_v2 = vrot.slane %v9017_v63, %v1222_v62 }
 0x15d   : > { %1370 = vmatmul.mubr.bf16.vlgmr.msra.gmra.mrb[4].mxu0 %v8837_v0  ;;  %v7411_v0 = vld [vmem:[#allocation4 + $0x1b0] ss:$36 sps:$4 sm:$0xff]   ;;  %v1227_v3 = vrot.slane %v9017_v63, %v1226_v1 }
 0x15e   : > { %4394 = vmatpush1.bf16.msra.mxu0 %v7378_v4  ;;  %4242 = vmatpush1.bf16.msra.mxu1 %v7411_v0  ;;  %v7477_v0 = vld [vmem:[#allocation4 + $0x4c8] ss:$36 sps:$4 sm:$0xff]  }
 0x15f   : > { %4395 = vmatprep.subr.bf16.mxu0 %v7386_v5  ;;  %4243 = vmatprep.subr.bf16.mxu1 %v7419_v19  ;;  %v7480_v19 = vld [vmem:[#allocation4 + $0x4d0] ss:$36 sps:$4 sm:$0xff]  }
 0x162   : > { %4396 = vmatpush1.bf16.msra.mxu0 %v7384_v8  ;;  %4244 = vmatpush1.bf16.msra.mxu1 %v7417_v22  ;;  %v7483_v22 = vld [vmem:[#allocation4 + $0x510] ss:$36 sps:$4 sm:$0xff]  }
 0x163   : > { %4397 = vmatprep.subr.bf16.mxu0 %v7392_v9  ;;  %4245 = vmatprep.subr.bf16.mxu1 %v7425_v23  ;;  %v7486_v23 = vld [vmem:[#allocation4 + $0x518] ss:$36 sps:$4 sm:$0xff]  }
 0x166   : > { %4398 = vmatpush1.bf16.msra.mxu0 %v7390_v12  ;;  %4246 = vmatpush1.bf16.msra.mxu1 %v7423_v26  ;;  %v7471_v12 = vld [vmem:[#allocation4 + $0x480] ss:$36 sps:$4 sm:$0xff]   ;;  %v1234_v26 = vsub.s32 3, %v8686_v15 }
 0x167   : > { %4399 = vmatprep.subr.bf16.mxu0 %v7398_v13  ;;  %4247 = vmatprep.subr.bf16.mxu1 %v7431_v28  ;;  %v7474_v13 = vld [vmem:[#allocation4 + $0x488] ss:$36 sps:$4 sm:$0xff]   ;;  %v7489_v28 = vld [vmem:[#allocation4 + $0x558] ss:$36 sps:$4 sm:$0xff]  }
 0x16a   : > { %4400 = vmatpush1.bf16.msra.mxu0 %v7396_v17  ;;  %4248 = vmatpush1.bf16.msra.mxu1 %v7429_v31  ;;  %v7500_v31 = vld [vmem:[#allocation4 + $0x5ac] ss:$36 sps:$4 sm:$0xff]  }
 0x16b   : > { %4401 = vmatprep.subr.bf16.mxu0 %v7404_v18  ;;  %4249 = vmatprep.subr.bf16.mxu1 %v7437_v32  ;;  %v7482_v18 = vld [vmem:[#allocation4 + $0x4d4] ss:$36 sps:$4 sm:$0xff]   ;;  %v1235_v32 = vrot.slane %v9017_v63, %v1234_v26 }
 0x16e   : > { %4402 = vmatpush1.bf16.msra.mxu0 %v7402_v20  ;;  %4250 = vmatpush1.bf16.msra.mxu1 %v7435_v34  ;;  %v7485_v20 = vld [vmem:[#allocation4 + $0x514] ss:$36 sps:$4 sm:$0xff]   ;;  %v7503_v34 = vld [vmem:[#allocation4 + $0x5ec] ss:$36 sps:$4 sm:$0xff]  }
 0x16f   : > { %4403 = vmatprep.subr.bf16.mxu0 %v7410_v21  ;;  %4251 = vmatprep.subr.bf16.mxu1 %v7443_v35  ;;  %v7488_v21 = vld [vmem:[#allocation4 + $0x51c] ss:$36 sps:$4 sm:$0xff]   ;;  %v7506_v35 = vld [vmem:[#allocation4 + $0x5f4] ss:$36 sps:$4 sm:$0xff]  }
 0x172   : > { %4404 = vmatpush1.bf16.msra.mxu0 %v7408_v24  ;;  %4252 = vmatpush1.bf16.msra.mxu1 %v7441_v38  ;;  %v7491_v24 = vld [vmem:[#allocation4 + $0x55c] ss:$36 sps:$4 sm:$0xff]   ;;  %v7501_v38 = vld [vmem:[#allocation4 + $0x5e8] ss:$36 sps:$4 sm:$0xff]  }
 0x173   : > { %4405 = vmatprep.subr.bf16.mxu0 %v7416_v25  ;;  %4253 = vmatprep.subr.bf16.mxu1 %v7449_v39  ;;  %v7494_v25 = vld [vmem:[#allocation4 + $0x564] ss:$36 sps:$4 sm:$0xff]   ;;  %v7504_v39 = vld [vmem:[#allocation4 + $0x5f0] ss:$36 sps:$4 sm:$0xff]  }
 0x176   : > { %4406 = vmatpush1.bf16.msra.mxu0 %v7414_v29  ;;  %4254 = vmatpush1.bf16.msra.mxu1 %v7447_v42  ;;  %v7492_v29 = vld [vmem:[#allocation4 + $0x560] ss:$36 sps:$4 sm:$0xff]  }
 0x177   : > { %4407 = vmatprep.subr.bf16.mxu0 %v7422_v30  ;;  %4255 = vmatprep.subr.bf16.mxu1 %v7455_v43  ;;  %v7497_v30 = vld [vmem:[#allocation4 + $0x5a4] ss:$36 sps:$4 sm:$0xff]   ;;  %v7509_v43 = vld [vmem:[#allocation4 + $0x634] ss:$36 sps:$4 sm:$0xff]  }
 0x17a   : > { %4408 = vmatpush1.bf16.msra.mxu0 %v7420_v33  ;;  %4256 = vmatpush1.bf16.msra.mxu1 %v7453_v46  ;;  %v7495_v33 = vld [vmem:[#allocation4 + $0x5a0] ss:$36 sps:$4 sm:$0xff]   ;;  %v7507_v46 = vld [vmem:[#allocation4 + $0x630] ss:$36 sps:$4 sm:$0xff]  }
 0x17b   : > { %4409 = vmatprep.subr.bf16.mxu0 %v7428_v27  ;;  %4257 = vmatprep.subr.bf16.mxu1 %v7461_v47  ;;  %v7498_v27 = vld [vmem:[#allocation4 + $0x5a8] ss:$36 sps:$4 sm:$0xff]  }
 0x17e   : > { %4410 = vmatpush1.bf16.msra.mxu0 %v7426_v36  ;;  %4258 = vmatpush1.bf16.msra.mxu1 %v7459_v50  ;;  %v7518_v50 = vld [vmem:[#allocation4 + $0x684] ss:$36 sps:$4 sm:$0xff]  }
 0x17f   : > { %4411 = vmatprep.subr.bf16.mxu0 %v7434_v37  ;;  %4259 = vmatprep.subr.bf16.mxu1 %v7467_v51  ;;  %v7513_v51 = vld [vmem:[#allocation4 + $0x678] ss:$36 sps:$4 sm:$0xff]  }
 0x182   : > { %4412 = vmatpush1.bf16.msra.mxu0 %v7432_v40  ;;  %4260 = vmatpush1.bf16.msra.mxu1 %v7465_v54  ;;  %v7524_v54 = vld [vmem:[#allocation4 + $0x6cc] ss:$36 sps:$4 sm:$0xff]  }
 0x183   : > { %4413 = vmatprep.subr.bf16.mxu0 %v7440_v41  ;;  %4270 = vmatprep.subr.bf16.mxu1 %v7473_v55  ;;  %v7519_v55 = vld [vmem:[#allocation4 + $0x6c0] ss:$36 sps:$4 sm:$0xff]  }
 0x186   : > { %4414 = vmatpush1.bf16.msra.mxu0 %v7438_v44  ;;  %v7512_v44 = vld [vmem:[#allocation4 + $0x63c] ss:$36 sps:$4 sm:$0xff]  }
 0x187   : > { %4415 = vmatprep.subr.bf16.mxu0 %v7446_v45 }
 0x18a   : > { %4416 = vmatpush1.bf16.msra.mxu0 %v7444_v48  ;;  %v7510_v48 = vld [vmem:[#allocation4 + $0x638] ss:$36 sps:$4 sm:$0xff]  }
 0x18b   : > { %4417 = vmatprep.subr.bf16.mxu0 %v7452_v49  ;;  %v7515_v49 = vld [vmem:[#allocation4 + $0x67c] ss:$36 sps:$4 sm:$0xff]  }
 0x18e   : > { %4418 = vmatpush1.bf16.msra.mxu0 %v7450_v52  ;;  %v7516_v52 = vld [vmem:[#allocation4 + $0x680] ss:$36 sps:$4 sm:$0xff]  }
 0x18f   : > { %4419 = vmatprep.subr.bf16.mxu0 %v7458_v53  ;;  %v7521_v53 = vld [vmem:[#allocation4 + $0x6c4] ss:$36 sps:$4 sm:$0xff]  }
 0x192   : > { %4420 = vmatpush1.bf16.msra.mxu0 %v7456_v56  ;;  %v7522_v56 = vld [vmem:[#allocation4 + $0x6c8] ss:$36 sps:$4 sm:$0xff]  }
 0x193   : > { %4421 = vmatprep.subr.bf16.mxu0 %v7464_v57  ;;  %v7527_v57 = vld [vmem:[#allocation4 + $0x70c] ss:$36 sps:$4 sm:$0xff]  }
 0x196   : > { %4422 = vmatpush1.bf16.msra.mxu0 %v7462_v58  ;;  %v7530_v58 = vld [vmem:[#allocation4 + $0x714] ss:$36 sps:$4 sm:$0xff]  }
 0x197   : > { %4423 = vmatprep.subr.bf16.mxu0 %v7470_v59  ;;  %v7525_v59 = vld [vmem:[#allocation4 + $0x708] ss:$36 sps:$4 sm:$0xff]  }
 0x19a   : > { %4424 = vmatpush1.bf16.msra.mxu0 %v7468_v60  ;;  %v7528_v60 = vld [vmem:[#allocation4 + $0x710] ss:$36 sps:$4 sm:$0xff]  }
 0x19b   : > { %4434 = vmatprep.subr.bf16.mxu0 %v7476_v61  ;;  %v7533_v61 = vld [vmem:[#allocation4 + $0x754] ss:$36 sps:$4 sm:$0xff]  }
 0x1f0   : > { %v1289_v4 = vpop.f32.mrb[0].mxu0 }
 0x1f1   : > { %v1290_v5 = vadd.f32 %v1289_v4, %v1223_v2  ;;  %v1291_v6 = vpop.f32.mrb[1].mxu0  ;;  %v7536_v2 = vld [vmem:[#allocation4 + $0x75c] ss:$36 sps:$4 sm:$0xff]  }
 0x1f2   : > { %v1292_v7 = vadd.f32 %v1291_v6, %v1227_v3  ;;  %v1293_v8 = vpop.f32.mrb[2].mxu0  ;;  %v7531_v3 = vld [vmem:[#allocation4 + $0x750] ss:$36 sps:$4 sm:$0xff]   ;;  %v7534_v4 = vld [vmem:[#allocation4 + $0x758] ss:$36 sps:$4 sm:$0xff]  }
 0x1f3   : > { %v1418_v9 = vmax.f32 %v1290_v5, 0.0  ;;  %v1294_v10 = vpop.f32.mrb[3].mxu0  ;;  %v7539_v5 = vld [vmem:[#allocation4 + $0x79c] ss:$36 sps:$4 sm:$0xff]   ;;  %v7542_v6 = vld [vmem:[#allocation4 + $0x7a4] ss:$36 sps:$4 sm:$0xff]  }
 0x1f4   : > { %v1419_v11 = vmax.f32 %v1292_v7, 0.0  ;;  %v7537_v7 = vld [vmem:[#allocation4 + $0x798] ss:$36 sps:$4 sm:$0xff]   ;;  %v7540_v8 = vld [vmem:[#allocation4 + $0x7a0] ss:$36 sps:$4 sm:$0xff]  }
 0x1f5   : > { %v9028_v17 = vpack.c.bf16 %v1418_v9, %v1418_v9  ;;  %v7545_v9 = vld [vmem:[#allocation4 + $0x7e4] ss:$36 sps:$4 sm:$0xff]   ;;  %v7548_v10 = vld [vmem:[#allocation4 + $0x7ec] ss:$36 sps:$4 sm:$0xff]  }
 0x1f6   : > { %v9026_v14 = vpack.c.bf16 %v1419_v11, %v1419_v11  ;;  %v9038_v36 = vpop.f32.mrb[0].mxu1  ;;  %v7543_v11 = vld [vmem:[#allocation4 + $0x7e0] ss:$36 sps:$4 sm:$0xff]  }
 0x1f7   : > { %v1332_v37 = vpop.f32.mrb[1].mxu1 }
 0x1f8   : > { %4261 = vmatprep.mubr.bf16.mxu1 %v9026_v14  ;;  %4425 = vmatprep.mubr.bf16.mxu0 %v9026_v14  ;;  %v1333_v40 = vadd.f32 %v1332_v37, %v1235_v32  ;;  %v1334_v41 = vpop.f32.mrb[2].mxu1  ;;  %v7561_v37 = vld [vmem:[#allocation4 + $0x8b8] ss:$36 sps:$4 sm:$0xff]  }
 0x1f9   : > { %4262 = vmatmul.mubr.bf16.vlgmr.msra.gmra.mrb[8].mxu1 %v9028_v17  ;;  %4426 = vmatmul.mubr.bf16.vlgmr.msra.gmra.mrb[8].mxu0 %v9028_v17  ;;  %v1335_v42 = vpop.f32.mrb[3].mxu1 }
 0x1fa   : > { %4271 = vmatpush1.bf16.msra.mxu1 %v7471_v12  ;;  %4435 = vmatpush1.bf16.msra.mxu0 %v7474_v13  ;;  %v1421_v45 = vmax.f32 %v1333_v40, 0.0  ;;  %v7546_v12 = vld [vmem:[#allocation4 + $0x7e8] ss:$36 sps:$4 sm:$0xff]   ;;  %v1230_v13 = vsub.s32 2, %v8686_v15  ;;  %v7564_v40 = vld [vmem:[#allocation4 + $0x8c0] ss:$36 sps:$4 sm:$0xff]  }
 0x1fb   : > { %4272 = vmatprep.subr.bf16.mxu1 %v7479_v16  ;;  %4436 = vmatprep.subr.bf16.mxu0 %v7482_v18  ;;  %v7551_v18 = vld [vmem:[#allocation4 + $0x82c] ss:$36 sps:$4 sm:$0xff]  }
 0x1fc   : > { %v9040_v47 = vpack.c.bf16 %v1421_v45, %v1421_v45 }
 0x1fe   : > { %4273 = vmatpush1.bf16.msra.mxu1 %v7477_v0  ;;  %4437 = vmatpush1.bf16.msra.mxu0 %v7480_v19  ;;  %v7554_v0 = vld [vmem:[#allocation4 + $0x834] ss:$36 sps:$4 sm:$0xff]  }
 0x1ff   : > { %4274 = vmatprep.subr.bf16.mxu1 %v7485_v20  ;;  %4438 = vmatprep.subr.bf16.mxu0 %v7488_v21  ;;  %v7549_v20 = vld [vmem:[#allocation4 + $0x828] ss:$36 sps:$4 sm:$0xff]  }
 0x200   : > { %4302 = vmatprep.mubr.bf16.mxu1 %v9040_v47  ;;  %4466 = vmatprep.mubr.bf16.mxu0 %v9040_v47 }
 0x202   : > { %4275 = vmatpush1.bf16.msra.mxu1 %v7483_v22  ;;  %4439 = vmatpush1.bf16.msra.mxu0 %v7486_v23  ;;  %v7552_v23 = vld [vmem:[#allocation4 + $0x830] ss:$36 sps:$4 sm:$0xff]  }
 0x203   : > { %4276 = vmatprep.subr.bf16.mxu1 %v7491_v24  ;;  %4440 = vmatprep.subr.bf16.mxu0 %v7494_v25  ;;  %v1231_v24 = vrot.slane %v9017_v63, %v1230_v13  ;;  %v1242_v25 = vsub.s32 5, %v8686_v15 }
 0x205   : > { %v1331_v32 = vadd.f32 %v9038_v36, %v1231_v24  ;;  %v7620_v24 = vld [vmem:[#allocation4 + $0xb4c] ss:$36 sps:$4 sm:$0xff]  }
 0x206   : > { %4277 = vmatpush1.bf16.msra.mxu1 %v7489_v28  ;;  %4441 = vmatpush1.bf16.msra.mxu0 %v7492_v29  ;;  %v7557_v29 = vld [vmem:[#allocation4 + $0x874] ss:$36 sps:$4 sm:$0xff]  }
 0x207   : > { %4278 = vmatprep.subr.bf16.mxu1 %v7497_v30  ;;  %4442 = vmatprep.subr.bf16.mxu0 %v7500_v31  ;;  %v7560_v30 = vld [vmem:[#allocation4 + $0x87c] ss:$36 sps:$4 sm:$0xff]   ;;  %v7555_v31 = vld [vmem:[#allocation4 + $0x870] ss:$36 sps:$4 sm:$0xff]  }
 0x20a   : > { %4279 = vmatpush1.bf16.msra.mxu1 %v7495_v33  ;;  %4443 = vmatpush1.bf16.msra.mxu0 %v7498_v27  ;;  %v7558_v33 = vld [vmem:[#allocation4 + $0x878] ss:$36 sps:$4 sm:$0xff]   ;;  %v1243_v27 = vrot.slane %v9017_v63, %v1242_v25  ;;  %v7567_v63 = vld [vmem:[#allocation4 + $0x900] ss:$36 sps:$4 sm:$0xff]  }
 0x20b   : > { %4280 = vmatprep.subr.bf16.mxu1 %v7503_v34  ;;  %4444 = vmatprep.subr.bf16.mxu0 %v7506_v35  ;;  %v7563_v34 = vld [vmem:[#allocation4 + $0x8bc] ss:$36 sps:$4 sm:$0xff]   ;;  %v7566_v35 = vld [vmem:[#allocation4 + $0x8c4] ss:$36 sps:$4 sm:$0xff]  }
 0x20e   : > { %4281 = vmatpush1.bf16.msra.mxu1 %v7501_v38  ;;  %4445 = vmatpush1.bf16.msra.mxu0 %v7504_v39  ;;  %v1420_v39 = vmax.f32 %v1331_v32, 0.0  ;;  %v7621_v32 = vld [vmem:[#allocation4 + $0xb88] ss:$36 sps:$4 sm:$0xff]  }
 0x20f   : > { %4282 = vmatprep.subr.bf16.mxu1 %v7509_v43  ;;  %4446 = vmatprep.subr.bf16.mxu0 %v7512_v44  ;;  %v7569_v43 = vld [vmem:[#allocation4 + $0x904] ss:$36 sps:$4 sm:$0xff]   ;;  %v7572_v44 = vld [vmem:[#allocation4 + $0x90c] ss:$36 sps:$4 sm:$0xff]  }
 0x212   : > { %4283 = vmatpush1.bf16.msra.mxu1 %v7507_v46  ;;  %4447 = vmatpush1.bf16.msra.mxu0 %v7510_v48  ;;  %v9057_v48 = vpack.c.bf16 %v1420_v39, %v1420_v39  ;;  %v7635_v39 = vld [vmem:[#allocation4 + $0xc1c] ss:$36 sps:$4 sm:$0xff]  }
 0x213   : > { %4284 = vmatprep.subr.bf16.mxu1 %v7515_v49  ;;  %4448 = vmatprep.subr.bf16.mxu0 %v7518_v50  ;;  %v7570_v49 = vld [vmem:[#allocation4 + $0x908] ss:$36 sps:$4 sm:$0xff]  }
 0x214   : > { %v7575_v50 = vld [vmem:[#allocation4 + $0x94c] ss:$36 sps:$4 sm:$0xff]  }
 0x216   : > { %4285 = vmatpush1.bf16.msra.mxu1 %v7513_v51  ;;  %4449 = vmatpush1.bf16.msra.mxu0 %v7516_v52  ;;  %v6827_v16 = vpop.f32.mrb[4].mxu1  ;;  %v7578_v51 = vld [vmem:[#allocation4 + $0x954] ss:$36 sps:$4 sm:$0xff]   ;;  %v7573_v52 = vld [vmem:[#allocation4 + $0x948] ss:$36 sps:$4 sm:$0xff]  }
 0x217   : > { %4286 = vmatprep.subr.bf16.mxu1 %v7521_v53  ;;  %4450 = vmatprep.subr.bf16.mxu0 %v7524_v54  ;;  %v6828_v19 = vpop.f32.mrb[5].mxu1  ;;  %v7576_v54 = vld [vmem:[#allocation4 + $0x950] ss:$36 sps:$4 sm:$0xff]  }
 0x218   : > { %v9045_v21 = vadd.f32 %v6828_v19, %v6827_v16  ;;  %v6830_v22 = vpop.f32.mrb[6].mxu1  ;;  %v7603_v16 = vld [vmem:[#allocation4 + $0xab0] ss:$36 sps:$4 sm:$0xff]   ;;  %v7614_v19 = vld [vmem:[#allocation4 + $0xb04] ss:$36 sps:$4 sm:$0xff]  }
 0x219   : > { %v6831_v28 = vpop.f32.mrb[7].mxu1  ;;  %v7612_v22 = vld [vmem:[#allocation4 + $0xb00] ss:$36 sps:$4 sm:$0xff]  }
 0x21a   : > { %4287 = vmatpush1.bf16.msra.mxu1 %v7519_v55  ;;  %4451 = vmatpush1.bf16.msra.mxu0 %v7522_v56  ;;  %v7581_v55 = vld [vmem:[#allocation4 + $0x994] ss:$36 sps:$4 sm:$0xff]   ;;  %v7584_v56 = vld [vmem:[#allocation4 + $0x99c] ss:$36 sps:$4 sm:$0xff]  }
 0x21b   : > { %4288 = vmatprep.subr.bf16.mxu1 %v7527_v57  ;;  %4452 = vmatprep.subr.bf16.mxu0 %v7530_v58  ;;  %v7579_v57 = vld [vmem:[#allocation4 + $0x990] ss:$36 sps:$4 sm:$0xff]   ;;  %v7582_v58 = vld [vmem:[#allocation4 + $0x998] ss:$36 sps:$4 sm:$0xff]   ;;  %v7615_v28 = vld [vmem:[#allocation4 + $0xb40] ss:$36 sps:$4 sm:$0xff]  }
 0x21e   : > { %4289 = vmatpush1.bf16.msra.mxu1 %v7525_v59  ;;  %4453 = vmatpush1.bf16.msra.mxu0 %v7528_v60  ;;  %v7587_v59 = vld [vmem:[#allocation4 + $0x9dc] ss:$36 sps:$4 sm:$0xff]   ;;  %v7590_v60 = vld [vmem:[#allocation4 + $0x9e4] ss:$36 sps:$4 sm:$0xff]  }
 0x21f   : > { %4290 = vmatprep.subr.bf16.mxu1 %v7533_v61  ;;  %4454 = vmatprep.subr.bf16.mxu0 %v7536_v2  ;;  %v7585_v61 = vld [vmem:[#allocation4 + $0x9d8] ss:$36 sps:$4 sm:$0xff]   ;;  %v7588_v2 = vld [vmem:[#allocation4 + $0x9e0] ss:$36 sps:$4 sm:$0xff]  }
 0x222   : > { %4291 = vmatpush1.bf16.msra.mxu1 %v7531_v3  ;;  %4455 = vmatpush1.bf16.msra.mxu0 %v7534_v4  ;;  %v7593_v3 = vld [vmem:[#allocation4 + $0xa24] ss:$36 sps:$4 sm:$0xff]   ;;  %v7596_v4 = vld [vmem:[#allocation4 + $0xa2c] ss:$36 sps:$4 sm:$0xff]  }
 0x223   : > { %4292 = vmatprep.subr.bf16.mxu1 %v7539_v5  ;;  %4456 = vmatprep.subr.bf16.mxu0 %v7542_v6  ;;  %v7591_v5 = vld [vmem:[#allocation4 + $0xa20] ss:$36 sps:$4 sm:$0xff]   ;;  %v7594_v6 = vld [vmem:[#allocation4 + $0xa28] ss:$36 sps:$4 sm:$0xff]  }
 0x226   : > { %4293 = vmatpush1.bf16.msra.mxu1 %v7537_v7  ;;  %4457 = vmatpush1.bf16.msra.mxu0 %v7540_v8  ;;  %v7599_v7 = vld [vmem:[#allocation4 + $0xa6c] ss:$36 sps:$4 sm:$0xff]   ;;  %v7602_v8 = vld [vmem:[#allocation4 + $0xa74] ss:$36 sps:$4 sm:$0xff]  }
 0x227   : > { %4294 = vmatprep.subr.bf16.mxu1 %v7545_v9  ;;  %4458 = vmatprep.subr.bf16.mxu0 %v7548_v10  ;;  %v7597_v9 = vld [vmem:[#allocation4 + $0xa68] ss:$36 sps:$4 sm:$0xff]   ;;  %v7600_v10 = vld [vmem:[#allocation4 + $0xa70] ss:$36 sps:$4 sm:$0xff]  }
 0x22a   : > { %4295 = vmatpush1.bf16.msra.mxu1 %v7543_v11  ;;  %4459 = vmatpush1.bf16.msra.mxu0 %v7546_v12  ;;  %v7605_v11 = vld [vmem:[#allocation4 + $0xab4] ss:$36 sps:$4 sm:$0xff]   ;;  %v7608_v12 = vld [vmem:[#allocation4 + $0xabc] ss:$36 sps:$4 sm:$0xff]  }
 0x22b   : > { %4296 = vmatprep.subr.bf16.mxu1 %v7551_v18  ;;  %4460 = vmatprep.subr.bf16.mxu0 %v7554_v0  ;;  %v7606_v18 = vld [vmem:[#allocation4 + $0xab8] ss:$36 sps:$4 sm:$0xff]  }
 0x22c   : > { %v7611_v0 = vld [vmem:[#allocation4 + $0xafc] ss:$36 sps:$4 sm:$0xff]  }
 0x22e   : > { %4297 = vmatpush1.bf16.msra.mxu1 %v7549_v20  ;;  %4461 = vmatpush1.bf16.msra.mxu0 %v7552_v23  ;;  %v7609_v20 = vld [vmem:[#allocation4 + $0xaf8] ss:$36 sps:$4 sm:$0xff]   ;;  %v7617_v23 = vld [vmem:[#allocation4 + $0xb44] ss:$36 sps:$4 sm:$0xff]  }
 0x22f   : > { %4298 = vmatprep.subr.bf16.mxu1 %v7557_v29  ;;  %4462 = vmatprep.subr.bf16.mxu0 %v7560_v30  ;;  %v7618_v29 = vld [vmem:[#allocation4 + $0xb48] ss:$36 sps:$4 sm:$0xff]  }
 0x230   : > { %v9055_v38 = vpop.f32.mrb[4].mxu0  ;;  %v7623_v30 = vld [vmem:[#allocation4 + $0xb8c] ss:$36 sps:$4 sm:$0xff]  }
 0x231   : > { %v1373_v41 = vpop.f32.mrb[5].mxu0 }
 0x232   : > { %4299 = vmatpush1.bf16.msra.mxu1 %v7555_v31  ;;  %4463 = vmatpush1.bf16.msra.mxu0 %v7558_v33  ;;  %v1374_v36 = vadd.f32 %v1373_v41, %v1243_v27  ;;  %v1375_v42 = vpop.f32.mrb[6].mxu0  ;;  %v7626_v31 = vld [vmem:[#allocation4 + $0xb94] ss:$36 sps:$4 sm:$0xff]  }
 0x233   : > { %4300 = vmatprep.subr.bf16.mxu1 %v7563_v34  ;;  %4464 = vmatprep.subr.bf16.mxu0 %v7566_v35  ;;  %v1376_v45 = vpop.f32.mrb[7].mxu0  ;;  %v7624_v33 = vld [vmem:[#allocation4 + $0xb90] ss:$36 sps:$4 sm:$0xff]   ;;  %v7632_v34 = vld [vmem:[#allocation4 + $0xbdc] ss:$36 sps:$4 sm:$0xff]  }
 0x234   : > { %v1423_v46 = vmax.f32 %v1374_v36, 0.0  ;;  %v7629_v27 = vld [vmem:[#allocation4 + $0xbd4] ss:$36 sps:$4 sm:$0xff]   ;;  %v7636_v36 = vld [vmem:[#allocation4 + $0xc20] ss:$36 sps:$4 sm:$0xff]  }
 0x235   : > { %v7627_v35 = vld [vmem:[#allocation4 + $0xbd0] ss:$36 sps:$4 sm:$0xff]   ;;  %v7633_v41 = vld [vmem:[#allocation4 + $0xc18] ss:$36 sps:$4 sm:$0xff]   ;;  %v7641_v42 = vld [vmem:[#allocation4 + $0xc64] ss:$36 sps:$4 sm:$0xff]  }
 0x236   : > { %4301 = vmatpush1.bf16.msra.mxu1 %v7561_v37  ;;  %4465 = vmatpush1.bf16.msra.mxu0 %v7564_v40  ;;  %v9059_v53 = vpack.c.bf16 %v1423_v46, %v1423_v46  ;;  %v7630_v37 = vld [vmem:[#allocation4 + $0xbd8] ss:$36 sps:$4 sm:$0xff]   ;;  %v7638_v40 = vld [vmem:[#allocation4 + $0xc24] ss:$36 sps:$4 sm:$0xff]   ;;  %v7647_v46 = vld [vmem:[#allocation4 + $0xcac] ss:$36 sps:$4 sm:$0xff]  }
 0x237   : > { %4311 = vmatprep.subr.bf16.mxu1 %v7569_v43  ;;  %4475 = vmatprep.subr.bf16.mxu0 %v7572_v44  ;;  %v7644_v43 = vld [vmem:[#allocation4 + $0xc6c] ss:$36 sps:$4 sm:$0xff]   ;;  %v7639_v44 = vld [vmem:[#allocation4 + $0xc60] ss:$36 sps:$4 sm:$0xff]  }
 0x238   : > { %v7642_v45 = vld [vmem:[#allocation4 + $0xc68] ss:$36 sps:$4 sm:$0xff]  }
 0x239   : > { %4303 = vmatmul.mubr.bf16.vlgmr.msra.gmra.mrb[8].mxu1 %v9057_v48  ;;  %4467 = vmatmul.mubr.bf16.vlgmr.msra.gmra.mrb[8].mxu0 %v9057_v48 }
 0x23a   : > { %4312 = vmatpush1.bf16.msra.mxu1 %v7567_v63  ;;  %4476 = vmatpush1.bf16.msra.mxu0 %v7570_v49  ;;  %v1238_v63 = vsub.s32 4, %v8686_v15  ;;  %v7650_v49 = vld [vmem:[#allocation4 + $0xcb4] ss:$36 sps:$4 sm:$0xff]  }
 0x23b   : > { %4313 = vmatprep.subr.bf16.mxu1 %v7575_v50  ;;  %4477 = vmatprep.subr.bf16.mxu0 %v7578_v51  ;;  %v7645_v50 = vld [vmem:[#allocation4 + $0xca8] ss:$36 sps:$4 sm:$0xff]   ;;  %v7648_v51 = vld [vmem:[#allocation4 + $0xcb0] ss:$36 sps:$4 sm:$0xff]  }
 0x23c   : > { %4343 = vmatprep.mubr.bf16.mxu1 %v9059_v53  ;;  %4507 = vmatprep.mubr.bf16.mxu0 %v9059_v53 }
 0x23e   : > { %4314 = vmatpush1.bf16.msra.mxu1 %v7573_v52  ;;  %4478 = vmatpush1.bf16.msra.mxu0 %v7576_v54  ;;  %v8098_v52 = vld [vmem:[#allocation2] sm:$0x7f] }
 0x23f   : > { %4315 = vmatprep.subr.bf16.mxu1 %v7581_v55  ;;  %4479 = vmatprep.subr.bf16.mxu0 %v7584_v56  ;;  %v1239_v54 = vrot.slane %v8098_v52, %v1238_v63  ;;  %v7653_v55 = vld [vmem:[#allocation4 + $0xcf4] ss:$36 sps:$4 sm:$0xff]   ;;  %v7656_v56 = vld [vmem:[#allocation4 + $0xcfc] ss:$36 sps:$4 sm:$0xff]  }
 0x242   : > { %4316 = vmatpush1.bf16.msra.mxu1 %v7579_v57  ;;  %4480 = vmatpush1.bf16.msra.mxu0 %v7582_v58  ;;  %v7651_v57 = vld [vmem:[#allocation4 + $0xcf0] ss:$36 sps:$4 sm:$0xff]   ;;  %v7654_v58 = vld [vmem:[#allocation4 + $0xcf8] ss:$36 sps:$4 sm:$0xff]  }
 0x243   : > { %4317 = vmatprep.subr.bf16.mxu1 %v7587_v59  ;;  %4481 = vmatprep.subr.bf16.mxu0 %v7590_v60  ;;  %v1372_v59 = vadd.f32 %v9055_v38, %v1239_v54  ;;  %v7659_v60 = vld [vmem:[#allocation4 + $0xd3c] ss:$36 sps:$4 sm:$0xff]  }
 0x244   : > { %v7663_v38 = vld [vmem:[#allocation4 + $0xd80] ss:$36 sps:$4 sm:$0xff]  }
 0x245   : > { %v7716_v54 = vld [vmem:[#allocation4 + $0x17c] ss:$36 sps:$4 sm:$0xff]  }
 0x246   : > { %4318 = vmatpush1.bf16.msra.mxu1 %v7585_v61  ;;  %4482 = vmatpush1.bf16.msra.mxu0 %v7588_v2  ;;  %v7662_v61 = vld [vmem:[#allocation4 + $0xd44] ss:$36 sps:$4 sm:$0xff]   ;;  %v7657_v2 = vld [vmem:[#allocation4 + $0xd38] ss:$36 sps:$4 sm:$0xff]  }
 0x247   : > { %4319 = vmatprep.subr.bf16.mxu1 %v7593_v3  ;;  %4483 = vmatprep.subr.bf16.mxu0 %v7596_v4  ;;  %v7660_v3 = vld [vmem:[#allocation4 + $0xd40] ss:$36 sps:$4 sm:$0xff]   ;;  %v1246_v4 = vsub.s32 6, %v8686_v15 }
 0x24a   : > { %4320 = vmatpush1.bf16.msra.mxu1 %v7591_v5  ;;  %4484 = vmatpush1.bf16.msra.mxu0 %v7594_v6  ;;  %v7668_v5 = vld [vmem:[#allocation4 + $0x1c] ss:$36 sps:$4 sm:$0xff]   ;;  %v1422_v6 = vmax.f32 %v1372_v59, 0.0  ;;  %v7725_v59 = vld [vmem:[#allocation4 + $0x334] ss:$36 sps:$4 sm:$0xff]  }
 0x24b   : > { %4321 = vmatprep.subr.bf16.mxu1 %v7599_v7  ;;  %4485 = vmatprep.subr.bf16.mxu0 %v7602_v8  ;;  %v7665_v7 = vld [vmem:[#allocation4 + $0xd84] ss:$36 sps:$4 sm:$0xff]   ;;  %v1247_v8 = vrot.slane %v8098_v52, %v1246_v4 }
 0x24c   : > { %v7711_v52 = vld [vmem:[#allocation4 + $0x2a0] ss:$36 sps:$4 sm:$0xff]  }
 0x24e   : > { %4322 = vmatpush1.bf16.msra.mxu1 %v7597_v9  ;;  %4486 = vmatpush1.bf16.msra.mxu0 %v7600_v10  ;;  %v7666_v9 = vld [vmem:[#allocation4 + $0x18] ss:$36 sps:$4 sm:$0xff]   ;;  %v9072_v10 = vpack.c.bf16 %v1422_v6, %v1422_v6 }
 0x24f   : > { %4323 = vmatprep.subr.bf16.mxu1 %v7605_v11  ;;  %4487 = vmatprep.subr.bf16.mxu0 %v7608_v12  ;;  %v7671_v11 = vld [vmem:[#allocation4 + $0x64] ss:$36 sps:$4 sm:$0xff]   ;;  %v7677_v12 = vld [vmem:[#allocation4 + $0xd8c] ss:$36 sps:$4 sm:$0xff]   ;;  %v7729_v6 = vld [vmem:[#allocation4 + $0x378] ss:$36 sps:$4 sm:$0xff]  }
 0x252   : > { %4324 = vmatpush1.bf16.msra.mxu1 %v7603_v16  ;;  %4488 = vmatpush1.bf16.msra.mxu0 %v7606_v18  ;;  %v1413_v16 = vadd.f32 %v9045_v21, %v1247_v8  ;;  %v7669_v18 = vld [vmem:[#allocation4 + $0x60] ss:$36 sps:$4 sm:$0xff]   ;;  %v7680_v21 = vld [vmem:[#allocation4 + $0xf4] ss:$36 sps:$4 sm:$0xff]  }
 0x253   : > { %4325 = vmatprep.subr.bf16.mxu1 %v7611_v0  ;;  %4489 = vmatprep.subr.bf16.mxu0 %v7614_v19  ;;  %v7674_v0 = vld [vmem:[#allocation4 + $0xac] ss:$36 sps:$4 sm:$0xff]   ;;  %v8364_v19 = vmov 0   ;;  %v7737_v8 = vld [vmem:[#allocation4 + $0x3c4] ss:$36 sps:$4 sm:$0xff]  }
 0x256   : > { %4326 = vmatpush1.bf16.msra.mxu1 %v7609_v20  ;;  %4490 = vmatpush1.bf16.msra.mxu0 %v7612_v22  ;;  %v1424_v20 = vmax.f32 %v1413_v16, 0.0  ;;  %v7672_v22 = vld [vmem:[#allocation4 + $0xa8] ss:$36 sps:$4 sm:$0xff]   ;;  %v7738_v16 = vld [vmem:[#allocation4 + $0x298] ss:$36 sps:$4 sm:$0xff]  }
 0x257   : > { %4327 = vmatprep.subr.bf16.mxu1 %v7617_v23  ;;  %4491 = vmatprep.subr.bf16.mxu0 %v7620_v24  ;;  %v7675_v24 = vld [vmem:[#allocation4 + $0xd88] ss:$36 sps:$4 sm:$0xff]  }
 0x258   : > { %v9079_v23 = vpack.c.bf16 %v1424_v20, %v1424_v20  ;;  %v7749_v20 = vld [vmem:[#allocation4 + $0x454] ss:$36 sps:$4 sm:$0xff]  }
 0x25a   : > { %4328 = vmatpush1.bf16.msra.mxu1 %v7615_v28  ;;  %4492 = vmatpush1.bf16.msra.mxu0 %v7618_v29  ;;  %v7678_v28 = vld [vmem:[#allocation4 + $0xf0] ss:$36 sps:$4 sm:$0xff]   ;;  %v7683_v29 = vld [vmem:[#allocation4 + $0x13c] ss:$36 sps:$4 sm:$0xff]  }
 0x25b   : > { %4329 = vmatprep.subr.bf16.mxu1 %v7623_v30  ;;  %4493 = vmatprep.subr.bf16.mxu0 %v7626_v31  ;;  %v7686_v30 = vld [vmem:[#allocation4 + $0x14] ss:$36 sps:$4 sm:$0xff]  }
 0x25c   : > { %v7681_v31 = vld [vmem:[#allocation4 + $0x138] ss:$36 sps:$4 sm:$0xff]  }
 0x25e   : > { %4330 = vmatpush1.bf16.msra.mxu1 %v7621_v32  ;;  %4494 = vmatpush1.bf16.msra.mxu0 %v7624_v33  ;;  %v7689_v32 = vld [vmem:[#allocation4 + $0x184] ss:$36 sps:$4 sm:$0xff]   ;;  %v7684_v33 = vld [vmem:[#allocation4 + $0x10] ss:$36 sps:$4 sm:$0xff]  }
 0x25f   : > { %4331 = vmatprep.subr.bf16.mxu1 %v7629_v27  ;;  %4495 = vmatprep.subr.bf16.mxu0 %v7632_v34  ;;  %v7687_v27 = vld [vmem:[#allocation4 + $0x180] ss:$36 sps:$4 sm:$0xff]  }
 0x260   : > { %v7692_v34 = vld [vmem:[#allocation4 + $0x5c] ss:$36 sps:$4 sm:$0xff]  }
 0x262   : > { %4332 = vmatpush1.bf16.msra.mxu1 %v7627_v35  ;;  %4496 = vmatpush1.bf16.msra.mxu0 %v7630_v37  ;;  %v7695_v35 = vld [vmem:[#allocation4 + $0x1cc] ss:$36 sps:$4 sm:$0xff]   ;;  %v7690_v37 = vld [vmem:[#allocation4 + $0x58] ss:$36 sps:$4 sm:$0xff]  }
 0x263   : > { %4333 = vmatprep.subr.bf16.mxu1 %v7635_v39  ;;  %4497 = vmatprep.subr.bf16.mxu0 %v7638_v40  ;;  %v7693_v39 = vld [vmem:[#allocation4 + $0x1c8] ss:$36 sps:$4 sm:$0xff]  }
 0x264   : > { %v7698_v40 = vld [vmem:[#allocation4 + $0xa4] ss:$36 sps:$4 sm:$0xff]  }
 0x266   : > { %4334 = vmatpush1.bf16.msra.mxu1 %v7633_v41  ;;  %4498 = vmatpush1.bf16.msra.mxu0 %v7636_v36  ;;  %v7701_v41 = vld [vmem:[#allocation4 + $0x214] ss:$36 sps:$4 sm:$0xff]   ;;  %v7696_v36 = vld [vmem:[#allocation4 + $0xa0] ss:$36 sps:$4 sm:$0xff]  }
 0x267   : > { %4335 = vmatprep.subr.bf16.mxu1 %v7641_v42  ;;  %4499 = vmatprep.subr.bf16.mxu0 %v7644_v43  ;;  %v7699_v42 = vld [vmem:[#allocation4 + $0x210] ss:$36 sps:$4 sm:$0xff]  }
 0x268   : > { %v7704_v43 = vld [vmem:[#allocation4 + $0xec] ss:$36 sps:$4 sm:$0xff]  }
 0x26a   : > { %4336 = vmatpush1.bf16.msra.mxu1 %v7639_v44  ;;  %4500 = vmatpush1.bf16.msra.mxu0 %v7642_v45  ;;  %v7707_v44 = vld [vmem:[#allocation4 + $0x25c] ss:$36 sps:$4 sm:$0xff]   ;;  %v7702_v45 = vld [vmem:[#allocation4 + $0xe8] ss:$36 sps:$4 sm:$0xff]  }
 0x26b   : > { %4337 = vmatprep.subr.bf16.mxu1 %v7647_v46  ;;  %4501 = vmatprep.subr.bf16.mxu0 %v7650_v49  ;;  %v7705_v46 = vld [vmem:[#allocation4 + $0x258] ss:$36 sps:$4 sm:$0xff]  }
 0x26c   : > { %v7710_v49 = vld [vmem:[#allocation4 + $0x134] ss:$36 sps:$4 sm:$0xff]  }
 0x26e   : > { %4338 = vmatpush1.bf16.msra.mxu1 %v7645_v50  ;;  %4502 = vmatpush1.bf16.msra.mxu0 %v7648_v51  ;;  %v7713_v50 = vld [vmem:[#allocation4 + $0x2a4] ss:$36 sps:$4 sm:$0xff]   ;;  %v7708_v51 = vld [vmem:[#allocation4 + $0x130] ss:$36 sps:$4 sm:$0xff]  }
 0x26f   : > { %4339 = vmatprep.subr.bf16.mxu1 %v7653_v55  ;;  %4503 = vmatprep.subr.bf16.mxu0 %v7656_v56  ;;  %v7719_v55 = vld [vmem:[#allocation4 + $0x2ec] ss:$36 sps:$4 sm:$0xff]   ;;  %v7714_v56 = vld [vmem:[#allocation4 + $0x178] ss:$36 sps:$4 sm:$0xff]  }
 0x272   : > { %4340 = vmatpush1.bf16.msra.mxu1 %v7651_v57  ;;  %4504 = vmatpush1.bf16.msra.mxu0 %v7654_v58  ;;  %v7717_v57 = vld [vmem:[#allocation4 + $0x2e8] ss:$36 sps:$4 sm:$0xff]  }
 0x273   : > { %4341 = vmatprep.subr.bf16.mxu1 %v7659_v60  ;;  %4505 = vmatprep.subr.bf16.mxu0 %v7662_v61  ;;  %v7722_v58 = vld [vmem:[#allocation4 + $0x1c4] ss:$36 sps:$4 sm:$0xff]   ;;  %v7723_v61 = vld [vmem:[#allocation4 + $0x330] ss:$36 sps:$4 sm:$0xff]  }
 0x274   : > { %v7720_v60 = vld [vmem:[#allocation4 + $0x1c0] ss:$36 sps:$4 sm:$0xff]  }
 0x276   : > { %4342 = vmatpush1.bf16.msra.mxu1 %v7657_v2  ;;  %4506 = vmatpush1.bf16.msra.mxu0 %v7660_v3  ;;  %v7728_v2 = vld [vmem:[#allocation4 + $0x20c] ss:$36 sps:$4 sm:$0xff]   ;;  %v7731_v3 = vld [vmem:[#allocation4 + $0x37c] ss:$36 sps:$4 sm:$0xff]  }
 0x277   : > { %4352 = vmatprep.subr.bf16.mxu1 %v7665_v7  ;;  %4721 = vmatprep.subr.bf16.mxu0 %v7668_v5  ;;  %v7726_v5 = vld [vmem:[#allocation4 + $0x208] ss:$36 sps:$4 sm:$0xff]   ;;  %v7734_v7 = vld [vmem:[#allocation4 + $0x254] ss:$36 sps:$4 sm:$0xff]  }
 0x279   : > { %4344 = vmatmul.mubr.bf16.vlgmr.msra.gmra.mrb[8].mxu1 %v9072_v10  ;;  %4508 = vmatmul.mubr.bf16.vlgmr.msra.gmra.mrb[8].mxu0 %v9072_v10 }
 0x27a   : > { %4353 = vmatpush1.bf16.msra.mxu1 %v7663_v38  ;;  %4722 = vmatpush1.bf16.msra.mxu0 %v7666_v9  ;;  %v7732_v38 = vld [vmem:[#allocation4 + $0x250] ss:$36 sps:$4 sm:$0xff]   ;;  %v7735_v9 = vld [vmem:[#allocation4 + $0x3c0] ss:$36 sps:$4 sm:$0xff]  }
 0x27b   : > { %4753 = vmatprep.mubr.bf16.mxu0 %v9026_v14  ;;  %4723 = vmatprep.subr.bf16.mxu0 %v7671_v11  ;;  %v7740_v11 = vld [vmem:[#allocation4 + $0x29c] ss:$36 sps:$4 sm:$0xff]  }
 0x27c   : > { %4384 = vmatprep.mubr.bf16.mxu1 %v8364_v19  ;;  %4516 = vmatprep.subr.bf16.mxu1 %v7677_v12  ;;  %v7743_v12 = vld [vmem:[#allocation4 + $0x40c] ss:$36 sps:$4 sm:$0xff]  }
 0x27e   : > { %4724 = vmatpush1.bf16.msra.mxu0 %v7669_v18  ;;  %v7741_v18 = vld [vmem:[#allocation4 + $0x408] ss:$36 sps:$4 sm:$0xff]  }
 0x27f   : > { %4725 = vmatprep.subr.bf16.mxu0 %v7674_v0  ;;  %v7746_v0 = vld [vmem:[#allocation4 + $0x2e4] ss:$36 sps:$4 sm:$0xff]  }
 0x282   : > { %4726 = vmatpush1.bf16.msra.mxu0 %v7672_v22  ;;  %v7744_v22 = vld [vmem:[#allocation4 + $0x2e0] ss:$36 sps:$4 sm:$0xff]  }
 0x283   : > { %4727 = vmatprep.subr.bf16.mxu0 %v7680_v21  ;;  %v7747_v21 = vld [vmem:[#allocation4 + $0x450] ss:$36 sps:$4 sm:$0xff]  }
 0x285   : > { %6721 = vmatmul.mubr.msk.bf16.vlgmr.msra.gmra.mrb[8].mxu1 %vm4225_vm0, %v9079_v23 }
 0x286   : > { %4517 = vmatpush1.bf16.msra.mxu1 %v7675_v24  ;;  %4728 = vmatpush1.bf16.msra.mxu0 %v7678_v28  ;;  %v7752_v24 = vld [vmem:[#allocation4 + $0x32c] ss:$36 sps:$4 sm:$0xff]   ;;  %v7755_v28 = vld [vmem:[#allocation4 + $0x49c] ss:$36 sps:$4 sm:$0xff]  }
 0x287   : > { %4729 = vmatprep.subr.bf16.mxu0 %v7683_v29  ;;  %4548 = vmatprep.mubr.bf16.mxu1 %v8364_v19  ;;  %v7750_v29 = vld [vmem:[#allocation4 + $0x328] ss:$36 sps:$4 sm:$0xff]  }
 0x288   : > { %4557 = vmatprep.subr.bf16.mxu1 %v7686_v30  ;;  %v7753_v30 = vld [vmem:[#allocation4 + $0x498] ss:$36 sps:$4 sm:$0xff]  }
 0x28a   : > { %4730 = vmatpush1.bf16.msra.mxu0 %v7681_v31  ;;  %v7758_v31 = vld [vmem:[#allocation4 + $0x374] ss:$36 sps:$4 sm:$0xff]  }
 0x28b   : > { %4731 = vmatprep.subr.bf16.mxu0 %v7689_v32  ;;  %v7761_v32 = vld [vmem:[#allocation4 + $0x4e4] ss:$36 sps:$4 sm:$0xff]  }
 0x28d   : > { %6722 = vmatmul.mubr.msk.bf16.vlgmr.msra.gmra.mrb[12].mxu1 %vm4225_vm0, %v9079_v23 }
 0x28e   : > { %4558 = vmatpush1.bf16.msra.mxu1 %v7684_v33  ;;  %4589 = vmatprep.mubr.bf16.mxu1 %v9026_v14  ;;  %v7756_v33 = vld [vmem:[#allocation4 + $0x370] ss:$36 sps:$4 sm:$0xff]  }
 0x28f   : > { %4732 = vmatpush1.bf16.msra.mxu0 %v7687_v27  ;;  %4559 = vmatprep.subr.bf16.mxu1 %v7692_v34  ;;  %v7759_v27 = vld [vmem:[#allocation4 + $0x4e0] ss:$36 sps:$4 sm:$0xff]  }
 0x290   : > { %4733 = vmatprep.subr.bf16.mxu0 %v7695_v35  ;;  %v7764_v34 = vld [vmem:[#allocation4 + $0x3bc] ss:$36 sps:$4 sm:$0xff]   ;;  %v7767_v35 = vld [vmem:[#allocation4 + $0x52c] ss:$36 sps:$4 sm:$0xff]  }
 0x292   : > { %4560 = vmatpush1.bf16.msra.mxu1 %v7690_v37  ;;  %v7762_v37 = vld [vmem:[#allocation4 + $0x3b8] ss:$36 sps:$4 sm:$0xff]  }
 0x293   : > { %4734 = vmatpush1.bf16.msra.mxu0 %v7693_v39  ;;  %4561 = vmatprep.subr.bf16.mxu1 %v7698_v40  ;;  %v7765_v39 = vld [vmem:[#allocation4 + $0x528] ss:$36 sps:$4 sm:$0xff]  }
 0x294   : > { %4735 = vmatprep.subr.bf16.mxu0 %v7701_v41  ;;  %v7770_v40 = vld [vmem:[#allocation4 + $0x404] ss:$36 sps:$4 sm:$0xff]   ;;  %v7773_v41 = vld [vmem:[#allocation4 + $0x574] ss:$36 sps:$4 sm:$0xff]  }
 0x296   : > { %4562 = vmatpush1.bf16.msra.mxu1 %v7696_v36  ;;  %v7768_v36 = vld [vmem:[#allocation4 + $0x400] ss:$36 sps:$4 sm:$0xff]  }
 0x297   : > { %4736 = vmatpush1.bf16.msra.mxu0 %v7699_v42  ;;  %4563 = vmatprep.subr.bf16.mxu1 %v7704_v43  ;;  %v7771_v42 = vld [vmem:[#allocation4 + $0x570] ss:$36 sps:$4 sm:$0xff]  }
 0x298   : > { %4737 = vmatprep.subr.bf16.mxu0 %v7707_v44  ;;  %v7776_v43 = vld [vmem:[#allocation4 + $0x44c] ss:$36 sps:$4 sm:$0xff]   ;;  %v7779_v44 = vld [vmem:[#allocation4 + $0x5bc] ss:$36 sps:$4 sm:$0xff]  }
 0x29a   : > { %4564 = vmatpush1.bf16.msra.mxu1 %v7702_v45  ;;  %v7774_v45 = vld [vmem:[#allocation4 + $0x448] ss:$36 sps:$4 sm:$0xff]  }
 0x29b   : > { %4738 = vmatpush1.bf16.msra.mxu0 %v7705_v46  ;;  %4565 = vmatprep.subr.bf16.mxu1 %v7710_v49  ;;  %v7777_v46 = vld [vmem:[#allocation4 + $0x5b8] ss:$36 sps:$4 sm:$0xff]  }
 0x29c   : > { %4739 = vmatprep.subr.bf16.mxu0 %v7713_v50  ;;  %v7782_v49 = vld [vmem:[#allocation4 + $0x494] ss:$36 sps:$4 sm:$0xff]   ;;  %v7785_v50 = vld [vmem:[#allocation4 + $0x604] ss:$36 sps:$4 sm:$0xff]  }
 0x29e   : > { %4566 = vmatpush1.bf16.msra.mxu1 %v7708_v51  ;;  %v7780_v51 = vld [vmem:[#allocation4 + $0x490] ss:$36 sps:$4 sm:$0xff]  }
 0x29f   : > { %4740 = vmatpush1.bf16.msra.mxu0 %v7711_v52  ;;  %4567 = vmatprep.subr.bf16.mxu1 %v7716_v54  ;;  %v7783_v52 = vld [vmem:[#allocation4 + $0x600] ss:$36 sps:$4 sm:$0xff]  }
 0x2a0   : > { %4741 = vmatprep.subr.bf16.mxu0 %v7719_v55  ;;  %v7788_v54 = vld [vmem:[#allocation4 + $0x4dc] ss:$36 sps:$4 sm:$0xff]   ;;  %v7791_v55 = vld [vmem:[#allocation4 + $0x64c] ss:$36 sps:$4 sm:$0xff]  }
 0x2a2   : > { %4568 = vmatpush1.bf16.msra.mxu1 %v7714_v56  ;;  %v7786_v56 = vld [vmem:[#allocation4 + $0x4d8] ss:$36 sps:$4 sm:$0xff]  }
 0x2a3   : > { %4742 = vmatpush1.bf16.msra.mxu0 %v7717_v57  ;;  %4569 = vmatprep.subr.bf16.mxu1 %v7722_v58  ;;  %v7789_v57 = vld [vmem:[#allocation4 + $0x648] ss:$36 sps:$4 sm:$0xff]  }
 0x2a4   : > { %4743 = vmatprep.subr.bf16.mxu0 %v7725_v59  ;;  %v7794_v58 = vld [vmem:[#allocation4 + $0x524] ss:$36 sps:$4 sm:$0xff]   ;;  %v7797_v59 = vld [vmem:[#allocation4 + $0x694] ss:$36 sps:$4 sm:$0xff]  }
 0x2a6   : > { %4570 = vmatpush1.bf16.msra.mxu1 %v7720_v60  ;;  %v7792_v60 = vld [vmem:[#allocation4 + $0x520] ss:$36 sps:$4 sm:$0xff]  }
 0x2a7   : > { %4744 = vmatpush1.bf16.msra.mxu0 %v7723_v61  ;;  %4571 = vmatprep.subr.bf16.mxu1 %v7728_v2  ;;  %v7795_v61 = vld [vmem:[#allocation4 + $0x690] ss:$36 sps:$4 sm:$0xff]  }
 0x2a8   : > { %4745 = vmatprep.subr.bf16.mxu0 %v7731_v3  ;;  %v7800_v2 = vld [vmem:[#allocation4 + $0x56c] ss:$36 sps:$4 sm:$0xff]   ;;  %v7803_v3 = vld [vmem:[#allocation4 + $0x6dc] ss:$36 sps:$4 sm:$0xff]  }
 0x2aa   : > { %4572 = vmatpush1.bf16.msra.mxu1 %v7726_v5  ;;  %v7798_v5 = vld [vmem:[#allocation4 + $0x568] ss:$36 sps:$4 sm:$0xff]  }
 0x2ab   : > { %4746 = vmatpush1.bf16.msra.mxu0 %v7729_v6  ;;  %4573 = vmatprep.subr.bf16.mxu1 %v7734_v7  ;;  %v7801_v6 = vld [vmem:[#allocation4 + $0x6d8] ss:$36 sps:$4 sm:$0xff]  }
 0x2ac   : > { %4747 = vmatprep.subr.bf16.mxu0 %v7737_v8  ;;  %v7806_v7 = vld [vmem:[#allocation4 + $0x5b4] ss:$36 sps:$4 sm:$0xff]   ;;  %v7809_v8 = vld [vmem:[#allocation4 + $0x724] ss:$36 sps:$4 sm:$0xff]  }
 0x2ae   : > { %4574 = vmatpush1.bf16.msra.mxu1 %v7732_v38  ;;  %v7804_v38 = vld [vmem:[#allocation4 + $0x5b0] ss:$36 sps:$4 sm:$0xff]  }
 0x2af   : > { %4748 = vmatpush1.bf16.msra.mxu0 %v7735_v9  ;;  %4575 = vmatprep.subr.bf16.mxu1 %v7740_v11  ;;  %v7807_v9 = vld [vmem:[#allocation4 + $0x720] ss:$36 sps:$4 sm:$0xff]  }
 0x2b0   : > { %4749 = vmatprep.subr.bf16.mxu0 %v7743_v12  ;;  %v7812_v11 = vld [vmem:[#allocation4 + $0x5fc] ss:$36 sps:$4 sm:$0xff]   ;;  %v7815_v12 = vld [vmem:[#allocation4 + $0x76c] ss:$36 sps:$4 sm:$0xff]  }
 0x2b2   : > { %4576 = vmatpush1.bf16.msra.mxu1 %v7738_v16  ;;  %v7810_v16 = vld [vmem:[#allocation4 + $0x5f8] ss:$36 sps:$4 sm:$0xff]  }
 0x2b3   : > { %4750 = vmatpush1.bf16.msra.mxu0 %v7741_v18  ;;  %4577 = vmatprep.subr.bf16.mxu1 %v7746_v0  ;;  %v7813_v18 = vld [vmem:[#allocation4 + $0x768] ss:$36 sps:$4 sm:$0xff]  }
 0x2b4   : > { %4751 = vmatprep.subr.bf16.mxu0 %v7749_v20  ;;  %v7818_v0 = vld [vmem:[#allocation4 + $0x644] ss:$36 sps:$4 sm:$0xff]   ;;  %v7821_v20 = vld [vmem:[#allocation4 + $0x7b4] ss:$36 sps:$4 sm:$0xff]  }
 0x2b6   : > { %4578 = vmatpush1.bf16.msra.mxu1 %v7744_v22  ;;  %v7816_v22 = vld [vmem:[#allocation4 + $0x640] ss:$36 sps:$4 sm:$0xff]  }
 0x2b7   : > { %4752 = vmatpush1.bf16.msra.mxu0 %v7747_v21  ;;  %4579 = vmatprep.subr.bf16.mxu1 %v7752_v24  ;;  %v7819_v21 = vld [vmem:[#allocation4 + $0x7b0] ss:$36 sps:$4 sm:$0xff]  }
 0x2b8   : > { %4762 = vmatprep.subr.bf16.mxu0 %v7755_v28  ;;  %v7824_v24 = vld [vmem:[#allocation4 + $0x68c] ss:$36 sps:$4 sm:$0xff]   ;;  %v7827_v28 = vld [vmem:[#allocation4 + $0x7fc] ss:$36 sps:$4 sm:$0xff]  }
 0x2ba   : > { %4580 = vmatpush1.bf16.msra.mxu1 %v7750_v29  ;;  %4754 = vmatmul.mubr.bf16.vlgmr.msra.gmra.mrb[12].mxu0 %v9028_v17  ;;  %v7822_v29 = vld [vmem:[#allocation4 + $0x688] ss:$36 sps:$4 sm:$0xff]  }
 0x2bb   : > { %4763 = vmatpush1.bf16.msra.mxu0 %v7753_v30  ;;  %4794 = vmatprep.mubr.bf16.mxu0 %v9040_v47  ;;  %v7825_v30 = vld [vmem:[#allocation4 + $0x7f8] ss:$36 sps:$4 sm:$0xff]  }
 0x2bc   : > { %4581 = vmatprep.subr.bf16.mxu1 %v7758_v31  ;;  %4764 = vmatprep.subr.bf16.mxu0 %v7761_v32  ;;  %v7830_v31 = vld [vmem:[#allocation4 + $0x6d4] ss:$36 sps:$4 sm:$0xff]   ;;  %v7833_v32 = vld [vmem:[#allocation4 + $0x844] ss:$36 sps:$4 sm:$0xff]  }
 0x2be   : > { %4582 = vmatpush1.bf16.msra.mxu1 %v7756_v33  ;;  %v7828_v33 = vld [vmem:[#allocation4 + $0x6d0] ss:$36 sps:$4 sm:$0xff]  }
 0x2bf   : > { %4765 = vmatpush1.bf16.msra.mxu0 %v7759_v27  ;;  %4583 = vmatprep.subr.bf16.mxu1 %v7764_v34  ;;  %v7831_v27 = vld [vmem:[#allocation4 + $0x840] ss:$36 sps:$4 sm:$0xff]  }
 0x2c0   : > { %4766 = vmatprep.subr.bf16.mxu0 %v7767_v35  ;;  %v7836_v34 = vld [vmem:[#allocation4 + $0x71c] ss:$36 sps:$4 sm:$0xff]   ;;  %v7839_v35 = vld [vmem:[#allocation4 + $0x88c] ss:$36 sps:$4 sm:$0xff]  }
 0x2c2   : > { %4584 = vmatpush1.bf16.msra.mxu1 %v7762_v37  ;;  %v7834_v37 = vld [vmem:[#allocation4 + $0x718] ss:$36 sps:$4 sm:$0xff]  }
 0x2c3   : > { %4767 = vmatpush1.bf16.msra.mxu0 %v7765_v39  ;;  %4585 = vmatprep.subr.bf16.mxu1 %v7770_v40  ;;  %v7837_v39 = vld [vmem:[#allocation4 + $0x888] ss:$36 sps:$4 sm:$0xff]  }
 0x2c4   : > { %4768 = vmatprep.subr.bf16.mxu0 %v7773_v41  ;;  %v7842_v40 = vld [vmem:[#allocation4 + $0x764] ss:$36 sps:$4 sm:$0xff]   ;;  %v7845_v41 = vld [vmem:[#allocation4 + $0x8d4] ss:$36 sps:$4 sm:$0xff]  }
 0x2c6   : > { %4586 = vmatpush1.bf16.msra.mxu1 %v7768_v36  ;;  %v7840_v36 = vld [vmem:[#allocation4 + $0x760] ss:$36 sps:$4 sm:$0xff]  }
 0x2c7   : > { %4769 = vmatpush1.bf16.msra.mxu0 %v7771_v42  ;;  %4587 = vmatprep.subr.bf16.mxu1 %v7776_v43  ;;  %v7843_v42 = vld [vmem:[#allocation4 + $0x8d0] ss:$36 sps:$4 sm:$0xff]  }
 0x2c8   : > { %4770 = vmatprep.subr.bf16.mxu0 %v7779_v44  ;;  %v7848_v43 = vld [vmem:[#allocation4 + $0x7ac] ss:$36 sps:$4 sm:$0xff]   ;;  %v7851_v44 = vld [vmem:[#allocation4 + $0x91c] ss:$36 sps:$4 sm:$0xff]  }
 0x2ca   : > { %4588 = vmatpush1.bf16.msra.mxu1 %v7774_v45  ;;  %v7846_v45 = vld [vmem:[#allocation4 + $0x7a8] ss:$36 sps:$4 sm:$0xff]  }
 0x2cb   : > { %4771 = vmatpush1.bf16.msra.mxu0 %v7777_v46  ;;  %4598 = vmatprep.subr.bf16.mxu1 %v7782_v49  ;;  %v7849_v46 = vld [vmem:[#allocation4 + $0x918] ss:$36 sps:$4 sm:$0xff]  }
 0x2cc   : > { %4772 = vmatprep.subr.bf16.mxu0 %v7785_v50  ;;  %v7854_v49 = vld [vmem:[#allocation4 + $0x7f4] ss:$36 sps:$4 sm:$0xff]   ;;  %v7857_v50 = vld [vmem:[#allocation4 + $0x964] ss:$36 sps:$4 sm:$0xff]  }
 0x2cd   : > { %4590 = vmatmul.mubr.bf16.vlgmr.msra.gmra.mrb[16].mxu1 %v9028_v17 }
 0x2ce   : > { %4599 = vmatpush1.bf16.msra.mxu1 %v7780_v51  ;;  %4630 = vmatprep.mubr.bf16.mxu1 %v9040_v47  ;;  %v7852_v51 = vld [vmem:[#allocation4 + $0x7f0] ss:$36 sps:$4 sm:$0xff]  }
 0x2cf   : > { %4773 = vmatpush1.bf16.msra.mxu0 %v7783_v52  ;;  %4600 = vmatprep.subr.bf16.mxu1 %v7788_v54  ;;  %v7855_v52 = vld [vmem:[#allocation4 + $0x960] ss:$36 sps:$4 sm:$0xff]  }
 0x2d0   : > { %4774 = vmatprep.subr.bf16.mxu0 %v7791_v55  ;;  %v7860_v54 = vld [vmem:[#allocation4 + $0x83c] ss:$36 sps:$4 sm:$0xff]   ;;  %v7863_v55 = vld [vmem:[#allocation4 + $0x9ac] ss:$36 sps:$4 sm:$0xff]  }
 0x2d2   : > { %4601 = vmatpush1.bf16.msra.mxu1 %v7786_v56  ;;  %v7858_v56 = vld [vmem:[#allocation4 + $0x838] ss:$36 sps:$4 sm:$0xff]  }
 0x2d3   : > { %4775 = vmatpush1.bf16.msra.mxu0 %v7789_v57  ;;  %4602 = vmatprep.subr.bf16.mxu1 %v7794_v58  ;;  %v7861_v57 = vld [vmem:[#allocation4 + $0x9a8] ss:$36 sps:$4 sm:$0xff]  }
 0x2d4   : > { %4776 = vmatprep.subr.bf16.mxu0 %v7797_v59  ;;  %v7866_v58 = vld [vmem:[#allocation4 + $0x884] ss:$36 sps:$4 sm:$0xff]   ;;  %v7869_v59 = vld [vmem:[#allocation4 + $0x9f4] ss:$36 sps:$4 sm:$0xff]  }
 0x2d6   : > { %4603 = vmatpush1.bf16.msra.mxu1 %v7792_v60  ;;  %v7864_v60 = vld [vmem:[#allocation4 + $0x880] ss:$36 sps:$4 sm:$0xff]  }
 0x2d7   : > { %4777 = vmatpush1.bf16.msra.mxu0 %v7795_v61  ;;  %4604 = vmatprep.subr.bf16.mxu1 %v7800_v2  ;;  %v7867_v61 = vld [vmem:[#allocation4 + $0x9f0] ss:$36 sps:$4 sm:$0xff]  }
 0x2d8   : > { %4778 = vmatprep.subr.bf16.mxu0 %v7803_v3  ;;  %v7872_v2 = vld [vmem:[#allocation4 + $0x8cc] ss:$36 sps:$4 sm:$0xff]   ;;  %v7875_v3 = vld [vmem:[#allocation4 + $0xa3c] ss:$36 sps:$4 sm:$0xff]  }
 0x2da   : > { %4605 = vmatpush1.bf16.msra.mxu1 %v7798_v5  ;;  %v7870_v5 = vld [vmem:[#allocation4 + $0x8c8] ss:$36 sps:$4 sm:$0xff]  }
 0x2db   : > { %4779 = vmatpush1.bf16.msra.mxu0 %v7801_v6  ;;  %4606 = vmatprep.subr.bf16.mxu1 %v7806_v7  ;;  %v7873_v6 = vld [vmem:[#allocation4 + $0xa38] ss:$36 sps:$4 sm:$0xff]  }
 0x2dc   : > { %4780 = vmatprep.subr.bf16.mxu0 %v7809_v8  ;;  %v7878_v7 = vld [vmem:[#allocation4 + $0x914] ss:$36 sps:$4 sm:$0xff]   ;;  %v7881_v8 = vld [vmem:[#allocation4 + $0xa84] ss:$36 sps:$4 sm:$0xff]  }
 0x2de   : > { %4607 = vmatpush1.bf16.msra.mxu1 %v7804_v38  ;;  %v7876_v38 = vld [vmem:[#allocation4 + $0x910] ss:$36 sps:$4 sm:$0xff]  }
 0x2df   : > { %4781 = vmatpush1.bf16.msra.mxu0 %v7807_v9  ;;  %4608 = vmatprep.subr.bf16.mxu1 %v7812_v11  ;;  %v7879_v9 = vld [vmem:[#allocation4 + $0xa80] ss:$36 sps:$4 sm:$0xff]  }
 0x2e0   : > { %4782 = vmatprep.subr.bf16.mxu0 %v7815_v12  ;;  %v7884_v11 = vld [vmem:[#allocation4 + $0x95c] ss:$36 sps:$4 sm:$0xff]   ;;  %v7887_v12 = vld [vmem:[#allocation4 + $0xacc] ss:$36 sps:$4 sm:$0xff]  }
 0x2e2   : > { %4609 = vmatpush1.bf16.msra.mxu1 %v7810_v16  ;;  %v7882_v16 = vld [vmem:[#allocation4 + $0x958] ss:$36 sps:$4 sm:$0xff]  }
 0x2e3   : > { %4783 = vmatpush1.bf16.msra.mxu0 %v7813_v18  ;;  %4610 = vmatprep.subr.bf16.mxu1 %v7818_v0  ;;  %v7885_v18 = vld [vmem:[#allocation4 + $0xac8] ss:$36 sps:$4 sm:$0xff]  }
 0x2e4   : > { %4784 = vmatprep.subr.bf16.mxu0 %v7821_v20  ;;  %v7890_v0 = vld [vmem:[#allocation4 + $0x9a4] ss:$36 sps:$4 sm:$0xff]   ;;  %v7893_v20 = vld [vmem:[#allocation4 + $0xb14] ss:$36 sps:$4 sm:$0xff]  }
 0x2e6   : > { %4611 = vmatpush1.bf16.msra.mxu1 %v7816_v22  ;;  %v7888_v22 = vld [vmem:[#allocation4 + $0x9a0] ss:$36 sps:$4 sm:$0xff]  }
 0x2e7   : > { %4785 = vmatpush1.bf16.msra.mxu0 %v7819_v21  ;;  %4612 = vmatprep.subr.bf16.mxu1 %v7824_v24  ;;  %v7891_v21 = vld [vmem:[#allocation4 + $0xb10] ss:$36 sps:$4 sm:$0xff]  }
 0x2e8   : > { %4786 = vmatprep.subr.bf16.mxu0 %v7827_v28  ;;  %v7896_v24 = vld [vmem:[#allocation4 + $0x9ec] ss:$36 sps:$4 sm:$0xff]   ;;  %v7899_v28 = vld [vmem:[#allocation4 + $0xb5c] ss:$36 sps:$4 sm:$0xff]  }
 0x2ea   : > { %4613 = vmatpush1.bf16.msra.mxu1 %v7822_v29  ;;  %v7894_v29 = vld [vmem:[#allocation4 + $0x9e8] ss:$36 sps:$4 sm:$0xff]  }
 0x2eb   : > { %4787 = vmatpush1.bf16.msra.mxu0 %v7825_v30  ;;  %4614 = vmatprep.subr.bf16.mxu1 %v7830_v31  ;;  %v7897_v30 = vld [vmem:[#allocation4 + $0xb58] ss:$36 sps:$4 sm:$0xff]  }
 0x2ec   : > { %4788 = vmatprep.subr.bf16.mxu0 %v7833_v32  ;;  %v7902_v31 = vld [vmem:[#allocation4 + $0xa34] ss:$36 sps:$4 sm:$0xff]   ;;  %v7905_v32 = vld [vmem:[#allocation4 + $0xba4] ss:$36 sps:$4 sm:$0xff]  }
 0x2ee   : > { %4615 = vmatpush1.bf16.msra.mxu1 %v7828_v33  ;;  %v7900_v33 = vld [vmem:[#allocation4 + $0xa30] ss:$36 sps:$4 sm:$0xff]  }
 0x2ef   : > { %4789 = vmatpush1.bf16.msra.mxu0 %v7831_v27  ;;  %4616 = vmatprep.subr.bf16.mxu1 %v7836_v34  ;;  %v7903_v27 = vld [vmem:[#allocation4 + $0xba0] ss:$36 sps:$4 sm:$0xff]  }
 0x2f0   : > { %4790 = vmatprep.subr.bf16.mxu0 %v7839_v35  ;;  %v7908_v34 = vld [vmem:[#allocation4 + $0xa7c] ss:$36 sps:$4 sm:$0xff]   ;;  %v7911_v35 = vld [vmem:[#allocation4 + $0xbec] ss:$36 sps:$4 sm:$0xff]  }
 0x2f2   : > { %4617 = vmatpush1.bf16.msra.mxu1 %v7834_v37  ;;  %v7906_v37 = vld [vmem:[#allocation4 + $0xa78] ss:$36 sps:$4 sm:$0xff]  }
 0x2f3   : > { %4791 = vmatpush1.bf16.msra.mxu0 %v7837_v39  ;;  %4618 = vmatprep.subr.bf16.mxu1 %v7842_v40  ;;  %v7909_v39 = vld [vmem:[#allocation4 + $0xbe8] ss:$36 sps:$4 sm:$0xff]  }
 0x2f4   : > { %4792 = vmatprep.subr.bf16.mxu0 %v7845_v41  ;;  %v7914_v40 = vld [vmem:[#allocation4 + $0xac4] ss:$36 sps:$4 sm:$0xff]   ;;  %v7917_v41 = vld [vmem:[#allocation4 + $0xc34] ss:$36 sps:$4 sm:$0xff]  }
 0x2f6   : > { %4619 = vmatpush1.bf16.msra.mxu1 %v7840_v36  ;;  %v7912_v36 = vld [vmem:[#allocation4 + $0xac0] ss:$36 sps:$4 sm:$0xff]  }
 0x2f7   : > { %4793 = vmatpush1.bf16.msra.mxu0 %v7843_v42  ;;  %4620 = vmatprep.subr.bf16.mxu1 %v7848_v43  ;;  %v7915_v42 = vld [vmem:[#allocation4 + $0xc30] ss:$36 sps:$4 sm:$0xff]  }
 0x2f8   : > { %4803 = vmatprep.subr.bf16.mxu0 %v7851_v44  ;;  %v7920_v43 = vld [vmem:[#allocation4 + $0xb0c] ss:$36 sps:$4 sm:$0xff]   ;;  %v7923_v44 = vld [vmem:[#allocation4 + $0xc7c] ss:$36 sps:$4 sm:$0xff]  }
 0x2fa   : > { %4621 = vmatpush1.bf16.msra.mxu1 %v7846_v45  ;;  %4795 = vmatmul.mubr.bf16.vlgmr.msra.gmra.mrb[12].mxu0 %v9057_v48  ;;  %v7918_v45 = vld [vmem:[#allocation4 + $0xb08] ss:$36 sps:$4 sm:$0xff]  }
 0x2fb   : > { %4804 = vmatpush1.bf16.msra.mxu0 %v7849_v46  ;;  %4835 = vmatprep.mubr.bf16.mxu0 %v9059_v53  ;;  %v7921_v46 = vld [vmem:[#allocation4 + $0xc78] ss:$36 sps:$4 sm:$0xff]  }
 0x2fc   : > { %4622 = vmatprep.subr.bf16.mxu1 %v7854_v49  ;;  %4805 = vmatprep.subr.bf16.mxu0 %v7857_v50  ;;  %v7926_v49 = vld [vmem:[#allocation4 + $0xb54] ss:$36 sps:$4 sm:$0xff]   ;;  %v7929_v50 = vld [vmem:[#allocation4 + $0xcc4] ss:$36 sps:$4 sm:$0xff]  }
 0x2fe   : > { %4623 = vmatpush1.bf16.msra.mxu1 %v7852_v51  ;;  %v7924_v51 = vld [vmem:[#allocation4 + $0xb50] ss:$36 sps:$4 sm:$0xff]  }
 0x2ff   : > { %4806 = vmatpush1.bf16.msra.mxu0 %v7855_v52  ;;  %4624 = vmatprep.subr.bf16.mxu1 %v7860_v54  ;;  %v7927_v52 = vld [vmem:[#allocation4 + $0xcc0] ss:$36 sps:$4 sm:$0xff]  }
 0x300   : > { %4807 = vmatprep.subr.bf16.mxu0 %v7863_v55  ;;  %v7932_v54 = vld [vmem:[#allocation4 + $0xb9c] ss:$36 sps:$4 sm:$0xff]   ;;  %v7935_v55 = vld [vmem:[#allocation4 + $0xd0c] ss:$36 sps:$4 sm:$0xff]  }
 0x302   : > { %4625 = vmatpush1.bf16.msra.mxu1 %v7858_v56  ;;  %v7930_v56 = vld [vmem:[#allocation4 + $0xb98] ss:$36 sps:$4 sm:$0xff]  }
 0x303   : > { %4808 = vmatpush1.bf16.msra.mxu0 %v7861_v57  ;;  %4626 = vmatprep.subr.bf16.mxu1 %v7866_v58  ;;  %v7933_v57 = vld [vmem:[#allocation4 + $0xd08] ss:$36 sps:$4 sm:$0xff]  }
 0x304   : > { %4809 = vmatprep.subr.bf16.mxu0 %v7869_v59  ;;  %v7938_v58 = vld [vmem:[#allocation4 + $0xbe4] ss:$36 sps:$4 sm:$0xff]   ;;  %v7941_v59 = vld [vmem:[#allocation4 + $0xd54] ss:$36 sps:$4 sm:$0xff]  }
 0x306   : > { %4627 = vmatpush1.bf16.msra.mxu1 %v7864_v60  ;;  %v7936_v60 = vld [vmem:[#allocation4 + $0xbe0] ss:$36 sps:$4 sm:$0xff]  }
 0x307   : > { %4810 = vmatpush1.bf16.msra.mxu0 %v7867_v61  ;;  %4628 = vmatprep.subr.bf16.mxu1 %v7872_v2  ;;  %v7939_v61 = vld [vmem:[#allocation4 + $0xd50] ss:$36 sps:$4 sm:$0xff]  }
 0x308   : > { %4811 = vmatprep.subr.bf16.mxu0 %v7875_v3  ;;  %v7944_v2 = vld [vmem:[#allocation4 + $0xc2c] ss:$36 sps:$4 sm:$0xff]   ;;  %v7953_v3 = vld [vmem:[#allocation4 + $0xd9c] ss:$36 sps:$4 sm:$0xff]  }
 0x30a   : > { %4629 = vmatpush1.bf16.msra.mxu1 %v7870_v5  ;;  %v7942_v5 = vld [vmem:[#allocation4 + $0xc28] ss:$36 sps:$4 sm:$0xff]  }
 0x30b   : > { %4812 = vmatpush1.bf16.msra.mxu0 %v7873_v6  ;;  %4639 = vmatprep.subr.bf16.mxu1 %v7878_v7  ;;  %v7947_v6 = vld [vmem:[#allocation4 + $0xc74] ss:$36 sps:$4 sm:$0xff]  }
 0x30c   : > { %4813 = vmatprep.subr.bf16.mxu0 %v7881_v8  ;;  %v7951_v7 = vld [vmem:[#allocation4 + $0xd98] ss:$36 sps:$4 sm:$0xff]   ;;  %v7957_v8 = vld [vmem:[#allocation4 + $0x6e0] ss:$36 sps:$4 sm:$0xff]  }
 0x30d   : > { %4631 = vmatmul.mubr.bf16.vlgmr.msra.gmra.mrb[16].mxu1 %v9057_v48 }
 0x30e   : > { %4640 = vmatpush1.bf16.msra.mxu1 %v7876_v38  ;;  %4671 = vmatprep.mubr.bf16.mxu1 %v9059_v53  ;;  %v7945_v38 = vld [vmem:[#allocation4 + $0xc70] ss:$36 sps:$4 sm:$0xff]  }
 0x30f   : > { %4814 = vmatpush1.bf16.msra.mxu0 %v7879_v9  ;;  %4641 = vmatprep.subr.bf16.mxu1 %v7884_v11  ;;  %v7950_v9 = vld [vmem:[#allocation4 + $0xcbc] ss:$36 sps:$4 sm:$0xff]  }
 0x310   : > { %4815 = vmatprep.subr.bf16.mxu0 %v7887_v12  ;;  %v7948_v11 = vld [vmem:[#allocation4 + $0xcb8] ss:$36 sps:$4 sm:$0xff]   ;;  %v7956_v12 = vld [vmem:[#allocation4 + $0xd04] ss:$36 sps:$4 sm:$0xff]  }
 0x312   : > { %4642 = vmatpush1.bf16.msra.mxu1 %v7882_v16  ;;  %v7954_v16 = vld [vmem:[#allocation4 + $0xd00] ss:$36 sps:$4 sm:$0xff]  }
 0x313   : > { %4816 = vmatpush1.bf16.msra.mxu0 %v7885_v18  ;;  %4643 = vmatprep.subr.bf16.mxu1 %v7890_v0  ;;  %v7958_v18 = vld [vmem:[#allocation4 + $0x4a0] ss:$36 sps:$4 sm:$0xff]   ;;  %v7961_v0 = vld [vmem:[#allocation4 + $0xd4c] ss:$36 sps:$4 sm:$0xff]  }
 0x314   : > { %4817 = vmatprep.subr.bf16.mxu0 %v7893_v20  ;;  %v7962_v20 = vld [vmem:[#allocation4 + $0x728] ss:$36 sps:$4 sm:$0xff]  }
 0x316   : > { %4644 = vmatpush1.bf16.msra.mxu1 %v7888_v22  ;;  %v7959_v22 = vld [vmem:[#allocation4 + $0xd48] ss:$36 sps:$4 sm:$0xff]  }
 0x317   : > { %4818 = vmatpush1.bf16.msra.mxu0 %v7891_v21  ;;  %4645 = vmatprep.subr.bf16.mxu1 %v7896_v24  ;;  %v7963_v21 = vld [vmem:[#allocation4 + $0x4e8] ss:$36 sps:$4 sm:$0xff]   ;;  %v7966_v24 = vld [vmem:[#allocation4 + $0xd94] ss:$36 sps:$4 sm:$0xff]  }
 0x318   : > { %4819 = vmatprep.subr.bf16.mxu0 %v7899_v28  ;;  %v7967_v28 = vld [vmem:[#allocation4 + $0x770] ss:$36 sps:$4 sm:$0xff]  }
 0x31a   : > { %4646 = vmatpush1.bf16.msra.mxu1 %v7894_v29  ;;  %v7964_v29 = vld [vmem:[#allocation4 + $0xd90] ss:$36 sps:$4 sm:$0xff]  }
 0x31b   : > { %4820 = vmatpush1.bf16.msra.mxu0 %v7897_v30  ;;  %4647 = vmatprep.subr.bf16.mxu1 %v7902_v31  ;;  %v7968_v30 = vld [vmem:[#allocation4 + $0x530] ss:$36 sps:$4 sm:$0xff]   ;;  %v7973_v31 = vld [vmem:[#allocation4 + $0x260] ss:$36 sps:$4 sm:$0xff]  }
 0x31c   : > { %4821 = vmatprep.subr.bf16.mxu0 %v7905_v32 }
 0x31e   : > { %4648 = vmatpush1.bf16.msra.mxu1 %v7900_v33  ;;  %v7969_v33 = vld [vmem:[#allocation4 + $0x7b8] ss:$36 sps:$4 sm:$0xff]  }
 0x31f   : > { %4822 = vmatpush1.bf16.msra.mxu0 %v7903_v27  ;;  %4649 = vmatprep.subr.bf16.mxu1 %v7908_v34 }
 0x320   : > { %4823 = vmatprep.subr.bf16.mxu0 %v7911_v35  ;;  %v7970_v35 = vld [vmem:[#allocation4 + $0x578] ss:$36 sps:$4 sm:$0xff]  }
 0x322   : > { %4650 = vmatpush1.bf16.msra.mxu1 %v7906_v37  ;;  %v7971_v37 = vld [vmem:[#allocation4 + $0x800] ss:$36 sps:$4 sm:$0xff]  }
 0x323   : > { %4824 = vmatpush1.bf16.msra.mxu0 %v7909_v39  ;;  %4651 = vmatprep.subr.bf16.mxu1 %v7914_v40  ;;  %v7972_v39 = vld [vmem:[#allocation4 + $0x5c0] ss:$36 sps:$4 sm:$0xff]   ;;  %v7975_v40 = vld [vmem:[#allocation4 + $0x848] ss:$36 sps:$4 sm:$0xff]  }
 0x324   : > { %4825 = vmatprep.subr.bf16.mxu0 %v7917_v41  ;;  %v7974_v41 = vld [vmem:[#allocation4 + $0x20] ss:$36 sps:$4 sm:$0xff]  }
 0x326   : > { %4652 = vmatpush1.bf16.msra.mxu1 %v7912_v36  ;;  %v7976_v36 = vld [vmem:[#allocation4 + $0x608] ss:$36 sps:$4 sm:$0xff]  }
 0x327   : > { %4826 = vmatpush1.bf16.msra.mxu0 %v7915_v42  ;;  %4653 = vmatprep.subr.bf16.mxu1 %v7920_v43  ;;  %v7977_v42 = vld [vmem:[#allocation4 + $0x2a8] ss:$36 sps:$4 sm:$0xff]  }
 0x328   : > { %4827 = vmatprep.subr.bf16.mxu0 %v7923_v44  ;;  %v9102_v43 = vld [vmem:[#allocation6] sm:$0xff] }
 0x32a   : > { %4654 = vmatpush1.bf16.msra.mxu1 %v7918_v45 }
 0x32b   : > { %4828 = vmatpush1.bf16.msra.mxu0 %v7921_v46  ;;  %4655 = vmatprep.subr.bf16.mxu1 %v7926_v49  ;;  %v7978_v49 = vld [vmem:[#allocation4 + $0x68] ss:$36 sps:$4 sm:$0xff]  }
 0x32c   : > { %4829 = vmatprep.subr.bf16.mxu0 %v7929_v50  ;;  %v4191_v50 = vrot.slane %v9102_v43, %v1230_v13 }
 0x32e   : > { %4656 = vmatpush1.bf16.msra.mxu1 %v7924_v51 }
 0x32f   : > { %4830 = vmatpush1.bf16.msra.mxu0 %v7927_v52  ;;  %4657 = vmatprep.subr.bf16.mxu1 %v7932_v54  ;;  %v7980_v52 = vld [vmem:[#allocation4 + $0x650] ss:$36 sps:$4 sm:$0xff]  }
 0x330   : > { %4831 = vmatprep.subr.bf16.mxu0 %v7935_v55  ;;  %v7981_v54 = vld [vmem:[#allocation4 + $0x2f0] ss:$36 sps:$4 sm:$0xff]   ;;  %v4195_v55 = vrot.slane %v9102_v43, %v1234_v26 }
 0x332   : > { %4658 = vmatpush1.bf16.msra.mxu1 %v7930_v56  ;;  %v7983_v56 = vld [vmem:[#allocation4 + $0x8d8] ss:$36 sps:$4 sm:$0xff]  }
 0x333   : > { %4832 = vmatpush1.bf16.msra.mxu0 %v7933_v57  ;;  %4659 = vmatprep.subr.bf16.mxu1 %v7938_v58  ;;  %v7982_v57 = vld [vmem:[#allocation4 + $0xb0] ss:$36 sps:$4 sm:$0xff]   ;;  %v7984_v58 = vld [vmem:[#allocation4 + $0x698] ss:$36 sps:$4 sm:$0xff]  }
 0x334   : > { %4833 = vmatprep.subr.bf16.mxu0 %v7941_v59  ;;  %v7985_v59 = vld [vmem:[#allocation4 + $0x338] ss:$36 sps:$4 sm:$0xff]  }
 0x336   : > { %4660 = vmatpush1.bf16.msra.mxu1 %v7936_v60 }
 0x337   : > { %4834 = vmatpush1.bf16.msra.mxu0 %v7939_v61  ;;  %4661 = vmatprep.subr.bf16.mxu1 %v7944_v2 }
 0x338   : > { %4844 = vmatprep.subr.bf16.mxu0 %v7953_v3 }
 0x33a   : > { %4662 = vmatpush1.bf16.msra.mxu1 %v7942_v5  ;;  %4836 = vmatmul.mubr.bf16.vlgmr.msra.gmra.mrb[12].mxu0 %v9072_v10 }
 0x33b   : > { %4663 = vmatprep.subr.bf16.mxu1 %v7947_v6  ;;  %4845 = vmatpush1.bf16.msra.mxu0 %v7951_v7  ;;  %v7986_v6 = vld [vmem:[#allocation4 + $0xf8] ss:$36 sps:$4 sm:$0xff]   ;;  %v7987_v7 = vld [vmem:[#allocation4 + $0x380] ss:$36 sps:$4 sm:$0xff]  }
 0x33c   : > { %4876 = vmatprep.mubr.bf16.mxu0 %v8364_v19  ;;  %6855 = vmatprep.subr.bf16.mxu0 %v7957_v8  ;;  %v7989_v8 = vld [vmem:[#allocation4 + $0xda0] ss:$36 sps:$4 sm:$0xff]  }
 0x33e   : > { %4664 = vmatpush1.bf16.msra.mxu1 %v7945_v38  ;;  %v8365_v38 = vmov 0.0  }
 0x33f   : > { %4665 = vmatprep.subr.bf16.mxu1 %v7950_v9  ;;  %v7991_v9 = vld [vmem:[%s9400_s5 + $0xc0] sm:$0xff]  }
 0x342   : > { %4666 = vmatpush1.bf16.msra.mxu1 %v7948_v11  ;;  %v7988_v11 = vld [vmem:[#allocation4 + $0x140] ss:$36 sps:$4 sm:$0xff]  }
 0x343   : > { %4667 = vmatprep.subr.bf16.mxu1 %v7956_v12  ;;  %v7990_v12 = vld [vmem:[#allocation4 + $0x3c8] ss:$36 sps:$4 sm:$0xff]  }
 0x346   : > { %4668 = vmatpush1.bf16.msra.mxu1 %v7954_v16  ;;  %6724 = vmatmul.mubr.msk.bf16.vlgmr.msra.gmra.mrb[12].mxu0 %vm4225_vm0, %v9079_v23 }
 0x347   : > { %6856 = vmatpush3.bf16.msra.mxu0 %v7958_v18  ;;  %4957 = vmatprep.mubr.bf16.mxu0 %v9040_v47  ;;  %v7992_v18 = vld [vmem:[#allocation4 + $0x188] ss:$36 sps:$4 sm:$0xff]  }
 0x348   : > { %4669 = vmatprep.subr.bf16.mxu1 %v7961_v0  ;;  %6857 = vmatprep.subr.bf16.mxu0 %v7962_v20  ;;  %v7993_v0 = vld [vmem:[%s9400_s5 + $0x80] sm:$0xff]   ;;  %v7994_v20 = vld [vmem:[#allocation4 + $0x410] ss:$36 sps:$4 sm:$0xff]  }
 0x34a   : > { %4670 = vmatpush1.bf16.msra.mxu1 %v7959_v22 }
 0x34b   : > { %6858 = vmatpush3.bf16.msra.mxu0 %v7963_v21  ;;  %4680 = vmatprep.subr.bf16.mxu1 %v7966_v24  ;;  %v7996_v21 = vld [vmem:[#allocation4 + $0x1d0] ss:$36 sps:$4 sm:$0xff]   ;;  %v7997_v24 = vld [vmem:[%s9400_s5 + $0x88] sm:$0xff]  }
 0x34c   : > { %v4509_v32 = vpop.f32.mrb[8].mxu0  ;;  %6859 = vmatprep.subr.bf16.mxu0 %v7967_v28  ;;  %v7998_v28 = vld [vmem:[#allocation4 + $0x458] ss:$36 sps:$4 sm:$0xff]  }
 0x34d   : > { %4672 = vmatmul.mubr.bf16.vlgmr.msra.gmra.mrb[16].mxu1 %v9072_v10  ;;  %v4511_v27 = vpop.f32.mrb[9].mxu0 }
 0x34e   : > { %4681 = vmatpush1.bf16.msra.mxu1 %v7964_v29  ;;  %v4513_v34 = vpop.f32.mrb[10].mxu0  ;;  %4712 = vmatprep.mubr.bf16.mxu1 %v8364_v19  ;;  %v7979_v19 = vld [vmem:[#allocation4 + $0x890] ss:$36 sps:$4 sm:$0xff]   ;;  %v7068_v60 = vadd.f32 %v4511_v27, %v4195_v55  ;;  %v7999_v29 = vld [vmem:[%s9400_s5 + $0xd0] sm:$0xff]   ;;  %v8044_v55 = vld [vmem:[%s9400_s5 + $0x1c0] sm:$0xff]  }
 0x34f   : > { %6860 = vmatpush3.bf16.msra.mxu0 %v7968_v30  ;;  %v4514_v47 = vpop.f32.mrb[11].mxu0  ;;  %6833 = vmatprep.subr.bf16.mxu1 %v7973_v31  ;;  %v8000_v30 = vld [vmem:[#allocation4 + $0x218] ss:$36 sps:$4 sm:$0xff]   ;;  %v8002_v31 = vld [vmem:[#allocation4 + $0xb60] ss:$36 sps:$4 sm:$0xff]   ;;  %v8005_v27 = vld [vmem:[%s9400_s5 + $0x98] sm:$0xff]  }
 0x350   : > { %6861 = vmatprep.subr.bf16.mxu0 %v7969_v33  ;;  %v8004_v33 = vld [vmem:[#allocation4 + $0x920] ss:$36 sps:$4 sm:$0xff]   ;;  %v8006_v34 = vld [vmem:[#allocation4 + $0xba8] ss:$36 sps:$4 sm:$0xff]   ;;  %v8007_v47 = vld [vmem:[%s9400_s5 + $0xe0] sm:$0xff]  }
 0x353   : > { %6862 = vmatpush3.bf16.msra.mxu0 %v7970_v35  ;;  %v8008_v35 = vld [vmem:[#allocation4 + $0x968] ss:$36 sps:$4 sm:$0xff]  }
 0x354   : > { %6863 = vmatprep.subr.bf16.mxu0 %v7971_v37  ;;  %v8009_v37 = vld [vmem:[%s9400_s5 + $0xa0] sm:$0xff]  }
 0x357   : > { %6864 = vmatpush3.bf16.msra.mxu0 %v7972_v39  ;;  %v8010_v39 = vld [vmem:[#allocation4 + $0xbf0] ss:$36 sps:$4 sm:$0xff]  }
 0x358   : > { %v9104_v44 = vpop.f32.mrb[8].mxu1  ;;  %6865 = vmatprep.subr.bf16.mxu0 %v7975_v40  ;;  %v8011_v40 = vld [vmem:[%s9400_s5 + $0xe8] sm:$0xff]  }
 0x359   : > { %6723 = vmatmul.mubr.msk.bf16.vlgmr.msra.gmra.mrb[16].mxu1 %vm4225_vm0, %v9079_v23  ;;  %v9108_v45 = vpop.f32.mrb[9].mxu1 }
 0x35a   : > { %6834 = vmatpush3.bf16.msra.mxu1 %v7974_v41  ;;  %4917 = vmatprep.mubr.bf16.mxu1 %v9026_v14  ;;  %v4390_v46 = vpop.f32.mrb[10].mxu1  ;;  %v7066_v14 = vadd.f32 %v4509_v32, %v4191_v50  ;;  %v8003_v32 = vld [vmem:[%s9400_s5 + $0xd8] sm:$0xff]   ;;  %v8020_v50 = vld [vmem:[#allocation4 + $0xa40] ss:$36 sps:$4 sm:$0xff]  }
 0x35b   : > { %6866 = vmatpush3.bf16.msra.mxu0 %v7976_v36  ;;  %v4391_v51 = vpop.f32.mrb[11].mxu1  ;;  %6835 = vmatprep.subr.bf16.mxu1 %v7977_v42  ;;  %v8012_v41 = vld [vmem:[#allocation4 + $0x9b0] ss:$36 sps:$4 sm:$0xff]   ;;  %v8015_v36 = vld [vmem:[%s9400_s5 + $0xf0] sm:$0xff]   ;;  %v8016_v42 = vld [vmem:[#allocation4 + $0x9f8] ss:$36 sps:$4 sm:$0xff]  }
 0x35c   : > { %6867 = vmatprep.subr.bf16.mxu0 %v7979_v19  ;;  %v8017_v19 = vld [vmem:[%s9400_s5 + $0xb0] sm:$0xff]   ;;  %v8018_v46 = vld [vmem:[#allocation4 + $0xc80] ss:$36 sps:$4 sm:$0xff]   ;;  %v8021_v51 = vld [vmem:[%s9400_s5 + $0xb8] sm:$0xff]  }
 0x35e   : > { %6836 = vmatpush3.bf16.msra.mxu1 %v7978_v49  ;;  %v8019_v49 = vld [vmem:[%s9400_s5 + $0xf8] sm:$0xff]  }
 0x35f   : > { %6868 = vmatpush3.bf16.msra.mxu0 %v7980_v52  ;;  %6837 = vmatprep.subr.bf16.mxu1 %v7981_v54  ;;  %v8022_v52 = vld [vmem:[#allocation4 + $0xcc8] ss:$36 sps:$4 sm:$0xff]  }
 0x360   : > { %v4550_v13 = vpop.f32.mrb[12].mxu1  ;;  %6869 = vmatprep.subr.bf16.mxu0 %v7983_v56  ;;  %v8023_v56 = vld [vmem:[#allocation4 + $0xa88] ss:$36 sps:$4 sm:$0xff]  }
 0x361   : > { %v9117_v61 = vadd.f32 %v7066_v14, %v4550_v13  ;;  %v4552_v2 = vpop.f32.mrb[13].mxu1  ;;  %v8045_v14 = vld [vmem:[%s9400_s5 + $0x180] sm:$0xff]   ;;  %v8025_v13 = vld [vmem:[#allocation4 + $0xad0] ss:$36 sps:$4 sm:$0xff]  }
 0x362   : > { %6838 = vmatpush3.bf16.msra.mxu1 %v7982_v57  ;;  %v7069_v3 = vadd.f32 %v7068_v60, %v4552_v2  ;;  %v4554_v5 = vpop.f32.mrb[14].mxu1  ;;  %v8024_v57 = vld [vmem:[#allocation4 + $0xd10] ss:$36 sps:$4 sm:$0xff]   ;;  %v8046_v60 = vld [vmem:[%s9400_s5 + $0x1c8] sm:$0xff]  }
 0x363   : > { %6870 = vmatpush3.bf16.msra.mxu0 %v7984_v58  ;;  %v4555_v26 = vpop.f32.mrb[15].mxu1  ;;  %6839 = vmatprep.subr.bf16.mxu1 %v7985_v59  ;;  %v5047_v54 = vmax.f32 %v9117_v61, 0.0  ;;  %v4187_v58 = vrot.slane %v9102_v43, %v1226_v1  ;;  %v8026_v61 = vld [vmem:[#allocation4 + $0xd58] ss:$36 sps:$4 sm:$0xff]   ;;  %v8047_v2 = vld [vmem:[%s9400_s5 + $0x188] sm:$0xff]   ;;  %v8048_v1 = vld [vmem:[%s9400_s5 + $0x1d0] sm:$0xff]  }
 0x364   : > { %7010 = vmatprep.subr.bf16.mxu0 %v8365_v38  ;;  %v5048_v16 = vmax.f32 %v7069_v3, 0.0  ;;  %v8027_v5 = vld [vmem:[#allocation4 + $0xb18] ss:$36 sps:$4 sm:$0xff]   ;;  %v8049_v26 = vld [vmem:[%s9400_s5 + $0x190] sm:$0xff]  }
 0x365   : > { %v5056_v59 = vpack.c.bf16 %v5047_v54, %v5047_v54  ;;  %v7065_v3 = vadd.f32 %v9108_v45, %v4187_v58  ;;  %v8050_v45 = vld [vmem:[%s9400_s5 + $0x1d8] sm:$0xff]   ;;  %v8071_v54 = vld [vmem:[%s9400_s5 + $0x128] sm:$0xff]   ;;  %v4210_v58 = vsub.s32 7, %v8686_v15 }
 0x366   : > { %6840 = vmatpush3.bf16.msra.mxu1 %v7986_v6  ;;  %4958 = vmatmul.mubr.bf16.vlgmr.msra.gmra.mrb[16].mxu0 %v9057_v48  ;;  %v7995_v48 = vld [vmem:[%s9400_s5 + $0xc8] sm:$0xff]   ;;  %v5057_v22 = vpack.c.bf16 %v5048_v16, %v5048_v16  ;;  %v8028_v6 = vld [vmem:[%s9400_s5 + $0x40] sm:$0xff]  }
 0x367   : > { %6841 = vmatprep.subr.bf16.mxu1 %v7987_v7  ;;  %7011 = vmatpush3.bf16.msra.mxu0 %v7989_v8  ;;  %v5046_v7 = vmax.f32 %v7065_v3, 0.0  ;;  %v8029_v8 = vld [vmem:[%s9400_s5] sm:$0xff]   ;;  %v8077_v15 = vld [vmem:[%s9400_s5 + $0x208] sm:$0xff]  }
 0x368   : > { %7012 = vmatprep.mubr.msk.bf16.mxu0 %vm8366_vm1, %v8365_v38  ;;  %6923 = vmatprep.subr.bf16.mxu0 %v7991_v9  ;;  %v8030_v9 = vld [vmem:[%s9400_s5 + $0x48] sm:$0xff]   ;;  %v8052_v16 = vld [vmem:[%s9400_s5 + $0x1e0] sm:$0xff]  }
 0x36a   : > { %6842 = vmatpush3.bf16.msra.mxu1 %v7988_v11  ;;  %v8051_v11 = vld [vmem:[%s9400_s5 + $0x198] sm:$0xff]  }
 0x36b   : > { %6843 = vmatprep.subr.bf16.mxu1 %v7990_v12  ;;  %v5055_v12 = vpack.c.bf16 %v5046_v7, %v5046_v7 }
 0x36e   : > { %6844 = vmatpush3.bf16.msra.mxu1 %v7992_v18  ;;  %7013 = vmatmul.mubr.msk.bf16.vlgmr.msra.gmra.mrb[20].mxu0 %vm4225_vm0, %v9079_v23  ;;  %v8001_v23 = vld [vmem:[%s9400_s5 + $0x90] sm:$0xff]   ;;  %v8031_v18 = vld [vmem:[%s9400_s5 + $0x8] sm:$0xff]  }
 0x36f   : > { %6924 = vmatpush3.bf16.msra.mxu0 %v7993_v0  ;;  %5712 = vmatprep.mubr.bf16.mxu0 %v5057_v22  ;;  %v8032_v0 = vld [vmem:[%s9400_s5 + $0x50] sm:$0xff]   ;;  %v8034_v22 = vld [vmem:[%s9400_s5 + $0x58] sm:$0xff]  }
 0x370   : > { %6845 = vmatprep.subr.bf16.mxu1 %v7994_v20  ;;  %6925 = vmatprep.subr.bf16.mxu0 %v7995_v48  ;;  %v8053_v20 = vld [vmem:[%s9400_s5 + $0x1a0] sm:$0xff]   ;;  %v8033_v48 = vld [vmem:[%s9400_s5 + $0x10] sm:$0xff]  }
 0x372   : > { %6846 = vmatpush3.bf16.msra.mxu1 %v7996_v21  ;;  %v8057_v21 = vld [vmem:[%s9400_s5 + $0x1a8] sm:$0xff]  }
 0x373   : > { %6926 = vmatpush3.bf16.msra.mxu0 %v7997_v24  ;;  %6847 = vmatprep.subr.bf16.mxu1 %v7998_v28  ;;  %v8060_v24 = vld [vmem:[%s9400_s5 + $0x1f0] sm:$0xff]   ;;  %v8035_v28 = vld [vmem:[%s9400_s5 + $0x18] sm:$0xff]  }
 0x374   : > { %6927 = vmatprep.subr.bf16.mxu0 %v7999_v29  ;;  %v8036_v29 = vld [vmem:[%s9400_s5 + $0x60] sm:$0xff]  }
 0x376   : > { %6848 = vmatpush3.bf16.msra.mxu1 %v8000_v30  ;;  %v8061_v30 = vld [vmem:[%s9400_s5 + $0x1b0] sm:$0xff]  }
 0x377   : > { %6928 = vmatpush3.bf16.msra.mxu0 %v8001_v23  ;;  %6877 = vmatprep.subr.bf16.mxu1 %v8002_v31  ;;  %v8064_v23 = vld [vmem:[%s9400_s5 + $0x1f8] sm:$0xff]   ;;  %v8037_v31 = vld [vmem:[%s9400_s5 + $0x20] sm:$0xff]  }
 0x378   : > { %6929 = vmatprep.subr.bf16.mxu0 %v8003_v32  ;;  %v8038_v32 = vld [vmem:[%s9400_s5 + $0x68] sm:$0xff]  }
 0x379   : > { %4918 = vmatmul.mubr.bf16.vlgmr.msra.gmra.mrb[20].mxu1 %v9028_v17  ;;  %v8013_v17 = vld [vmem:[%s9400_s5 + $0xa8] sm:$0xff]  }
 0x37a   : > { %6878 = vmatpush3.bf16.msra.mxu1 %v8004_v33  ;;  %4997 = vmatprep.mubr.bf16.mxu1 %v9059_v53  ;;  %v8014_v53 = vld [vmem:[#allocation4 + $0xc38] ss:$36 sps:$4 sm:$0xff]   ;;  %v8065_v33 = vld [vmem:[%s9400_s5 + $0x1b8] sm:$0xff]  }
 0x37b   : > { %6930 = vmatpush3.bf16.msra.mxu0 %v8005_v27  ;;  %6879 = vmatprep.subr.bf16.mxu1 %v8006_v34  ;;  %v8039_v27 = vld [vmem:[%s9400_s5 + $0x28] sm:$0xff]   ;;  %v4183_v34 = vrot.slane %v9102_v43, %v1222_v62  ;;  %v8042_v62 = vld [vmem:[%s9400_s5 + $0x78] sm:$0xff]  }
 0x37c   : > { %6931 = vmatprep.subr.bf16.mxu0 %v8007_v47  ;;  %v8040_v47 = vld [vmem:[%s9400_s5 + $0x70] sm:$0xff]  }
 0x37e   : > { %6880 = vmatpush3.bf16.msra.mxu1 %v8008_v35  ;;  %v8041_v35 = vld [vmem:[%s9400_s5 + $0x30] sm:$0xff]  }
 0x37f   : > { %6932 = vmatpush3.bf16.msra.mxu0 %v8009_v37  ;;  %6881 = vmatprep.subr.bf16.mxu1 %v8010_v39  ;;  %v7064_v37 = vadd.f32 %v9104_v44, %v4183_v34  ;;  %v8043_v39 = vld [vmem:[%s9400_s5 + $0x38] sm:$0xff]   ;;  %v8055_v44 = vld [vmem:[%s9400_s5 + $0x100] sm:$0xff]   ;;  %v8081_v34 = vld [vmem:[%s9400_s5 + $0x228] sm:$0xff]  }
 0x380   : > { %6933 = vmatprep.subr.bf16.mxu0 %v8011_v40 }
 0x381   : > { %v5045_v40 = vmax.f32 %v7064_v37, 0.0  ;;  %v6720_v37 = vld [vmem:[#allocation6 + $0x8] ss:$0 sm:$0xff] }
 0x382   : > { %6882 = vmatpush3.bf16.msra.mxu1 %v8012_v41  ;;  %v8054_v41 = vld [vmem:[%s9400_s5 + $0x140] sm:$0xff]  }
 0x383   : > { %6934 = vmatpush3.bf16.msra.mxu0 %v8013_v17  ;;  %6883 = vmatprep.subr.bf16.mxu1 %v8014_v53  ;;  %v5054_v17 = vpack.c.bf16 %v5045_v40, %v5045_v40  ;;  %v8058_v53 = vld [vmem:[%s9400_s5 + $0x148] sm:$0xff]  }
 0x384   : > { %6935 = vmatprep.subr.bf16.mxu0 %v8015_v36  ;;  %v8059_v36 = vld [vmem:[%s9400_s5 + $0x108] sm:$0xff]  }
 0x386   : > { %6884 = vmatpush3.bf16.msra.mxu1 %v8016_v42  ;;  %v8062_v42 = vld [vmem:[%s9400_s5 + $0x150] sm:$0xff]  }
 0x387   : > { %6936 = vmatpush3.bf16.msra.mxu0 %v8017_v19  ;;  %6885 = vmatprep.subr.bf16.mxu1 %v8018_v46  ;;  %v8063_v19 = vld [vmem:[%s9400_s5 + $0x110] sm:$0xff]   ;;  %v8066_v46 = vld [vmem:[%s9400_s5 + $0x158] sm:$0xff]  }
 0x388   : > { %6937 = vmatprep.subr.bf16.mxu0 %v8019_v49  ;;  %v8067_v49 = vld [vmem:[%s9400_s5 + $0x118] sm:$0xff]  }
 0x38a   : > { %6886 = vmatpush3.bf16.msra.mxu1 %v8020_v50  ;;  %v8068_v50 = vld [vmem:[%s9400_s5 + $0x160] sm:$0xff]  }
 0x38b   : > { %6938 = vmatpush3.bf16.msra.mxu0 %v8021_v51  ;;  %6887 = vmatprep.subr.bf16.mxu1 %v8022_v52  ;;  %v8069_v51 = vld [vmem:[%s9400_s5 + $0x120] sm:$0xff]   ;;  %v8070_v52 = vld [vmem:[%s9400_s5 + $0x168] sm:$0xff]  }
 0x38c   : > { %6967 = vmatprep.subr.bf16.mxu0 %v8044_v55  ;;  %v8072_v55 = vld [vmem:[%s9400_s5 + $0x170] sm:$0xff]  }
 0x38e   : > { %5713 = vmatmul.mubr.bf16.vlgmr.msra.gmra.mrb[24].mxu0 %v5056_v59  ;;  %6888 = vmatpush3.bf16.msra.mxu1 %v8023_v56  ;;  %v8073_v56 = vld [vmem:[%s9400_s5 + $0x130] sm:$0xff]   ;;  %v4207_v59 = vrot.slane %v9102_v43, %v1246_v4  ;;  %v4199_v4 = vrot.slane %v9102_v43, %v1238_v63 }
 0x38f   : > { %6889 = vmatprep.subr.bf16.mxu1 %v8024_v57  ;;  %6968 = vmatpush3.bf16.msra.mxu0 %v8045_v14  ;;  %v8074_v57 = vld [vmem:[%s9400_s5 + $0x178] sm:$0xff]  }
 0x390   : > { %6969 = vmatprep.subr.bf16.mxu0 %v8046_v60  ;;  %v8075_v14 = vld [vmem:[%s9400_s5 + $0x138] sm:$0xff]   ;;  %v4211_v60 = vrot.slane %v9102_v43, %v4210_v58 }
 0x392   : > { %6890 = vmatpush3.bf16.msra.mxu1 %v8025_v13 }
 0x393   : > { %6891 = vmatprep.subr.bf16.mxu1 %v8026_v61  ;;  %6970 = vmatpush3.bf16.msra.mxu0 %v8047_v2 }
 0x394   : > { %6971 = vmatprep.subr.bf16.mxu0 %v8048_v1 }
 0x396   : > { %6892 = vmatpush3.bf16.msra.mxu1 %v8027_v5 }
 0x397   : > { %6901 = vmatprep.subr.bf16.mxu1 %v8028_v6  ;;  %6972 = vmatpush3.bf16.msra.mxu0 %v8049_v26 }
 0x398   : > { %6973 = vmatprep.subr.bf16.mxu0 %v8050_v45 }
 0x399   : > { %4998 = vmatmul.mubr.bf16.vlgmr.msra.gmra.mrb[24].mxu1 %v9072_v10  ;;  %v8056_v10 = vld [vmem:[%s9400_s5 + $0x1e8] sm:$0xff]  }
 0x39a   : > { %6902 = vmatpush3.bf16.msra.mxu1 %v8029_v8  ;;  %5672 = vmatprep.mubr.bf16.mxu1 %v5055_v12  ;;  %v4203_v8 = vrot.slane %v9102_v43, %v1242_v25  ;;  %v8078_v43 = vld [vmem:[%s9400_s5 + $0x210] sm:$0xff]  }
 0x39b   : > { %6903 = vmatprep.subr.bf16.mxu1 %v8030_v9  ;;  %6974 = vmatpush3.bf16.msra.mxu0 %v8051_v11 }
 0x39c   : > { %6975 = vmatprep.subr.bf16.mxu0 %v8052_v16 }
 0x39e   : > { %6904 = vmatpush3.bf16.msra.mxu1 %v8031_v18 }
 0x39f   : > { %6905 = vmatprep.subr.bf16.mxu1 %v8032_v0  ;;  %6976 = vmatpush3.bf16.msra.mxu0 %v8053_v20 }
 0x3a0   : > { %6977 = vmatprep.subr.bf16.mxu0 %v8056_v10 }
 0x3a2   : > { %6906 = vmatpush3.bf16.msra.mxu1 %v8033_v48 }
 0x3a3   : > { %6907 = vmatprep.subr.bf16.mxu1 %v8034_v22  ;;  %6978 = vmatpush3.bf16.msra.mxu0 %v8057_v21  ;;  %v8076_v22 = vld [vmem:[%s9400_s5 + $0x200] sm:$0xff]  }
 0x3a4   : > { %6979 = vmatprep.subr.bf16.mxu0 %v8060_v24 }
 0x3a6   : > { %6908 = vmatpush3.bf16.msra.mxu1 %v8035_v28 }
 0x3a7   : > { %6909 = vmatprep.subr.bf16.mxu1 %v8036_v29  ;;  %6980 = vmatpush3.bf16.msra.mxu0 %v8061_v30  ;;  %v8079_v30 = vld [vmem:[%s9400_s5 + $0x218] sm:$0xff]  }
 0x3a8   : > { %6981 = vmatprep.subr.bf16.mxu0 %v8064_v23 }
 0x3aa   : > { %6910 = vmatpush3.bf16.msra.mxu1 %v8037_v31 }
 0x3ab   : > { %6911 = vmatprep.subr.bf16.mxu1 %v8038_v32  ;;  %6982 = vmatpush3.bf16.msra.mxu0 %v8065_v33  ;;  %v8080_v32 = vld [vmem:[%s9400_s5 + $0x220] sm:$0xff]  }
 0x3ac   : > { %7036 = vmatprep.subr.bf16.mxu0 %v8365_v38 }
 0x3ae   : > { %6912 = vmatpush3.bf16.msra.mxu1 %v8039_v27 }
 0x3af   : > { %6913 = vmatprep.subr.bf16.mxu1 %v8040_v47  ;;  %v8082_v47 = vld [vmem:[%s9400_s5 + $0x230] sm:$0xff]  }
 0x3b2   : > { %6914 = vmatpush3.bf16.msra.mxu1 %v8041_v35 }
 0x3b3   : > { %6915 = vmatprep.subr.bf16.mxu1 %v8042_v62 }
 0x3b6   : > { %6916 = vmatpush3.bf16.msra.mxu1 %v8043_v39 }
 0x3b7   : > { %6945 = vmatprep.subr.bf16.mxu1 %v8054_v41  ;;  %v8083_v41 = vld [vmem:[%s9400_s5 + $0x238] sm:$0xff]  }
 0x3b9   : > { %5673 = vmatmul.mubr.bf16.vlgmr.msra.gmra.mrb[28].mxu1 %v5054_v17 }
 0x3ba   : > { %6946 = vmatpush3.bf16.msra.mxu1 %v8055_v44 }
 0x3bb   : > { %6947 = vmatprep.subr.bf16.mxu1 %v8058_v53 }
 0x3be   : > { %6948 = vmatpush3.bf16.msra.mxu1 %v8059_v36 }
 0x3bf   : > { %6949 = vmatprep.subr.bf16.mxu1 %v8062_v42 }
 0x3c2   : > { %6950 = vmatpush3.bf16.msra.mxu1 %v8063_v19 }
 0x3c3   : > { %6951 = vmatprep.subr.bf16.mxu1 %v8066_v46 }
 0x3c6   : > { %6952 = vmatpush3.bf16.msra.mxu1 %v8067_v49 }
 0x3c7   : > { %6953 = vmatprep.subr.bf16.mxu1 %v8068_v50 }
 0x3ca   : > { %6954 = vmatpush3.bf16.msra.mxu1 %v8069_v51 }
 0x3cb   : > { %6955 = vmatprep.subr.bf16.mxu1 %v8070_v52 }
 0x3ce   : > { %6956 = vmatpush3.bf16.msra.mxu1 %v8071_v54 }
 0x3cf   : > { %6957 = vmatprep.subr.bf16.mxu1 %v8072_v55 }
 0x3d2   : > { %6958 = vmatpush3.bf16.msra.mxu1 %v8073_v56 }
 0x3d3   : > { %6959 = vmatprep.subr.bf16.mxu1 %v8074_v57 }
 0x3d6   : > { %6960 = vmatpush3.bf16.msra.mxu1 %v8075_v14 }
 0x3d7   : > { %7016 = vmatprep.subr.bf16.mxu1 %v8365_v38 }
 0x419   : > { %v4878_v13 = vpop.f32.mrb[12].mxu0 }
 0x41a   : > { %v7072_v61 = vadd.f32 %v4878_v13, %v4207_v59  ;;  %v4880_v2 = vpop.f32.mrb[13].mxu0 }
 0x41b   : > { %v7073_v3 = vadd.f32 %v4880_v2, %v4211_v60  ;;  %v4882_v1 = vpop.f32.mrb[14].mxu0  ;;  %v5207_v60 = vld [vmem:[#allocation7] sm:$0x1] }
 0x41c   : > { %v5051_v5 = vmax.f32 %v7072_v61, 0.0  ;;  %v4883_v6 = vpop.f32.mrb[15].mxu0 }
 0x41d   : > { %v5052_v26 = vmax.f32 %v7073_v3, 0.0  ;;  %v8084_v6 = vld [vmem:[#allocation9] sm:$0xff]  }
 0x41e   : > { %v5060_v45 = vpack.c.bf16 %v5051_v5, %v5051_v5 }
 0x41f   : > { %v5061_v7 = vpack.c.bf16 %v5052_v26, %v5052_v26  ;;  %v8085_v26 = vld [vmem:[#allocation9 + $0x8] sm:$0xff]  }
 0x421   : > { %5792 = vmatprep.mubr.bf16.mxu0 %v5061_v7 }
 0x422   : > { %5793 = vmatmul.mubr.bf16.vlgmr.msra.gmra.mrb[28].mxu0 %v5060_v45 }
 0x423   : > { %7040 = vmatprep.mubr.msk.bf16.mxu0 %vm8366_vm1, %v8365_v38  ;;  %7037 = vmatpush3.bf16.msra.mxu0 %v8084_v6 }
 0x424   : > { %7038 = vmatprep.subr.bf16.mxu0 %v8365_v38 }
 0x427   : > { %7039 = vmatpush3.bf16.msra.mxu0 %v8085_v26 }
 0x428   : > { %7044 = vmatprep.subr.bf16.mxu0 %v8365_v38 }
 0x42c   : > { %v4714_v9 = vpop.f32.mrb[16].mxu1 }
 0x42d   : > { %v7070_v11 = vadd.f32 %v4714_v9, %v4199_v4  ;;  %v4716_v12 = vpop.f32.mrb[17].mxu1 }
 0x42e   : > { %v7071_v16 = vadd.f32 %v4716_v12, %v4203_v8  ;;  %v4718_v18 = vpop.f32.mrb[18].mxu1 }
 0x42f   : > { %v5049_v0 = vmax.f32 %v7070_v11, 0.0  ;;  %v4719_v20 = vpop.f32.mrb[19].mxu1 }
 0x430   : > { %v5050_v10 = vmax.f32 %v7071_v16, 0.0 }
 0x431   : > { %v5058_v21 = vpack.c.bf16 %v5049_v0, %v5049_v0 }
 0x432   : > { %v5059_v48 = vpack.c.bf16 %v5050_v10, %v5050_v10 }
 0x434   : > { %5752 = vmatprep.mubr.bf16.mxu1 %v5059_v48 }
 0x435   : > { %5753 = vmatmul.mubr.bf16.vlgmr.msra.gmra.mrb[32].mxu1 %v5058_v21 }
 0x436   : > { %7017 = vmatpush3.bf16.msra.mxu1 %v8076_v22  ;;  %7032 = vmatprep.mubr.msk.bf16.mxu1 %vm8366_vm1, %v8365_v38 }
 0x437   : > { %7018 = vmatprep.subr.bf16.mxu1 %v8365_v38 }
 0x439   : > { %v6871_v25 = vpop.f32.mrb[16].mxu0 }
 0x43a   : > { %v6872_v63 = vpop.f32.mrb[17].mxu0  ;;  %7019 = vmatpush3.bf16.msra.mxu1 %v8077_v15 }
 0x43b   : > { %v6873_v24 = vadd.f32 %v6872_v63, %v6871_v25  ;;  %v6874_v28 = vpop.f32.mrb[18].mxu0  ;;  %7020 = vmatprep.subr.bf16.mxu1 %v8365_v38 }
 0x43c   : > { %v6875_v29 = vpop.f32.mrb[19].mxu0  ;;  %v8087_v28 = vld [vmem:[#allocation12 + $0x8] sm:$0xff]  }
 0x43d   : > { %v8088_v29 = vld [vmem:[#allocation12 + $0x10] sm:$0xff]  }
 0x43e   : > { %7021 = vmatpush3.bf16.msra.mxu1 %v8078_v43  ;;  %v8086_v43 = vld [vmem:[#allocation12] sm:$0xff]  }
 0x43f   : > { %7022 = vmatprep.subr.bf16.mxu1 %v8365_v38 }
 0x441   : > { %v5039_v23 = vpop.f32.mrb[20].mxu0 }
 0x442   : > { %v7014_v31 = vpop.f32.mrb[21].mxu0  ;;  %7023 = vmatpush3.bf16.msra.mxu1 %v8079_v30  ;;  %v8089_v30 = vld [vmem:[#allocation12 + $0x18] sm:$0xff]  }
 0x443   : > { %v5042_v33 = vpop.f32.mrb[22].mxu0  ;;  %7024 = vmatprep.subr.bf16.mxu1 %v8365_v38  ;;  %v8091_v31 = vld [vmem:[#allocation12 + $0x28] sm:$0xff]  }
 0x444   : > { %v7015_v27 = vpop.f32.mrb[23].mxu0  ;;  %v8093_v33 = vld [vmem:[#allocation12 + $0x38] sm:$0xff]  }
 0x445   : > { %v5846_v27 = vld [vmem:[#allocation10] sm:$0x1] }
 0x446   : > { %7025 = vmatpush3.bf16.msra.mxu1 %v8080_v32  ;;  %v8092_v32 = vld [vmem:[#allocation12 + $0x30] sm:$0xff]  }
 0x447   : > { %7026 = vmatprep.subr.bf16.mxu1 %v8365_v38 }
 0x44a   : > { %7027 = vmatpush3.bf16.msra.mxu1 %v8081_v34 }
 0x44b   : > { %7028 = vmatprep.subr.bf16.mxu1 %v8365_v38 }
 0x44c   : > { %v6849_v35 = vpop.f32.mrb[20].mxu1 }
 0x44d   : > { %v6850_v62 = vpop.f32.mrb[21].mxu1 }
 0x44e   : > { %v6851_v39 = vadd.f32 %v6850_v62, %v6849_v35  ;;  %v6852_v40 = vpop.f32.mrb[22].mxu1  ;;  %7029 = vmatpush3.bf16.msra.mxu1 %v8082_v47 }
 0x44f   : > { %v6853_v44 = vpop.f32.mrb[23].mxu1  ;;  %7030 = vmatprep.subr.bf16.mxu1 %v8365_v38 }
 0x450   : > { %v4920_v17 = vadd.f32 %v6851_v39, %v6720_v37 }
 0x452   : > { %v4960_v53 = vadd.f32 %v6873_v24, %v4920_v17  ;;  %7031 = vmatpush3.bf16.msra.mxu1 %v8083_v41 }
 0x461   : > { %v6939_v36 = vpop.f32.mrb[24].mxu0 }
 0x462   : > { %v6940_v42 = vpop.f32.mrb[25].mxu0 }
 0x463   : > { %v6941_v19 = vadd.f32 %v6940_v42, %v6939_v36  ;;  %v6942_v46 = vpop.f32.mrb[26].mxu0 }
 0x464   : > { %v6943_v49 = vpop.f32.mrb[27].mxu0 }
 0x46c   : > { %v6893_v50 = vpop.f32.mrb[24].mxu1 }
 0x46d   : > { %v6894_v51 = vpop.f32.mrb[25].mxu1 }
 0x46e   : > { %v6895_v52 = vadd.f32 %v6894_v51, %v6893_v50  ;;  %v6896_v54 = vpop.f32.mrb[26].mxu1 }
 0x46f   : > { %v6897_v55 = vpop.f32.mrb[27].mxu1 }
 0x470   : > { %v5000_v56 = vadd.f32 %v6895_v52, %v4960_v53  ;;  %v5924_v53 = vld [vmem:[#allocation13] sm:$0x1] }
 0x472   : > { %v5040_v57 = vadd.f32 %v5039_v23, %v5000_v56  ;;  %v8090_v23 = vld [vmem:[#allocation12 + $0x20] sm:$0xff]  }
 0x474   : > { %v5053_v14 = vmax.f32 %v5040_v57, 0.0 }
 0x476   : > { %v5062_v58 = vpack.c.bf16 %v5053_v14, %v5053_v14 }
 0x478   : > { %7033 = vmatmul.mubr.bf16.vlgmr.msra.gmra.mrb[36].mxu1 %v5062_v58 }
 0x48c   : > { %v6917_v59 = vpop.f32.mrb[28].mxu1 }
 0x48d   : > { %v6918_v13 = vpop.f32.mrb[29].mxu1 }
 0x48e   : > { %v6919_v61 = vadd.f32 %v6918_v13, %v6917_v59  ;;  %v6920_v2 = vpop.f32.mrb[30].mxu1 }
 0x48f   : > { %v6921_v3 = vpop.f32.mrb[31].mxu1 }
 0x490   : > { %v5675_v1 = vadd.f32 %v6919_v61, %v5207_v60 }
 0x492   : > { %v5715_v5 = vadd.f32 %v6941_v19, %v5675_v1 }
 0x4f5   : > { %v6983_v7 = vpop.f32.mrb[28].mxu0 }
 0x4f6   : > { %v6984_v45 = vpop.f32.mrb[29].mxu0 }
 0x4f7   : > { %v6985_v4 = vadd.f32 %v6984_v45, %v6983_v7  ;;  %v6986_v8 = vpop.f32.mrb[30].mxu0 }
 0x4f8   : > { %v6987_v9 = vpop.f32.mrb[31].mxu0 }
 0x508   : > { %v6961_v11 = vpop.f32.mrb[32].mxu1 }
 0x509   : > { %v6962_v12 = vpop.f32.mrb[33].mxu1 }
 0x50a   : > { %v6963_v16 = vadd.f32 %v6962_v12, %v6961_v11  ;;  %v6964_v18 = vpop.f32.mrb[34].mxu1 }
 0x50b   : > { %v6965_v0 = vpop.f32.mrb[35].mxu1 }
 0x50c   : > { %v5755_v20 = vadd.f32 %v6963_v16, %v5715_v5 }
 0x50e   : > { %v5795_v10 = vadd.f32 %v6985_v4, %v5755_v20 }
 0x54b   : > { %v5834_v48 = vpop.f32.mrb[36].mxu1 }
 0x54c   : > { %v5835_v22 = vadd.f32 %v5834_v48, %v5795_v10  ;;  %v7034_v21 = vpop.f32.mrb[37].mxu1 }
 0x54d   : > { %v5837_v15 = vpop.f32.mrb[38].mxu1 }
 0x54e   : > { %v5840_v25 = vmax.f32 %v5835_v22, 0.0  ;;  %v7035_v63 = vpop.f32.mrb[39].mxu1 }
 0x550   : > { %v5841_v24 = vpack.c.bf16 %v5840_v25, %v5840_v25 }
 0x552   : > { %7041 = vmatmul.mubr.msk.bf16.vlgmr.msra.gmra.mrb[32].mxu0 %vm5859_vm2, %v5841_v24 }
 0x553   : > { %7045 = vmatpush3.bf16.msra.mxu0 %v8086_v43  ;;  %7060 = vmatprep.mubr.msk.bf16.mxu0 %vm8366_vm1, %v8365_v38 }
 0x554   : > { %7046 = vmatprep.subr.bf16.mxu0 %v8365_v38 }
 0x557   : > { %7047 = vmatpush3.bf16.msra.mxu0 %v8087_v28 }
 0x558   : > { %7048 = vmatprep.subr.bf16.mxu0 %v8365_v38 }
 0x55b   : > { %7049 = vmatpush3.bf16.msra.mxu0 %v8088_v29 }
 0x55c   : > { %7050 = vmatprep.subr.bf16.mxu0 %v8365_v38 }
 0x55f   : > { %7051 = vmatpush3.bf16.msra.mxu0 %v8089_v30 }
 0x560   : > { %7052 = vmatprep.subr.bf16.mxu0 %v8365_v38 }
 0x563   : > { %7053 = vmatpush3.bf16.msra.mxu0 %v8090_v23 }
 0x564   : > { %7054 = vmatprep.subr.bf16.mxu0 %v8365_v38 }
 0x567   : > { %7055 = vmatpush3.bf16.msra.mxu0 %v8091_v31 }
 0x568   : > { %7056 = vmatprep.subr.bf16.mxu0 %v8365_v38 }
 0x56b   : > { %7057 = vmatpush3.bf16.msra.mxu0 %v8092_v32 }
 0x56c   : > { %7058 = vmatprep.subr.bf16.mxu0 %v8365_v38 }
 0x56f   : > { %7059 = vmatpush3.bf16.msra.mxu0 %v8093_v33 }
 0x625   : > { %v5897_v34 = vpop.f32.mrb[32].mxu0 }
 0x626   : > { %v5898_v47 = vadd.f32 %v5897_v34, %v5846_v27  ;;  %v7042_v35 = vpop.f32.mrb[33].mxu0 }
 0x627   : > { %v5900_v37 = vpop.f32.mrb[34].mxu0 }
 0x628   : > { %v5903_v62 = vmul.f32 0.5, %v5898_v47  ;;  %v7043_v39 = vpop.f32.mrb[35].mxu0 }
 0x62a   : > { %8094 = vtanh.f32 %v5903_v62 }
 0x634   : > { %v8095_v40 = vpop.eup %8094 }
 0x635   : > { %v5905_v41 = vmul.f32 0.5, %v8095_v40 }
 0x637   : > { %v5906_v44 = vadd.f32 0.5, %v5905_v41 }
 0x639   : > { %v5907_v17 = vpack.c.bf16 %v5906_v44, %v5906_v44 }
 0x63b   : > { %7061 = vmatmul.mubr.bf16.vlgmr.msra.gmra.mrb[36].mxu0 %v5907_v17 }
 0x70e   : > { %v6007_v36 = vpop.f32.mrb[36].mxu0 }
 0x70f   : > { %v6008_v42 = vadd.f32 %v6007_v36, %v5924_v53  ;;  %v7062_v38 = vpop.f32.mrb[37].mxu0 }
 0x710   : > { %v6010_v19 = vpop.f32.mrb[38].mxu0 }
 0x711   : > { %v6013_v46 = vmul.f32 0.5, %v6008_v42  ;;  %v7063_v49 = vpop.f32.mrb[39].mxu0 }
 0x713   : > { %8096 = vtanh.f32 %v6013_v46 }
 0x71d   : > { %v8097_v50 = vpop.eup %8096 }
 0x71e   : > { %v6015_v51 = vmul.f32 0.5, %v8097_v50 }
 0x720   : > { %v6016_v52 = vadd.f32 0.5, %v6015_v51 }
 0x722   : > { %6017 = vst [vmem:[%s486_s30] sm:$0x1] %v6016_v52 }
 0x723 PF: > { %s9427_s12 = sld [smem:[#allocation20_spill]] }
 0x729   : > { %s26_s17 = sadd.s32 1, %s9427_s12  }
 0x72a   : > { %p23_p11 = scmp.ge.s32.totalorder %s26_s17, 4  }
 0x72c   :  { %25 = sbr.rel (!%p23_p11) target bundleno = 7 (0x7), region = 127 }
 0x733   :  { %6035 = vsyncpa [#allocation3], 1 }
 0x734   :  { %6037 = vsyncpa [#allocation3 + $0x1], 1 }
 0x735   :  { %6038 = vsyncpa [#allocation5], 1 }
 0x736   :  { %6039 = vsyncpa [#allocation8], 1 }
 0x737   :  { %6040 = vsyncpa [#allocation11], 1 }
 0x738   :  { %6041 = vsyncpa [#allocation14], 1 }

</bundles_post_ra>
